<compile_context>
chip_gen: v7x
topology: tpu7x:2x2x1
jax: 0.10.0
libtpu: 0.0.40
codegen_flags: <defaults>
</compile_context>

<pallas_src>
import math
from functools import partial

import jax
import jax.numpy as jnp
from jax.experimental import pallas as pl
from jax.experimental.pallas import tpu as pltpu


# ----------------------------- kernel helpers ------------------------------

_GELU_C = math.sqrt(2.0 / math.pi)


def _gelu_tanh(x):
    # TODO(synk): exact erf-GELU (PyTorch nn.GELU default) replaced with the
    # tanh approximation inside the kernel (guaranteed Mosaic/EUP lowering).
    return 0.5 * x * (1.0 + jnp.tanh(_GELU_C * (x + 0.044715 * (x * x * x))))


def _layer_norm(x, g, b, eps=1e-5):
    mu = jnp.mean(x, axis=-1, keepdims=True)
    var = jnp.mean(jnp.square(x - mu), axis=-1, keepdims=True)
    return (x - mu) * jax.lax.rsqrt(var + eps) * g + b


# --------------------------- fused forward kernel --------------------------

def _fused_forward_kernel(patches_ref,
                          pw_ref, pb_ref,
                          ln1g_ref, ln1b_ref,
                          qw_ref, qb_ref, kw_ref, kb_ref, vw_ref, vb_ref,
                          prw_ref, prb_ref,
                          ln2g_ref, ln2b_ref,
                          f1w_ref, f1b_ref, f2w_ref, f2b_ref,
                          hw_ref, hb_ref,
                          o_ref,
                          *, depth, num_heads, compute_dtype):
    """Whole MobileSAM-LoRA forward for one batch element, VMEM resident.

    patch-embed -> [LN1 -> q/k/v -> batched MHA -> proj -> residual ->
    LN2 -> fc1 -> GELU -> fc2 -> residual] x depth -> neck∘head (D->1).
    Matmul operands are cast to `compute_dtype` (bf16) with f32 accumulation;
    LN / softmax / GELU / residual math stays f32 (v5e-safe).
    """
    x = patches_ref[0].astype(compute_dtype)                      # (N, P)
    tok = jnp.dot(x, pw_ref[...],
                  preferred_element_type=jnp.float32) + pb_ref[...]   # (N, D) f32
    N, D = tok.shape
    dh = D // num_heads
    scale = 1.0 / math.sqrt(dh)

    for d in range(depth):                                        # unrolled (depth=2)
        # ---- attention branch ---------------------------------------------
        h = _layer_norm(tok, ln1g_ref[d], ln1b_ref[d])
        hc = h.astype(compute_dtype)
        q = jnp.dot(hc, qw_ref[d], preferred_element_type=jnp.float32) + qb_ref[d]
        k = jnp.dot(hc, kw_ref[d], preferred_element_type=jnp.float32) + kb_ref[d]
        v = jnp.dot(hc, vw_ref[d], preferred_element_type=jnp.float32) + vb_ref[d]

        # (N, D) -> (H, N, dh); one batched dot per stage instead of a
        # per-head Python loop of tiny matmuls.
        qh = q.reshape(N, num_heads, dh).swapaxes(0, 1).astype(compute_dtype)
        kh = k.reshape(N, num_heads, dh).swapaxes(0, 1).astype(compute_dtype)
        vh = v.reshape(N, num_heads, dh).swapaxes(0, 1).astype(compute_dtype)

        s = jnp.einsum('hqd,hkd->hqk', qh, kh,
                       preferred_element_type=jnp.float32) * scale
        s = s - jnp.max(s, axis=-1, keepdims=True)
        e = jnp.exp(s)
        p = e * pl.reciprocal(jnp.sum(e, axis=-1, keepdims=True), approx=True)
        a = jnp.einsum('hqk,hkd->hqd', p.astype(compute_dtype), vh,
                       preferred_element_type=jnp.float32)        # (H, N, dh)
        a = a.swapaxes(0, 1).reshape(N, D)

        attn = jnp.dot(a.astype(compute_dtype), prw_ref[d],
                       preferred_element_type=jnp.float32) + prb_ref[d]
        tok = tok + attn

        # ---- MLP branch -----------------------------------------------------
        h2 = _layer_norm(tok, ln2g_ref[d], ln2b_ref[d])
        m1 = jnp.dot(h2.astype(compute_dtype), f1w_ref[d],
                     preferred_element_type=jnp.float32) + f1b_ref[d]
        m1 = _gelu_tanh(m1)
        m2 = jnp.dot(m1.astype(compute_dtype), f2w_ref[d],
                     preferred_element_type=jnp.float32) + f2b_ref[d]
        tok = tok + m2

    # ---- composed neck (D->256) ∘ temp_decoder_head (256->1) == dense D->1.
    head = jnp.dot(tok.astype(compute_dtype), hw_ref[...],
                   preferred_element_type=jnp.float32) + hb_ref[...]   # (N, 1)
    o_ref[0] = head.astype(o_ref.dtype)


# ------------------------------ plain-JAX glue ------------------------------

PIXEL_MEAN = jnp.array([123.675, 116.28, 103.53], jnp.float32).reshape(1, 3, 1, 1)
PIXEL_STD = jnp.array([58.395, 57.12, 57.375], jnp.float32).reshape(1, 3, 1, 1)


def preprocess(image, img_size):
    """Sam.preprocess: normalize then pad bottom/right to (img_size, img_size)."""
    x = (image - PIXEL_MEAN) / PIXEL_STD
    _, _, H, W = x.shape
    return jnp.pad(x, ((0, 0), (0, 0), (0, img_size - H), (0, img_size - W)))


def bilinear_resize_nchw(x, out_h, out_w):
    """Matches F.interpolate(mode='bilinear', align_corners=False)."""
    # TODO(synk): gather-based bilinear upsample kept in plain JAX.
    B, C, h, w = x.shape
    sy, sx = h / out_h, w / out_w
    ys = jnp.maximum((jnp.arange(out_h, dtype=jnp.float32) + 0.5) * sy - 0.5, 0.0)
    xs = jnp.maximum((jnp.arange(out_w, dtype=jnp.float32) + 0.5) * sx - 0.5, 0.0)
    y0 = jnp.floor(ys).astype(jnp.int32)
    x0 = jnp.floor(xs).astype(jnp.int32)
    y1 = jnp.minimum(y0 + 1, h - 1)
    x1 = jnp.minimum(x0 + 1, w - 1)
    wy = (ys - y0.astype(jnp.float32))[None, None, :, None]
    wx = (xs - x0.astype(jnp.float32))[None, None, None, :]
    g = lambda yi, xi: x[:, :, yi][:, :, :, xi]
    top = g(y0, x0) * (1.0 - wx) + g(y0, x1) * wx
    bot = g(y1, x0) * (1.0 - wx) + g(y1, x1) * wx
    return top * (1.0 - wy) + bot * wy


# ------------------------------- parameters --------------------------------

def init_params(key, *, cin=3, patch=8, dim=64, depth=2, mlp_dim=256, r=4,
                neck_dim=256):
    keys = iter(jax.random.split(key, 64))

    def lin(d_in, d_out):
        bound = 1.0 / math.sqrt(d_in)
        w = jax.random.uniform(next(keys), (d_in, d_out), jnp.float32, -bound, bound)
        b = jax.random.uniform(next(keys), (1, d_out), jnp.float32, -bound, bound)
        return w, b

    def lora(d_in, d_out):
        # lora_A ~ kaiming_uniform(a=sqrt(5)) -> U(-1/sqrt(d_in), 1/sqrt(d_in));
        # lora_B zero-initialised, exactly matching the PyTorch LoRALinear.
        a = jax.random.uniform(next(keys), (d_in, r), jnp.float32,
                               -1.0 / math.sqrt(d_in), 1.0 / math.sqrt(d_in))
        bm = jnp.zeros((r, d_out), jnp.float32)
        return a, bm

    params = {}
    params['patch_w'], params['patch_b'] = lin(cin * patch * patch, dim)
    blocks = []
    for _ in range(depth):
        blk = {}
        blk['ln1_g'] = jnp.ones((1, dim), jnp.float32)
        blk['ln1_b'] = jnp.zeros((1, dim), jnp.float32)
        blk['qkv_w'], blk['qkv_b'] = lin(dim, 3 * dim)
        blk['qkv_A'], blk['qkv_B'] = lora(dim, 3 * dim)
        blk['proj_w'], blk['proj_b'] = lin(dim, dim)
        blk['proj_A'], blk['proj_B'] = lora(dim, dim)
        blk['ln2_g'] = jnp.ones((1, dim), jnp.float32)
        blk['ln2_b'] = jnp.zeros((1, dim), jnp.float32)
        blk['fc1_w'], blk['fc1_b'] = lin(dim, mlp_dim)
        blk['fc1_A'], blk['fc1_B'] = lora(dim, mlp_dim)
        blk['fc2_w'], blk['fc2_b'] = lin(mlp_dim, dim)
        blk['fc2_A'], blk['fc2_B'] = lora(mlp_dim, dim)
        blocks.append(blk)
    params['blocks'] = blocks
    params['neck_w'], params['neck_b'] = lin(dim, neck_dim)     # 1x1 conv -> 256
    params['head_w'], params['head_b'] = lin(neck_dim, 1)       # temp_decoder_head
    return params


def prepare_inference_params(params, *, r=4, lora_alpha=4,
                             compute_dtype=jnp.bfloat16):
    """One-time host-side prep (hoisted out of the per-call forward):
    merge LoRA into base weights, split qkv into q/k/v, stack per-block
    weights along a depth axis, compose neck∘head, cast matmul weights bf16.
    x @ W + scaling * ((x @ A) @ B) == x @ (W + scaling * A @ B)."""
    scaling = lora_alpha / r if r > 0 else 0.0
    D = params['patch_w'].shape[1]

    def merge(w, a, bm):
        return w + scaling * (a @ bm)

    acc = {k: [] for k in ('qw', 'qb', 'kw', 'kb', 'vw', 'vb', 'prw', 'prb',
                           'ln1g', 'ln1b', 'ln2g', 'ln2b',
                           'f1w', 'f1b', 'f2w', 'f2b')}
    for blk in params['blocks']:
        qkv_w = merge(blk['qkv_w'], blk['qkv_A'], blk['qkv_B'])
        qkv_b = blk['qkv_b']
        acc['qw'].append(qkv_w[:, :D]);        acc['qb'].append(qkv_b[:, :D])
        acc['kw'].append(qkv_w[:, D:2 * D]);   acc['kb'].append(qkv_b[:, D:2 * D])
        acc['vw'].append(qkv_w[:, 2 * D:]);    acc['vb'].append(qkv_b[:, 2 * D:])
        acc['prw'].append(merge(blk['proj_w'], blk['proj_A'], blk['proj_B']))
        acc['prb'].append(blk['proj_b'])
        acc['ln1g'].append(blk['ln1_g']);      acc['ln1b'].append(blk['ln1_b'])
        acc['ln2g'].append(blk['ln2_g']);      acc['ln2b'].append(blk['ln2_b'])
        acc['f1w'].append(merge(blk['fc1_w'], blk['fc1_A'], blk['fc1_B']))
        acc['f1b'].append(blk['fc1_b'])
        acc['f2w'].append(merge(blk['fc2_w'], blk['fc2_A'], blk['fc2_B']))
        acc['f2b'].append(blk['fc2_b'])

    stk = lambda xs: jnp.stack(xs, axis=0)
    bf = lambda x: x.astype(compute_dtype)
    prep = {
        'patch_w': bf(params['patch_w']), 'patch_b': params['patch_b'],
        'ln1g': stk(acc['ln1g']), 'ln1b': stk(acc['ln1b']),
        'qw': bf(stk(acc['qw'])), 'qb': stk(acc['qb']),
        'kw': bf(stk(acc['kw'])), 'kb': stk(acc['kb']),
        'vw': bf(stk(acc['vw'])), 'vb': stk(acc['vb']),
        'prw': bf(stk(acc['prw'])), 'prb': stk(acc['prb']),
        'ln2g': stk(acc['ln2g']), 'ln2b': stk(acc['ln2b']),
        'f1w': bf(stk(acc['f1w'])), 'f1b': stk(acc['f1b']),
        'f2w': bf(stk(acc['f2w'])), 'f2b': stk(acc['f2b']),
        # NOTE: valid only because this synthetic stand-in has no norm between
        # neck and head (the real MobileSAM neck has LayerNorm2d).
        'head_w': bf(params['neck_w'] @ params['head_w']),                 # (D, 1)
        'head_b': params['neck_b'] @ params['head_w'] + params['head_b'],  # (1, 1)
    }
    return prep


# --------------------------------- forward ---------------------------------

def mobilesam_lora_forward(prep, image, *, img_size=32, patch=8, num_heads=4,
                           compute_dtype=jnp.bfloat16):
    """MobileSAM_LoRA_Adapted.forward -> (outputs, iou_pred=None)."""
    B, Cin, H0, W0 = image.shape

    # ---- self.model.preprocess(image)
    x = preprocess(image, img_size)

    # ---- patch extraction (Conv2d(k=patch, s=patch) == dense over patches)
    gh = gw = img_size // patch
    N = gh * gw
    P = Cin * patch * patch
    xp = x.reshape(B, Cin, gh, patch, gw, patch)
    xp = xp.transpose(0, 2, 4, 1, 3, 5).reshape(B, N, P)

    depth, D, _ = prep['qw'].shape

    def cspec(arr):
        if arr.ndim == 2:
            return pl.BlockSpec(arr.shape, lambda b: (0, 0))
        return pl.BlockSpec(arr.shape, lambda b: (0, 0, 0))

    weights = [prep['patch_w'], prep['patch_b'],
               prep['ln1g'], prep['ln1b'],
               prep['qw'], prep['qb'], prep['kw'], prep['kb'],
               prep['vw'], prep['vb'], prep['prw'], prep['prb'],
               prep['ln2g'], prep['ln2b'],
               prep['f1w'], prep['f1b'], prep['f2w'], prep['f2b'],
               prep['head_w'], prep['head_b']]

    # ---- image_encoder + neck + temp_decoder_head: ONE fused pallas_call.
    out = pl.pallas_call(
        partial(_fused_forward_kernel, depth=depth, num_heads=num_heads,
                compute_dtype=compute_dtype),
        out_shape=jax.ShapeDtypeStruct((B, N, 1), jnp.float32),
        grid=(B,),
        in_specs=[pl.BlockSpec((1, N, P), lambda b: (b, 0, 0))]
                 + [cspec(w) for w in weights],
        out_specs=pl.BlockSpec((1, N, 1), lambda b: (b, 0, 0)),
        compiler_params=pltpu.CompilerParams(dimension_semantics=("parallel",)),
    )(xp, *weights)

    masks_lr = out.reshape(B, gh, gw)[:, None, :, :]          # (B, 1, gh, gw)

    # ---- F.interpolate(..., size=image.shape[-2:], mode='bilinear',
    #                    align_corners=False)
    outputs = bilinear_resize_nchw(masks_lr, H0, W0)           # (B, 1, H, W)
    iou_pred = None
    return outputs, iou_pred


# ----------------------------------- main -----------------------------------

if __name__ == "__main__":
    key = jax.random.PRNGKey(0)
    pkey, ikey = jax.random.split(key)
    params = init_params(pkey)
    # LoRA merge / qkv split / neck∘head composition / bf16 cast hoisted out
    # of the jitted forward (done once).
    prep = prepare_inference_params(params)

    B, C, H, W = 2, 3, 32, 32
    image = jax.random.uniform(ikey, (B, C, H, W), jnp.float32, 0.0, 255.0)

    fwd = jax.jit(mobilesam_lora_forward)
    outputs, iou_pred = fwd(prep, image)
    jax.block_until_ready(outputs)

    assert outputs.shape == (B, 1, H, W), outputs.shape
    assert iou_pred is None
    assert bool(jnp.all(jnp.isfinite(outputs)))
    print("KERNEL_OK")
</pallas_src>

<mosaic_0001>
module attributes {stable_mosaic.version = 11 : i64} {
  func.func @_fused_forward_kernel(%arg0: i32, %arg1: memref<1x16x192xf32, #tpu.memory_space<vmem>>, %arg2: memref<192x64xbf16, #tpu.memory_space<vmem>>, %arg3: memref<1x64xf32, #tpu.memory_space<vmem>>, %arg4: memref<2x1x64xf32, #tpu.memory_space<vmem>>, %arg5: memref<2x1x64xf32, #tpu.memory_space<vmem>>, %arg6: memref<2x64x64xbf16, #tpu.memory_space<vmem>>, %arg7: memref<2x1x64xf32, #tpu.memory_space<vmem>>, %arg8: memref<2x64x64xbf16, #tpu.memory_space<vmem>>, %arg9: memref<2x1x64xf32, #tpu.memory_space<vmem>>, %arg10: memref<2x64x64xbf16, #tpu.memory_space<vmem>>, %arg11: memref<2x1x64xf32, #tpu.memory_space<vmem>>, %arg12: memref<2x64x64xbf16, #tpu.memory_space<vmem>>, %arg13: memref<2x1x64xf32, #tpu.memory_space<vmem>>, %arg14: memref<2x1x64xf32, #tpu.memory_space<vmem>>, %arg15: memref<2x1x64xf32, #tpu.memory_space<vmem>>, %arg16: memref<2x64x256xbf16, #tpu.memory_space<vmem>>, %arg17: memref<2x1x256xf32, #tpu.memory_space<vmem>>, %arg18: memref<2x256x64xbf16, #tpu.memory_space<vmem>>, %arg19: memref<2x1x64xf32, #tpu.memory_space<vmem>>, %arg20: memref<64x1xbf16, #tpu.memory_space<vmem>>, %arg21: memref<1x1xf32, #tpu.memory_space<vmem>>, %arg22: memref<1x16x1xf32, #tpu.memory_space<vmem>>) attributes {dimension_semantics = [#tpu.dimension_semantics<parallel>], iteration_bounds = array<i64: 2>, scalar_prefetch = 0 : i64, scratch_operands = 0 : i64, tpu.core_type = #tpu.core_type<tc>, window_params = [{transform_indices = @transform_0, window_bounds = array<i64: 1, 16, 192>}, {pipeline_mode = #tpu.pipeline_mode<synchronous>, transform_indices = @transform_1, window_bounds = array<i64: 192, 64>}, {pipeline_mode = #tpu.pipeline_mode<synchronous>, transform_indices = @transform_2, window_bounds = array<i64: 1, 64>}, {pipeline_mode = #tpu.pipeline_mode<synchronous>, transform_indices = @transform_3, window_bounds = array<i64: 2, 1, 64>}, {pipeline_mode = #tpu.pipeline_mode<synchronous>, transform_indices = @transform_4, window_bounds = array<i64: 2, 1, 64>}, {pipeline_mode = #tpu.pipeline_mode<synchronous>, transform_indices = @transform_5, window_bounds = array<i64: 2, 64, 64>}, {pipeline_mode = #tpu.pipeline_mode<synchronous>, transform_indices = @transform_6, window_bounds = array<i64: 2, 1, 64>}, {pipeline_mode = #tpu.pipeline_mode<synchronous>, transform_indices = @transform_7, window_bounds = array<i64: 2, 64, 64>}, {pipeline_mode = #tpu.pipeline_mode<synchronous>, transform_indices = @transform_8, window_bounds = array<i64: 2, 1, 64>}, {pipeline_mode = #tpu.pipeline_mode<synchronous>, transform_indices = @transform_9, window_bounds = array<i64: 2, 64, 64>}, {pipeline_mode = #tpu.pipeline_mode<synchronous>, transform_indices = @transform_10, window_bounds = array<i64: 2, 1, 64>}, {pipeline_mode = #tpu.pipeline_mode<synchronous>, transform_indices = @transform_11, window_bounds = array<i64: 2, 64, 64>}, {pipeline_mode = #tpu.pipeline_mode<synchronous>, transform_indices = @transform_12, window_bounds = array<i64: 2, 1, 64>}, {pipeline_mode = #tpu.pipeline_mode<synchronous>, transform_indices = @transform_13, window_bounds = array<i64: 2, 1, 64>}, {pipeline_mode = #tpu.pipeline_mode<synchronous>, transform_indices = @transform_14, window_bounds = array<i64: 2, 1, 64>}, {pipeline_mode = #tpu.pipeline_mode<synchronous>, transform_indices = @transform_15, window_bounds = array<i64: 2, 64, 256>}, {pipeline_mode = #tpu.pipeline_mode<synchronous>, transform_indices = @transform_16, window_bounds = array<i64: 2, 1, 256>}, {pipeline_mode = #tpu.pipeline_mode<synchronous>, transform_indices = @transform_17, window_bounds = array<i64: 2, 256, 64>}, {pipeline_mode = #tpu.pipeline_mode<synchronous>, transform_indices = @transform_18, window_bounds = array<i64: 2, 1, 64>}, {pipeline_mode = #tpu.pipeline_mode<synchronous>, transform_indices = @transform_19, window_bounds = array<i64: 64, 1>}, {pipeline_mode = #tpu.pipeline_mode<synchronous>, transform_indices = @transform_20, window_bounds = array<i64: 1, 1>}, {transform_indices = @transform_21, window_bounds = array<i64: 1, 16, 1>}]} {
    %c0 = arith.constant 0 : index
    %c0_0 = arith.constant 0 : index
    %c0_1 = arith.constant 0 : index
    %0 = vector.load %arg1[%c0, %c0_0, %c0_1] : memref<1x16x192xf32, #tpu.memory_space<vmem>>, vector<1x16x192xf32>
    %1 = vector.shape_cast %0 : vector<1x16x192xf32> to vector<16x192xf32>
    %2 = arith.truncf %1 : vector<16x192xf32> to vector<16x192xbf16>
    %c0_2 = arith.constant 0 : index
    %c0_3 = arith.constant 0 : index
    %3 = vector.load %arg2[%c0_2, %c0_3] : memref<192x64xbf16, #tpu.memory_space<vmem>>, vector<192x64xbf16>
    %cst = arith.constant dense<0.000000e+00> : vector<16x64xf32>
    %4 = tpu.matmul %2, %3, %cst {dimension_numbers = #tpu.dot_dimension_numbers<[1], [0], [0], [1], [0, 0, 1, 1], [], []>} : vector<16x192xbf16>, vector<192x64xbf16>, vector<16x64xf32> -> vector<16x64xf32>
    %c0_4 = arith.constant 0 : index
    %c0_5 = arith.constant 0 : index
    %5 = vector.load %arg3[%c0_4, %c0_5] : memref<1x64xf32, #tpu.memory_space<vmem>>, vector<1x64xf32>
    %6 = vector.broadcast %5 : vector<1x64xf32> to vector<16x64xf32>
    %7 = arith.addf %4, %6 : vector<16x64xf32>
    %c0_6 = arith.constant 0 : index
    %c0_7 = arith.constant 0 : index
    %c0_8 = arith.constant 0 : index
    %8 = vector.load %arg4[%c0_6, %c0_7, %c0_8] : memref<2x1x64xf32, #tpu.memory_space<vmem>>, vector<1x1x64xf32>
    %9 = vector.shape_cast %8 : vector<1x1x64xf32> to vector<1x64xf32>
    %c0_9 = arith.constant 0 : index
    %c0_10 = arith.constant 0 : index
    %c0_11 = arith.constant 0 : index
    %10 = vector.load %arg5[%c0_9, %c0_10, %c0_11] : memref<2x1x64xf32, #tpu.memory_space<vmem>>, vector<1x1x64xf32>
    %11 = vector.shape_cast %10 : vector<1x1x64xf32> to vector<1x64xf32>
    %cst_12 = arith.constant dense<0.000000e+00> : vector<16xf32>
    %12 = vector.multi_reduction <add>, %7, %cst_12 [1] : vector<16x64xf32> to vector<16xf32>
    %13 = vector.shape_cast %12 : vector<16xf32> to vector<16x1xf32>
    %cst_13 = arith.constant 6.400000e+01 : f32
    %14 = vector.broadcast %cst_13 : f32 to vector<16x1xf32>
    %15 = arith.divf %13, %14 : vector<16x1xf32>
    %16 = vector.broadcast %15 : vector<16x1xf32> to vector<16x64xf32>
    %17 = arith.subf %7, %16 : vector<16x64xf32>
    %18 = arith.mulf %17, %17 : vector<16x64xf32>
    %cst_14 = arith.constant dense<0.000000e+00> : vector<16xf32>
    %19 = vector.multi_reduction <add>, %18, %cst_14 [1] : vector<16x64xf32> to vector<16xf32>
    %20 = vector.shape_cast %19 : vector<16xf32> to vector<16x1xf32>
    %cst_15 = arith.constant 6.400000e+01 : f32
    %21 = vector.broadcast %cst_15 : f32 to vector<16x1xf32>
    %22 = arith.divf %20, %21 : vector<16x1xf32>
    %23 = vector.broadcast %15 : vector<16x1xf32> to vector<16x64xf32>
    %24 = arith.subf %7, %23 : vector<16x64xf32>
    %cst_16 = arith.constant 9.99999974E-6 : f32
    %25 = vector.broadcast %cst_16 : f32 to vector<16x1xf32>
    %26 = arith.addf %22, %25 : vector<16x1xf32>
    %27 = math.rsqrt %26 : vector<16x1xf32>
    %28 = vector.broadcast %27 : vector<16x1xf32> to vector<16x64xf32>
    %29 = arith.mulf %24, %28 : vector<16x64xf32>
    %30 = vector.broadcast %9 : vector<1x64xf32> to vector<16x64xf32>
    %31 = arith.mulf %29, %30 : vector<16x64xf32>
    %32 = vector.broadcast %11 : vector<1x64xf32> to vector<16x64xf32>
    %33 = arith.addf %31, %32 : vector<16x64xf32>
    %34 = arith.truncf %33 : vector<16x64xf32> to vector<16x64xbf16>
    %c0_17 = arith.constant 0 : index
    %c0_18 = arith.constant 0 : index
    %c0_19 = arith.constant 0 : index
    %35 = vector.load %arg6[%c0_17, %c0_18, %c0_19] : memref<2x64x64xbf16, #tpu.memory_space<vmem>>, vector<1x64x64xbf16>
    %36 = vector.shape_cast %35 : vector<1x64x64xbf16> to vector<64x64xbf16>
    %cst_20 = arith.constant dense<0.000000e+00> : vector<16x64xf32>
    %37 = tpu.matmul %34, %36, %cst_20 {dimension_numbers = #tpu.dot_dimension_numbers<[1], [0], [0], [1], [0, 0, 1, 1], [], []>} : vector<16x64xbf16>, vector<64x64xbf16>, vector<16x64xf32> -> vector<16x64xf32>
    %c0_21 = arith.constant 0 : index
    %c0_22 = arith.constant 0 : index
    %c0_23 = arith.constant 0 : index
    %38 = vector.load %arg7[%c0_21, %c0_22, %c0_23] : memref<2x1x64xf32, #tpu.memory_space<vmem>>, vector<1x1x64xf32>
    %39 = vector.shape_cast %38 : vector<1x1x64xf32> to vector<1x64xf32>
    %40 = vector.broadcast %39 : vector<1x64xf32> to vector<16x64xf32>
    %41 = arith.addf %37, %40 : vector<16x64xf32>
    %c0_24 = arith.constant 0 : index
    %c0_25 = arith.constant 0 : index
    %c0_26 = arith.constant 0 : index
    %42 = vector.load %arg8[%c0_24, %c0_25, %c0_26] : memref<2x64x64xbf16, #tpu.memory_space<vmem>>, vector<1x64x64xbf16>
    %43 = vector.shape_cast %42 : vector<1x64x64xbf16> to vector<64x64xbf16>
    %cst_27 = arith.constant dense<0.000000e+00> : vector<16x64xf32>
    %44 = tpu.matmul %34, %43, %cst_27 {dimension_numbers = #tpu.dot_dimension_numbers<[1], [0], [0], [1], [0, 0, 1, 1], [], []>} : vector<16x64xbf16>, vector<64x64xbf16>, vector<16x64xf32> -> vector<16x64xf32>
    %c0_28 = arith.constant 0 : index
    %c0_29 = arith.constant 0 : index
    %c0_30 = arith.constant 0 : index
    %45 = vector.load %arg9[%c0_28, %c0_29, %c0_30] : memref<2x1x64xf32, #tpu.memory_space<vmem>>, vector<1x1x64xf32>
    %46 = vector.shape_cast %45 : vector<1x1x64xf32> to vector<1x64xf32>
    %47 = vector.broadcast %46 : vector<1x64xf32> to vector<16x64xf32>
    %48 = arith.addf %44, %47 : vector<16x64xf32>
    %c0_31 = arith.constant 0 : index
    %c0_32 = arith.constant 0 : index
    %c0_33 = arith.constant 0 : index
    %49 = vector.load %arg10[%c0_31, %c0_32, %c0_33] : memref<2x64x64xbf16, #tpu.memory_space<vmem>>, vector<1x64x64xbf16>
    %50 = vector.shape_cast %49 : vector<1x64x64xbf16> to vector<64x64xbf16>
    %cst_34 = arith.constant dense<0.000000e+00> : vector<16x64xf32>
    %51 = tpu.matmul %34, %50, %cst_34 {dimension_numbers = #tpu.dot_dimension_numbers<[1], [0], [0], [1], [0, 0, 1, 1], [], []>} : vector<16x64xbf16>, vector<64x64xbf16>, vector<16x64xf32> -> vector<16x64xf32>
    %c0_35 = arith.constant 0 : index
    %c0_36 = arith.constant 0 : index
    %c0_37 = arith.constant 0 : index
    %52 = vector.load %arg11[%c0_35, %c0_36, %c0_37] : memref<2x1x64xf32, #tpu.memory_space<vmem>>, vector<1x1x64xf32>
    %53 = vector.shape_cast %52 : vector<1x1x64xf32> to vector<1x64xf32>
    %54 = vector.broadcast %53 : vector<1x64xf32> to vector<16x64xf32>
    %55 = arith.addf %51, %54 : vector<16x64xf32>
    %56 = vector.shape_cast %41 : vector<16x64xf32> to vector<16x4x16xf32>
    %57 = tpu.transpose %56, [1, 0, 2] : vector<16x4x16xf32> -> vector<4x16x16xf32>
    %58 = arith.truncf %57 : vector<4x16x16xf32> to vector<4x16x16xbf16>
    %59 = vector.shape_cast %48 : vector<16x64xf32> to vector<16x4x16xf32>
    %60 = tpu.transpose %59, [1, 0, 2] : vector<16x4x16xf32> -> vector<4x16x16xf32>
    %61 = arith.truncf %60 : vector<4x16x16xf32> to vector<4x16x16xbf16>
    %62 = vector.shape_cast %55 : vector<16x64xf32> to vector<16x4x16xf32>
    %63 = tpu.transpose %62, [1, 0, 2] : vector<16x4x16xf32> -> vector<4x16x16xf32>
    %64 = arith.truncf %63 : vector<4x16x16xf32> to vector<4x16x16xbf16>
    "tpu.trace_start"() <{level = 10 : i32, message = "hqd,hkd->hqk"}> : () -> ()
    %cst_38 = arith.constant dense<0.000000e+00> : vector<4x16x16xf32>
    %65 = tpu.matmul %58, %61, %cst_38 {dimension_numbers = #tpu.dot_dimension_numbers<[2], [2], [1], [1], [0, 0, 0, 1, 1, 1], [0], [0]>} : vector<4x16x16xbf16>, vector<4x16x16xbf16>, vector<4x16x16xf32> -> vector<4x16x16xf32>
    "tpu.trace_stop"() : () -> ()
    %cst_39 = arith.constant 2.500000e-01 : f32
    %66 = vector.broadcast %cst_39 : f32 to vector<4x16x16xf32>
    %67 = arith.mulf %65, %66 : vector<4x16x16xf32>
    %cst_40 = arith.constant dense<0xFF800000> : vector<4x16xf32>
    %68 = vector.multi_reduction <maximumf>, %67, %cst_40 [2] : vector<4x16x16xf32> to vector<4x16xf32>
    %69 = vector.shape_cast %68 : vector<4x16xf32> to vector<4x16x1xf32>
    %70 = vector.broadcast %69 : vector<4x16x1xf32> to vector<4x16x16xf32>
    %71 = arith.subf %67, %70 : vector<4x16x16xf32>
    %72 = math.exp %71 : vector<4x16x16xf32>
    %cst_41 = arith.constant dense<0.000000e+00> : vector<4x16xf32>
    %73 = vector.multi_reduction <add>, %72, %cst_41 [2] : vector<4x16x16xf32> to vector<4x16xf32>
    %74 = vector.shape_cast %73 : vector<4x16xf32> to vector<4x16x1xf32>
    %75 = tpu.reciprocal %74 {approx = true} : vector<4x16x1xf32> -> vector<4x16x1xf32>
    %76 = vector.broadcast %75 : vector<4x16x1xf32> to vector<4x16x16xf32>
    %77 = arith.mulf %72, %76 : vector<4x16x16xf32>
    %78 = arith.truncf %77 : vector<4x16x16xf32> to vector<4x16x16xbf16>
    "tpu.trace_start"() <{level = 10 : i32, message = "hqk,hkd->hqd"}> : () -> ()
    %cst_42 = arith.constant dense<0.000000e+00> : vector<4x16x16xf32>
    %79 = tpu.matmul %78, %64, %cst_42 {dimension_numbers = #tpu.dot_dimension_numbers<[2], [1], [1], [2], [0, 0, 0, 1, 1, 2], [0], [0]>} : vector<4x16x16xbf16>, vector<4x16x16xbf16>, vector<4x16x16xf32> -> vector<4x16x16xf32>
    "tpu.trace_stop"() : () -> ()
    %80 = tpu.transpose %79, [1, 0, 2] : vector<4x16x16xf32> -> vector<16x4x16xf32>
    %81 = vector.shape_cast %80 : vector<16x4x16xf32> to vector<16x64xf32>
    %82 = arith.truncf %81 : vector<16x64xf32> to vector<16x64xbf16>
    %c0_43 = arith.constant 0 : index
    %c0_44 = arith.constant 0 : index
    %c0_45 = arith.constant 0 : index
    %83 = vector.load %arg12[%c0_43, %c0_44, %c0_45] : memref<2x64x64xbf16, #tpu.memory_space<vmem>>, vector<1x64x64xbf16>
    %84 = vector.shape_cast %83 : vector<1x64x64xbf16> to vector<64x64xbf16>
    %cst_46 = arith.constant dense<0.000000e+00> : vector<16x64xf32>
    %85 = tpu.matmul %82, %84, %cst_46 {dimension_numbers = #tpu.dot_dimension_numbers<[1], [0], [0], [1], [0, 0, 1, 1], [], []>} : vector<16x64xbf16>, vector<64x64xbf16>, vector<16x64xf32> -> vector<16x64xf32>
    %c0_47 = arith.constant 0 : index
    %c0_48 = arith.constant 0 : index
    %c0_49 = arith.constant 0 : index
    %86 = vector.load %arg13[%c0_47, %c0_48, %c0_49] : memref<2x1x64xf32, #tpu.memory_space<vmem>>, vector<1x1x64xf32>
    %87 = vector.shape_cast %86 : vector<1x1x64xf32> to vector<1x64xf32>
    %88 = vector.broadcast %87 : vector<1x64xf32> to vector<16x64xf32>
    %89 = arith.addf %85, %88 : vector<16x64xf32>
    %90 = arith.addf %7, %89 : vector<16x64xf32>
    %c0_50 = arith.constant 0 : index
    %c0_51 = arith.constant 0 : index
    %c0_52 = arith.constant 0 : index
    %91 = vector.load %arg14[%c0_50, %c0_51, %c0_52] : memref<2x1x64xf32, #tpu.memory_space<vmem>>, vector<1x1x64xf32>
    %92 = vector.shape_cast %91 : vector<1x1x64xf32> to vector<1x64xf32>
    %c0_53 = arith.constant 0 : index
    %c0_54 = arith.constant 0 : index
    %c0_55 = arith.constant 0 : index
    %93 = vector.load %arg15[%c0_53, %c0_54, %c0_55] : memref<2x1x64xf32, #tpu.memory_space<vmem>>, vector<1x1x64xf32>
    %94 = vector.shape_cast %93 : vector<1x1x64xf32> to vector<1x64xf32>
    %cst_56 = arith.constant dense<0.000000e+00> : vector<16xf32>
    %95 = vector.multi_reduction <add>, %90, %cst_56 [1] : vector<16x64xf32> to vector<16xf32>
    %96 = vector.shape_cast %95 : vector<16xf32> to vector<16x1xf32>
    %cst_57 = arith.constant 6.400000e+01 : f32
    %97 = vector.broadcast %cst_57 : f32 to vector<16x1xf32>
    %98 = arith.divf %96, %97 : vector<16x1xf32>
    %99 = vector.broadcast %98 : vector<16x1xf32> to vector<16x64xf32>
    %100 = arith.subf %90, %99 : vector<16x64xf32>
    %101 = arith.mulf %100, %100 : vector<16x64xf32>
    %cst_58 = arith.constant dense<0.000000e+00> : vector<16xf32>
    %102 = vector.multi_reduction <add>, %101, %cst_58 [1] : vector<16x64xf32> to vector<16xf32>
    %103 = vector.shape_cast %102 : vector<16xf32> to vector<16x1xf32>
    %cst_59 = arith.constant 6.400000e+01 : f32
    %104 = vector.broadcast %cst_59 : f32 to vector<16x1xf32>
    %105 = arith.divf %103, %104 : vector<16x1xf32>
    %106 = vector.broadcast %98 : vector<16x1xf32> to vector<16x64xf32>
    %107 = arith.subf %90, %106 : vector<16x64xf32>
    %cst_60 = arith.constant 9.99999974E-6 : f32
    %108 = vector.broadcast %cst_60 : f32 to vector<16x1xf32>
    %109 = arith.addf %105, %108 : vector<16x1xf32>
    %110 = math.rsqrt %109 : vector<16x1xf32>
    %111 = vector.broadcast %110 : vector<16x1xf32> to vector<16x64xf32>
    %112 = arith.mulf %107, %111 : vector<16x64xf32>
    %113 = vector.broadcast %92 : vector<1x64xf32> to vector<16x64xf32>
    %114 = arith.mulf %112, %113 : vector<16x64xf32>
    %115 = vector.broadcast %94 : vector<1x64xf32> to vector<16x64xf32>
    %116 = arith.addf %114, %115 : vector<16x64xf32>
    %117 = arith.truncf %116 : vector<16x64xf32> to vector<16x64xbf16>
    %c0_61 = arith.constant 0 : index
    %c0_62 = arith.constant 0 : index
    %c0_63 = arith.constant 0 : index
    %118 = vector.load %arg16[%c0_61, %c0_62, %c0_63] : memref<2x64x256xbf16, #tpu.memory_space<vmem>>, vector<1x64x256xbf16>
    %119 = vector.shape_cast %118 : vector<1x64x256xbf16> to vector<64x256xbf16>
    %cst_64 = arith.constant dense<0.000000e+00> : vector<16x256xf32>
    %120 = tpu.matmul %117, %119, %cst_64 {dimension_numbers = #tpu.dot_dimension_numbers<[1], [0], [0], [1], [0, 0, 1, 1], [], []>} : vector<16x64xbf16>, vector<64x256xbf16>, vector<16x256xf32> -> vector<16x256xf32>
    %c0_65 = arith.constant 0 : index
    %c0_66 = arith.constant 0 : index
    %c0_67 = arith.constant 0 : index
    %121 = vector.load %arg17[%c0_65, %c0_66, %c0_67] : memref<2x1x256xf32, #tpu.memory_space<vmem>>, vector<1x1x256xf32>
    %122 = vector.shape_cast %121 : vector<1x1x256xf32> to vector<1x256xf32>
    %123 = vector.broadcast %122 : vector<1x256xf32> to vector<16x256xf32>
    %124 = arith.addf %120, %123 : vector<16x256xf32>
    %cst_68 = arith.constant 5.000000e-01 : f32
    %125 = vector.broadcast %cst_68 : f32 to vector<16x256xf32>
    %126 = arith.mulf %125, %124 : vector<16x256xf32>
    %127 = arith.mulf %124, %124 : vector<16x256xf32>
    %128 = arith.mulf %127, %124 : vector<16x256xf32>
    %cst_69 = arith.constant 4.471500e-02 : f32
    %129 = vector.broadcast %cst_69 : f32 to vector<16x256xf32>
    %130 = arith.mulf %129, %128 : vector<16x256xf32>
    %131 = arith.addf %124, %130 : vector<16x256xf32>
    %cst_70 = arith.constant 0.797884583 : f32
    %132 = vector.broadcast %cst_70 : f32 to vector<16x256xf32>
    %133 = arith.mulf %132, %131 : vector<16x256xf32>
    %134 = math.tanh %133 : vector<16x256xf32>
    %cst_71 = arith.constant 1.000000e+00 : f32
    %135 = vector.broadcast %cst_71 : f32 to vector<16x256xf32>
    %136 = arith.addf %135, %134 : vector<16x256xf32>
    %137 = arith.mulf %126, %136 : vector<16x256xf32>
    %138 = arith.truncf %137 : vector<16x256xf32> to vector<16x256xbf16>
    %c0_72 = arith.constant 0 : index
    %c0_73 = arith.constant 0 : index
    %c0_74 = arith.constant 0 : index
    %139 = vector.load %arg18[%c0_72, %c0_73, %c0_74] : memref<2x256x64xbf16, #tpu.memory_space<vmem>>, vector<1x256x64xbf16>
    %140 = vector.shape_cast %139 : vector<1x256x64xbf16> to vector<256x64xbf16>
    %cst_75 = arith.constant dense<0.000000e+00> : vector<16x64xf32>
    %141 = tpu.matmul %138, %140, %cst_75 {dimension_numbers = #tpu.dot_dimension_numbers<[1], [0], [0], [1], [0, 0, 1, 1], [], []>} : vector<16x256xbf16>, vector<256x64xbf16>, vector<16x64xf32> -> vector<16x64xf32>
    %c0_76 = arith.constant 0 : index
    %c0_77 = arith.constant 0 : index
    %c0_78 = arith.constant 0 : index
    %142 = vector.load %arg19[%c0_76, %c0_77, %c0_78] : memref<2x1x64xf32, #tpu.memory_space<vmem>>, vector<1x1x64xf32>
    %143 = vector.shape_cast %142 : vector<1x1x64xf32> to vector<1x64xf32>
    %144 = vector.broadcast %143 : vector<1x64xf32> to vector<16x64xf32>
    %145 = arith.addf %141, %144 : vector<16x64xf32>
    %146 = arith.addf %90, %145 : vector<16x64xf32>
    %c1 = arith.constant 1 : index
    %c0_79 = arith.constant 0 : index
    %c0_80 = arith.constant 0 : index
    %147 = vector.load %arg4[%c1, %c0_79, %c0_80] : memref<2x1x64xf32, #tpu.memory_space<vmem>>, vector<1x1x64xf32>
    %148 = vector.shape_cast %147 : vector<1x1x64xf32> to vector<1x64xf32>
    %c1_81 = arith.constant 1 : index
    %c0_82 = arith.constant 0 : index
    %c0_83 = arith.constant 0 : index
    %149 = vector.load %arg5[%c1_81, %c0_82, %c0_83] : memref<2x1x64xf32, #tpu.memory_space<vmem>>, vector<1x1x64xf32>
    %150 = vector.shape_cast %149 : vector<1x1x64xf32> to vector<1x64xf32>
    %cst_84 = arith.constant dense<0.000000e+00> : vector<16xf32>
    %151 = vector.multi_reduction <add>, %146, %cst_84 [1] : vector<16x64xf32> to vector<16xf32>
    %152 = vector.shape_cast %151 : vector<16xf32> to vector<16x1xf32>
    %cst_85 = arith.constant 6.400000e+01 : f32
    %153 = vector.broadcast %cst_85 : f32 to vector<16x1xf32>
    %154 = arith.divf %152, %153 : vector<16x1xf32>
    %155 = vector.broadcast %154 : vector<16x1xf32> to vector<16x64xf32>
    %156 = arith.subf %146, %155 : vector<16x64xf32>
    %157 = arith.mulf %156, %156 : vector<16x64xf32>
    %cst_86 = arith.constant dense<0.000000e+00> : vector<16xf32>
    %158 = vector.multi_reduction <add>, %157, %cst_86 [1] : vector<16x64xf32> to vector<16xf32>
    %159 = vector.shape_cast %158 : vector<16xf32> to vector<16x1xf32>
    %cst_87 = arith.constant 6.400000e+01 : f32
    %160 = vector.broadcast %cst_87 : f32 to vector<16x1xf32>
    %161 = arith.divf %159, %160 : vector<16x1xf32>
    %162 = vector.broadcast %154 : vector<16x1xf32> to vector<16x64xf32>
    %163 = arith.subf %146, %162 : vector<16x64xf32>
    %cst_88 = arith.constant 9.99999974E-6 : f32
    %164 = vector.broadcast %cst_88 : f32 to vector<16x1xf32>
    %165 = arith.addf %161, %164 : vector<16x1xf32>
    %166 = math.rsqrt %165 : vector<16x1xf32>
    %167 = vector.broadcast %166 : vector<16x1xf32> to vector<16x64xf32>
    %168 = arith.mulf %163, %167 : vector<16x64xf32>
    %169 = vector.broadcast %148 : vector<1x64xf32> to vector<16x64xf32>
    %170 = arith.mulf %168, %169 : vector<16x64xf32>
    %171 = vector.broadcast %150 : vector<1x64xf32> to vector<16x64xf32>
    %172 = arith.addf %170, %171 : vector<16x64xf32>
    %173 = arith.truncf %172 : vector<16x64xf32> to vector<16x64xbf16>
    %c1_89 = arith.constant 1 : index
    %c0_90 = arith.constant 0 : index
    %c0_91 = arith.constant 0 : index
    %174 = vector.load %arg6[%c1_89, %c0_90, %c0_91] : memref<2x64x64xbf16, #tpu.memory_space<vmem>>, vector<1x64x64xbf16>
    %175 = vector.shape_cast %174 : vector<1x64x64xbf16> to vector<64x64xbf16>
    %cst_92 = arith.constant dense<0.000000e+00> : vector<16x64xf32>
    %176 = tpu.matmul %173, %175, %cst_92 {dimension_numbers = #tpu.dot_dimension_numbers<[1], [0], [0], [1], [0, 0, 1, 1], [], []>} : vector<16x64xbf16>, vector<64x64xbf16>, vector<16x64xf32> -> vector<16x64xf32>
    %c1_93 = arith.constant 1 : index
    %c0_94 = arith.constant 0 : index
    %c0_95 = arith.constant 0 : index
    %177 = vector.load %arg7[%c1_93, %c0_94, %c0_95] : memref<2x1x64xf32, #tpu.memory_space<vmem>>, vector<1x1x64xf32>
    %178 = vector.shape_cast %177 : vector<1x1x64xf32> to vector<1x64xf32>
    %179 = vector.broadcast %178 : vector<1x64xf32> to vector<16x64xf32>
    %180 = arith.addf %176, %179 : vector<16x64xf32>
    %c1_96 = arith.constant 1 : index
    %c0_97 = arith.constant 0 : index
    %c0_98 = arith.constant 0 : index
    %181 = vector.load %arg8[%c1_96, %c0_97, %c0_98] : memref<2x64x64xbf16, #tpu.memory_space<vmem>>, vector<1x64x64xbf16>
    %182 = vector.shape_cast %181 : vector<1x64x64xbf16> to vector<64x64xbf16>
    %cst_99 = arith.constant dense<0.000000e+00> : vector<16x64xf32>
    %183 = tpu.matmul %173, %182, %cst_99 {dimension_numbers = #tpu.dot_dimension_numbers<[1], [0], [0], [1], [0, 0, 1, 1], [], []>} : vector<16x64xbf16>, vector<64x64xbf16>, vector<16x64xf32> -> vector<16x64xf32>
    %c1_100 = arith.constant 1 : index
    %c0_101 = arith.constant 0 : index
    %c0_102 = arith.constant 0 : index
    %184 = vector.load %arg9[%c1_100, %c0_101, %c0_102] : memref<2x1x64xf32, #tpu.memory_space<vmem>>, vector<1x1x64xf32>
    %185 = vector.shape_cast %184 : vector<1x1x64xf32> to vector<1x64xf32>
    %186 = vector.broadcast %185 : vector<1x64xf32> to vector<16x64xf32>
    %187 = arith.addf %183, %186 : vector<16x64xf32>
    %c1_103 = arith.constant 1 : index
    %c0_104 = arith.constant 0 : index
    %c0_105 = arith.constant 0 : index
    %188 = vector.load %arg10[%c1_103, %c0_104, %c0_105] : memref<2x64x64xbf16, #tpu.memory_space<vmem>>, vector<1x64x64xbf16>
    %189 = vector.shape_cast %188 : vector<1x64x64xbf16> to vector<64x64xbf16>
    %cst_106 = arith.constant dense<0.000000e+00> : vector<16x64xf32>
    %190 = tpu.matmul %173, %189, %cst_106 {dimension_numbers = #tpu.dot_dimension_numbers<[1], [0], [0], [1], [0, 0, 1, 1], [], []>} : vector<16x64xbf16>, vector<64x64xbf16>, vector<16x64xf32> -> vector<16x64xf32>
    %c1_107 = arith.constant 1 : index
    %c0_108 = arith.constant 0 : index
    %c0_109 = arith.constant 0 : index
    %191 = vector.load %arg11[%c1_107, %c0_108, %c0_109] : memref<2x1x64xf32, #tpu.memory_space<vmem>>, vector<1x1x64xf32>
    %192 = vector.shape_cast %191 : vector<1x1x64xf32> to vector<1x64xf32>
    %193 = vector.broadcast %192 : vector<1x64xf32> to vector<16x64xf32>
    %194 = arith.addf %190, %193 : vector<16x64xf32>
    %195 = vector.shape_cast %180 : vector<16x64xf32> to vector<16x4x16xf32>
    %196 = tpu.transpose %195, [1, 0, 2] : vector<16x4x16xf32> -> vector<4x16x16xf32>
    %197 = arith.truncf %196 : vector<4x16x16xf32> to vector<4x16x16xbf16>
    %198 = vector.shape_cast %187 : vector<16x64xf32> to vector<16x4x16xf32>
    %199 = tpu.transpose %198, [1, 0, 2] : vector<16x4x16xf32> -> vector<4x16x16xf32>
    %200 = arith.truncf %199 : vector<4x16x16xf32> to vector<4x16x16xbf16>
    %201 = vector.shape_cast %194 : vector<16x64xf32> to vector<16x4x16xf32>
    %202 = tpu.transpose %201, [1, 0, 2] : vector<16x4x16xf32> -> vector<4x16x16xf32>
    %203 = arith.truncf %202 : vector<4x16x16xf32> to vector<4x16x16xbf16>
    "tpu.trace_start"() <{level = 10 : i32, message = "hqd,hkd->hqk"}> : () -> ()
    %cst_110 = arith.constant dense<0.000000e+00> : vector<4x16x16xf32>
    %204 = tpu.matmul %197, %200, %cst_110 {dimension_numbers = #tpu.dot_dimension_numbers<[2], [2], [1], [1], [0, 0, 0, 1, 1, 1], [0], [0]>} : vector<4x16x16xbf16>, vector<4x16x16xbf16>, vector<4x16x16xf32> -> vector<4x16x16xf32>
    "tpu.trace_stop"() : () -> ()
    %cst_111 = arith.constant 2.500000e-01 : f32
    %205 = vector.broadcast %cst_111 : f32 to vector<4x16x16xf32>
    %206 = arith.mulf %204, %205 : vector<4x16x16xf32>
    %cst_112 = arith.constant dense<0xFF800000> : vector<4x16xf32>
    %207 = vector.multi_reduction <maximumf>, %206, %cst_112 [2] : vector<4x16x16xf32> to vector<4x16xf32>
    %208 = vector.shape_cast %207 : vector<4x16xf32> to vector<4x16x1xf32>
    %209 = vector.broadcast %208 : vector<4x16x1xf32> to vector<4x16x16xf32>
    %210 = arith.subf %206, %209 : vector<4x16x16xf32>
    %211 = math.exp %210 : vector<4x16x16xf32>
    %cst_113 = arith.constant dense<0.000000e+00> : vector<4x16xf32>
    %212 = vector.multi_reduction <add>, %211, %cst_113 [2] : vector<4x16x16xf32> to vector<4x16xf32>
    %213 = vector.shape_cast %212 : vector<4x16xf32> to vector<4x16x1xf32>
    %214 = tpu.reciprocal %213 {approx = true} : vector<4x16x1xf32> -> vector<4x16x1xf32>
    %215 = vector.broadcast %214 : vector<4x16x1xf32> to vector<4x16x16xf32>
    %216 = arith.mulf %211, %215 : vector<4x16x16xf32>
    %217 = arith.truncf %216 : vector<4x16x16xf32> to vector<4x16x16xbf16>
    "tpu.trace_start"() <{level = 10 : i32, message = "hqk,hkd->hqd"}> : () -> ()
    %cst_114 = arith.constant dense<0.000000e+00> : vector<4x16x16xf32>
    %218 = tpu.matmul %217, %203, %cst_114 {dimension_numbers = #tpu.dot_dimension_numbers<[2], [1], [1], [2], [0, 0, 0, 1, 1, 2], [0], [0]>} : vector<4x16x16xbf16>, vector<4x16x16xbf16>, vector<4x16x16xf32> -> vector<4x16x16xf32>
    "tpu.trace_stop"() : () -> ()
    %219 = tpu.transpose %218, [1, 0, 2] : vector<4x16x16xf32> -> vector<16x4x16xf32>
    %220 = vector.shape_cast %219 : vector<16x4x16xf32> to vector<16x64xf32>
    %221 = arith.truncf %220 : vector<16x64xf32> to vector<16x64xbf16>
    %c1_115 = arith.constant 1 : index
    %c0_116 = arith.constant 0 : index
    %c0_117 = arith.constant 0 : index
    %222 = vector.load %arg12[%c1_115, %c0_116, %c0_117] : memref<2x64x64xbf16, #tpu.memory_space<vmem>>, vector<1x64x64xbf16>
    %223 = vector.shape_cast %222 : vector<1x64x64xbf16> to vector<64x64xbf16>
    %cst_118 = arith.constant dense<0.000000e+00> : vector<16x64xf32>
    %224 = tpu.matmul %221, %223, %cst_118 {dimension_numbers = #tpu.dot_dimension_numbers<[1], [0], [0], [1], [0, 0, 1, 1], [], []>} : vector<16x64xbf16>, vector<64x64xbf16>, vector<16x64xf32> -> vector<16x64xf32>
    %c1_119 = arith.constant 1 : index
    %c0_120 = arith.constant 0 : index
    %c0_121 = arith.constant 0 : index
    %225 = vector.load %arg13[%c1_119, %c0_120, %c0_121] : memref<2x1x64xf32, #tpu.memory_space<vmem>>, vector<1x1x64xf32>
    %226 = vector.shape_cast %225 : vector<1x1x64xf32> to vector<1x64xf32>
    %227 = vector.broadcast %226 : vector<1x64xf32> to vector<16x64xf32>
    %228 = arith.addf %224, %227 : vector<16x64xf32>
    %229 = arith.addf %146, %228 : vector<16x64xf32>
    %c1_122 = arith.constant 1 : index
    %c0_123 = arith.constant 0 : index
    %c0_124 = arith.constant 0 : index
    %230 = vector.load %arg14[%c1_122, %c0_123, %c0_124] : memref<2x1x64xf32, #tpu.memory_space<vmem>>, vector<1x1x64xf32>
    %231 = vector.shape_cast %230 : vector<1x1x64xf32> to vector<1x64xf32>
    %c1_125 = arith.constant 1 : index
    %c0_126 = arith.constant 0 : index
    %c0_127 = arith.constant 0 : index
    %232 = vector.load %arg15[%c1_125, %c0_126, %c0_127] : memref<2x1x64xf32, #tpu.memory_space<vmem>>, vector<1x1x64xf32>
    %233 = vector.shape_cast %232 : vector<1x1x64xf32> to vector<1x64xf32>
    %cst_128 = arith.constant dense<0.000000e+00> : vector<16xf32>
    %234 = vector.multi_reduction <add>, %229, %cst_128 [1] : vector<16x64xf32> to vector<16xf32>
    %235 = vector.shape_cast %234 : vector<16xf32> to vector<16x1xf32>
    %cst_129 = arith.constant 6.400000e+01 : f32
    %236 = vector.broadcast %cst_129 : f32 to vector<16x1xf32>
    %237 = arith.divf %235, %236 : vector<16x1xf32>
    %238 = vector.broadcast %237 : vector<16x1xf32> to vector<16x64xf32>
    %239 = arith.subf %229, %238 : vector<16x64xf32>
    %240 = arith.mulf %239, %239 : vector<16x64xf32>
    %cst_130 = arith.constant dense<0.000000e+00> : vector<16xf32>
    %241 = vector.multi_reduction <add>, %240, %cst_130 [1] : vector<16x64xf32> to vector<16xf32>
    %242 = vector.shape_cast %241 : vector<16xf32> to vector<16x1xf32>
    %cst_131 = arith.constant 6.400000e+01 : f32
    %243 = vector.broadcast %cst_131 : f32 to vector<16x1xf32>
    %244 = arith.divf %242, %243 : vector<16x1xf32>
    %245 = vector.broadcast %237 : vector<16x1xf32> to vector<16x64xf32>
    %246 = arith.subf %229, %245 : vector<16x64xf32>
    %cst_132 = arith.constant 9.99999974E-6 : f32
    %247 = vector.broadcast %cst_132 : f32 to vector<16x1xf32>
    %248 = arith.addf %244, %247 : vector<16x1xf32>
    %249 = math.rsqrt %248 : vector<16x1xf32>
    %250 = vector.broadcast %249 : vector<16x1xf32> to vector<16x64xf32>
    %251 = arith.mulf %246, %250 : vector<16x64xf32>
    %252 = vector.broadcast %231 : vector<1x64xf32> to vector<16x64xf32>
    %253 = arith.mulf %251, %252 : vector<16x64xf32>
    %254 = vector.broadcast %233 : vector<1x64xf32> to vector<16x64xf32>
    %255 = arith.addf %253, %254 : vector<16x64xf32>
    %256 = arith.truncf %255 : vector<16x64xf32> to vector<16x64xbf16>
    %c1_133 = arith.constant 1 : index
    %c0_134 = arith.constant 0 : index
    %c0_135 = arith.constant 0 : index
    %257 = vector.load %arg16[%c1_133, %c0_134, %c0_135] : memref<2x64x256xbf16, #tpu.memory_space<vmem>>, vector<1x64x256xbf16>
    %258 = vector.shape_cast %257 : vector<1x64x256xbf16> to vector<64x256xbf16>
    %cst_136 = arith.constant dense<0.000000e+00> : vector<16x256xf32>
    %259 = tpu.matmul %256, %258, %cst_136 {dimension_numbers = #tpu.dot_dimension_numbers<[1], [0], [0], [1], [0, 0, 1, 1], [], []>} : vector<16x64xbf16>, vector<64x256xbf16>, vector<16x256xf32> -> vector<16x256xf32>
    %c1_137 = arith.constant 1 : index
    %c0_138 = arith.constant 0 : index
    %c0_139 = arith.constant 0 : index
    %260 = vector.load %arg17[%c1_137, %c0_138, %c0_139] : memref<2x1x256xf32, #tpu.memory_space<vmem>>, vector<1x1x256xf32>
    %261 = vector.shape_cast %260 : vector<1x1x256xf32> to vector<1x256xf32>
    %262 = vector.broadcast %261 : vector<1x256xf32> to vector<16x256xf32>
    %263 = arith.addf %259, %262 : vector<16x256xf32>
    %cst_140 = arith.constant 5.000000e-01 : f32
    %264 = vector.broadcast %cst_140 : f32 to vector<16x256xf32>
    %265 = arith.mulf %264, %263 : vector<16x256xf32>
    %266 = arith.mulf %263, %263 : vector<16x256xf32>
    %267 = arith.mulf %266, %263 : vector<16x256xf32>
    %cst_141 = arith.constant 4.471500e-02 : f32
    %268 = vector.broadcast %cst_141 : f32 to vector<16x256xf32>
    %269 = arith.mulf %268, %267 : vector<16x256xf32>
    %270 = arith.addf %263, %269 : vector<16x256xf32>
    %cst_142 = arith.constant 0.797884583 : f32
    %271 = vector.broadcast %cst_142 : f32 to vector<16x256xf32>
    %272 = arith.mulf %271, %270 : vector<16x256xf32>
    %273 = math.tanh %272 : vector<16x256xf32>
    %cst_143 = arith.constant 1.000000e+00 : f32
    %274 = vector.broadcast %cst_143 : f32 to vector<16x256xf32>
    %275 = arith.addf %274, %273 : vector<16x256xf32>
    %276 = arith.mulf %265, %275 : vector<16x256xf32>
    %277 = arith.truncf %276 : vector<16x256xf32> to vector<16x256xbf16>
    %c1_144 = arith.constant 1 : index
    %c0_145 = arith.constant 0 : index
    %c0_146 = arith.constant 0 : index
    %278 = vector.load %arg18[%c1_144, %c0_145, %c0_146] : memref<2x256x64xbf16, #tpu.memory_space<vmem>>, vector<1x256x64xbf16>
    %279 = vector.shape_cast %278 : vector<1x256x64xbf16> to vector<256x64xbf16>
    %cst_147 = arith.constant dense<0.000000e+00> : vector<16x64xf32>
    %280 = tpu.matmul %277, %279, %cst_147 {dimension_numbers = #tpu.dot_dimension_numbers<[1], [0], [0], [1], [0, 0, 1, 1], [], []>} : vector<16x256xbf16>, vector<256x64xbf16>, vector<16x64xf32> -> vector<16x64xf32>
    %c1_148 = arith.constant 1 : index
    %c0_149 = arith.constant 0 : index
    %c0_150 = arith.constant 0 : index
    %281 = vector.load %arg19[%c1_148, %c0_149, %c0_150] : memref<2x1x64xf32, #tpu.memory_space<vmem>>, vector<1x1x64xf32>
    %282 = vector.shape_cast %281 : vector<1x1x64xf32> to vector<1x64xf32>
    %283 = vector.broadcast %282 : vector<1x64xf32> to vector<16x64xf32>
    %284 = arith.addf %280, %283 : vector<16x64xf32>
    %285 = arith.addf %229, %284 : vector<16x64xf32>
    %286 = arith.truncf %285 : vector<16x64xf32> to vector<16x64xbf16>
    %c0_151 = arith.constant 0 : index
    %c0_152 = arith.constant 0 : index
    %287 = vector.load %arg20[%c0_151, %c0_152] : memref<64x1xbf16, #tpu.memory_space<vmem>>, vector<64x1xbf16>
    %cst_153 = arith.constant dense<0.000000e+00> : vector<16x1xf32>
    %288 = tpu.matmul %286, %287, %cst_153 {dimension_numbers = #tpu.dot_dimension_numbers<[1], [0], [0], [1], [0, 0, 1, 1], [], []>} : vector<16x64xbf16>, vector<64x1xbf16>, vector<16x1xf32> -> vector<16x1xf32>
    %c0_154 = arith.constant 0 : index
    %c0_155 = arith.constant 0 : index
    %289 = vector.load %arg21[%c0_154, %c0_155] : memref<1x1xf32, #tpu.memory_space<vmem>>, vector<1x1xf32>
    %290 = vector.broadcast %289 : vector<1x1xf32> to vector<16x1xf32>
    %291 = arith.addf %288, %290 : vector<16x1xf32>
    %c0_156 = arith.constant 0 : index
    %c0_157 = arith.constant 0 : index
    %c0_158 = arith.constant 0 : index
    %292 = vector.load %arg22[%c0_156, %c0_157, %c0_158] : memref<1x16x1xf32, #tpu.memory_space<vmem>>, vector<1x16x1xf32>
    %293 = vector.shape_cast %292 : vector<1x16x1xf32> to vector<16x1xf32>
    %294 = vector.shape_cast %291 : vector<16x1xf32> to vector<1x16x1xf32>
    tpu.vector_store %arg22[%c0_156, %c0_157, %c0_158], %294 {strides = array<i32>} : memref<1x16x1xf32, #tpu.memory_space<vmem>>, vector<1x16x1xf32>,
    return
  }
  func.func @transform_0(%arg0: i32) -> (i32, i32, i32) {
    %c0_i32 = arith.constant 0 : i32
    %c0_i32_0 = arith.constant 0 : i32
    %c0_i32_1 = arith.constant 0 : i32
    return %arg0, %c0_i32, %c0_i32_0 : i32, i32, i32
  }
  func.func @transform_1(%arg0: i32) -> (i32, i32) {
    %c0_i32 = arith.constant 0 : i32
    %c0_i32_0 = arith.constant 0 : i32
    %c0_i32_1 = arith.constant 0 : i32
    return %c0_i32, %c0_i32_0 : i32, i32
  }
  func.func @transform_2(%arg0: i32) -> (i32, i32) {
    %c0_i32 = arith.constant 0 : i32
    %c0_i32_0 = arith.constant 0 : i32
    %c0_i32_1 = arith.constant 0 : i32
    return %c0_i32, %c0_i32_0 : i32, i32
  }
  func.func @transform_3(%arg0: i32) -> (i32, i32, i32) {
    %c0_i32 = arith.constant 0 : i32
    %c0_i32_0 = arith.constant 0 : i32
    %c0_i32_1 = arith.constant 0 : i32
    %c0_i32_2 = arith.constant 0 : i32
    return %c0_i32, %c0_i32_0, %c0_i32_1 : i32, i32, i32
  }
  func.func @transform_4(%arg0: i32) -> (i32, i32, i32) {
    %c0_i32 = arith.constant 0 : i32
    %c0_i32_0 = arith.constant 0 : i32
    %c0_i32_1 = arith.constant 0 : i32
    %c0_i32_2 = arith.constant 0 : i32
    return %c0_i32, %c0_i32_0, %c0_i32_1 : i32, i32, i32
  }
  func.func @transform_5(%arg0: i32) -> (i32, i32, i32) {
    %c0_i32 = arith.constant 0 : i32
    %c0_i32_0 = arith.constant 0 : i32
    %c0_i32_1 = arith.constant 0 : i32
    %c0_i32_2 = arith.constant 0 : i32
    return %c0_i32, %c0_i32_0, %c0_i32_1 : i32, i32, i32
  }
  func.func @transform_6(%arg0: i32) -> (i32, i32, i32) {
    %c0_i32 = arith.constant 0 : i32
    %c0_i32_0 = arith.constant 0 : i32
    %c0_i32_1 = arith.constant 0 : i32
    %c0_i32_2 = arith.constant 0 : i32
    return %c0_i32, %c0_i32_0, %c0_i32_1 : i32, i32, i32
  }
  func.func @transform_7(%arg0: i32) -> (i32, i32, i32) {
    %c0_i32 = arith.constant 0 : i32
    %c0_i32_0 = arith.constant 0 : i32
    %c0_i32_1 = arith.constant 0 : i32
    %c0_i32_2 = arith.constant 0 : i32
    return %c0_i32, %c0_i32_0, %c0_i32_1 : i32, i32, i32
  }
  func.func @transform_8(%arg0: i32) -> (i32, i32, i32) {
    %c0_i32 = arith.constant 0 : i32
    %c0_i32_0 = arith.constant 0 : i32
    %c0_i32_1 = arith.constant 0 : i32
    %c0_i32_2 = arith.constant 0 : i32
    return %c0_i32, %c0_i32_0, %c0_i32_1 : i32, i32, i32
  }
  func.func @transform_9(%arg0: i32) -> (i32, i32, i32) {
    %c0_i32 = arith.constant 0 : i32
    %c0_i32_0 = arith.constant 0 : i32
    %c0_i32_1 = arith.constant 0 : i32
    %c0_i32_2 = arith.constant 0 : i32
    return %c0_i32, %c0_i32_0, %c0_i32_1 : i32, i32, i32
  }
  func.func @transform_10(%arg0: i32) -> (i32, i32, i32) {
    %c0_i32 = arith.constant 0 : i32
    %c0_i32_0 = arith.constant 0 : i32
    %c0_i32_1 = arith.constant 0 : i32
    %c0_i32_2 = arith.constant 0 : i32
    return %c0_i32, %c0_i32_0, %c0_i32_1 : i32, i32, i32
  }
  func.func @transform_11(%arg0: i32) -> (i32, i32, i32) {
    %c0_i32 = arith.constant 0 : i32
    %c0_i32_0 = arith.constant 0 : i32
    %c0_i32_1 = arith.constant 0 : i32
    %c0_i32_2 = arith.constant 0 : i32
    return %c0_i32, %c0_i32_0, %c0_i32_1 : i32, i32, i32
  }
  func.func @transform_12(%arg0: i32) -> (i32, i32, i32) {
    %c0_i32 = arith.constant 0 : i32
    %c0_i32_0 = arith.constant 0 : i32
    %c0_i32_1 = arith.constant 0 : i32
    %c0_i32_2 = arith.constant 0 : i32
    return %c0_i32, %c0_i32_0, %c0_i32_1 : i32, i32, i32
  }
  func.func @transform_13(%arg0: i32) -> (i32, i32, i32) {
    %c0_i32 = arith.constant 0 : i32
    %c0_i32_0 = arith.constant 0 : i32
    %c0_i32_1 = arith.constant 0 : i32
    %c0_i32_2 = arith.constant 0 : i32
    return %c0_i32, %c0_i32_0, %c0_i32_1 : i32, i32, i32
  }
  func.func @transform_14(%arg0: i32) -> (i32, i32, i32) {
    %c0_i32 = arith.constant 0 : i32
    %c0_i32_0 = arith.constant 0 : i32
    %c0_i32_1 = arith.constant 0 : i32
    %c0_i32_2 = arith.constant 0 : i32
    return %c0_i32, %c0_i32_0, %c0_i32_1 : i32, i32, i32
  }
  func.func @transform_15(%arg0: i32) -> (i32, i32, i32) {
    %c0_i32 = arith.constant 0 : i32
    %c0_i32_0 = arith.constant 0 : i32
    %c0_i32_1 = arith.constant 0 : i32
    %c0_i32_2 = arith.constant 0 : i32
    return %c0_i32, %c0_i32_0, %c0_i32_1 : i32, i32, i32
  }
  func.func @transform_16(%arg0: i32) -> (i32, i32, i32) {
    %c0_i32 = arith.constant 0 : i32
    %c0_i32_0 = arith.constant 0 : i32
    %c0_i32_1 = arith.constant 0 : i32
    %c0_i32_2 = arith.constant 0 : i32
    return %c0_i32, %c0_i32_0, %c0_i32_1 : i32, i32, i32
  }
  func.func @transform_17(%arg0: i32) -> (i32, i32, i32) {
    %c0_i32 = arith.constant 0 : i32
    %c0_i32_0 = arith.constant 0 : i32
    %c0_i32_1 = arith.constant 0 : i32
    %c0_i32_2 = arith.constant 0 : i32
    return %c0_i32, %c0_i32_0, %c0_i32_1 : i32, i32, i32
  }
  func.func @transform_18(%arg0: i32) -> (i32, i32, i32) {
    %c0_i32 = arith.constant 0 : i32
    %c0_i32_0 = arith.constant 0 : i32
    %c0_i32_1 = arith.constant 0 : i32
    %c0_i32_2 = arith.constant 0 : i32
    return %c0_i32, %c0_i32_0, %c0_i32_1 : i32, i32, i32
  }
  func.func @transform_19(%arg0: i32) -> (i32, i32) {
    %c0_i32 = arith.constant 0 : i32
    %c0_i32_0 = arith.constant 0 : i32
    %c0_i32_1 = arith.constant 0 : i32
    return %c0_i32, %c0_i32_0 : i32, i32
  }
  func.func @transform_20(%arg0: i32) -> (i32, i32) {
    %c0_i32 = arith.constant 0 : i32
    %c0_i32_0 = arith.constant 0 : i32
    %c0_i32_1 = arith.constant 0 : i32
    return %c0_i32, %c0_i32_0 : i32, i32
  }
  func.func @transform_21(%arg0: i32) -> (i32, i32, i32) {
    %c0_i32 = arith.constant 0 : i32
    %c0_i32_0 = arith.constant 0 : i32
    %c0_i32_1 = arith.constant 0 : i32
    return %arg0, %c0_i32, %c0_i32_0 : i32, i32, i32
  }
}

</mosaic_0001>

<bundles_post_ra>
// kernel: mobilesam_lora_forward.1
= control target key start
LH: loop header
LB: loop body
LE: loop exit
PB: predicated region body
PF: predicated region fallthrough
CT: control target
= control target key end

     0   :  { %s6743_s26 = smov 0   ;;  %s7905_s0 = inlined_call_operand.vmem [shape: f32[2,16,192], index: 0, kind: input, shape index: {}]   ;;  %s7906_s1 = inlined_call_operand.vmem [shape: bf16[192,64], index: 1, kind: input, shape index: {}]   ;;  %s7907_s2 = inlined_call_operand.vmem [shape: f32[1,64], index: 2, kind: input, shape index: {}]   ;;  %s7908_s3 = inlined_call_operand.vmem [shape: f32[2,1,64], index: 3, kind: input, shape index: {}]   ;;  %s7909_s4 = inlined_call_operand.vmem [shape: f32[2,1,64], index: 4, kind: input, shape index: {}]   ;;  %s7910_s5 = inlined_call_operand.vmem [shape: bf16[2,64,64], index: 5, kind: input, shape index: {}]   ;;  %s7911_s6 = inlined_call_operand.vmem [shape: f32[2,1,64], index: 6, kind: input, shape index: {}]   ;;  %s7912_s7 = inlined_call_operand.vmem [shape: bf16[2,64,64], index: 7, kind: input, shape index: {}]   ;;  %s7913_s8 = inlined_call_operand.vmem [shape: f32[2,1,64], index: 8, kind: input, shape index: {}]   ;;  %s7914_s9 = inlined_call_operand.vmem [shape: bf16[2,64,64], index: 9, kind: input, shape index: {}]   ;;  %s7915_s10 = inlined_call_operand.vmem [shape: f32[2,1,64], index: 10, kind: input, shape index: {}]   ;;  %s7916_s11 = inlined_call_operand.vmem [shape: bf16[2,64,64], index: 11, kind: input, shape index: {}]   ;;  %s7917_s12 = inlined_call_operand.vmem [shape: f32[2,1,64], index: 12, kind: input, shape index: {}]   ;;  %s7918_s13 = inlined_call_operand.vmem [shape: f32[2,1,64], index: 13, kind: input, shape index: {}]   ;;  %s7919_s14 = inlined_call_operand.vmem [shape: f32[2,1,64], index: 14, kind: input, shape index: {}]   ;;  %s7920_s15 = inlined_call_operand.vmem [shape: bf16[2,64,256], index: 15, kind: input, shape index: {}]   ;;  %s7921_s16 = inlined_call_operand.vmem [shape: f32[2,1,256], index: 16, kind: input, shape index: {}]   ;;  %s7922_s17 = inlined_call_operand.vmem [shape: bf16[2,256,64], index: 17, kind: input, shape index: {}]   ;;  %s7923_s18 = inlined_call_operand.vmem [shape: f32[2,1,64], index: 18, kind: input, shape index: {}]   ;;  %s7924_s19 = inlined_call_operand.vmem [shape: bf16[64,1], index: 19, kind: input, shape index: {}]   ;;  %s7925_s20 = inlined_call_operand.<no memory space> [shape: f32[1,1], index: 20, kind: input, shape index: {}]   ;;  %s7926_s21 = inlined_call_operand.vmem [shape: f32[2,16,1], index: 21, kind: output, shape index: {}]  }
   0x1   :  { %7940 = sst [smem:[#allocation3_spill]] %s7905_s0  ;;  %v26_v0 = vstv %s7925_s20 }
   0x2   :  { %7941 = sst [smem:[#allocation4_spill]] %s7906_s1  ;;  %27 = vst [vmem:[#allocation2] sm:$0x1] %v26_v0 }
   0x3   :  { %7942 = sst [smem:[#allocation5_spill]] %s7907_s2 }
   0x4   :  { %7943 = sst [smem:[#allocation6_spill]] %s7908_s3 }
   0x5   :  { %7944 = sst [smem:[#allocation7_spill]] %s7909_s4 }
   0x6   :  { %7945 = sst [smem:[#allocation8_spill]] %s7910_s5 }
   0x7 LB: > { %s5766_s27 = sadd.s32 4294967295, %s6617_s26   ;;  %p5770_p0 = scmp.ge.s32.totalorder %s6617_s26, 1  ;;  %s6617_s26 = sphi %s6743_s26, %s33_s26  }
   0x8   : > { %p589_p1 = scmp.lt.s32.totalorder %s6617_s26, 3 }
   0xa   : > { %p590_p2 = pnand %p5770_p0, %p589_p1 }
   0xb   : > { %s7946_s29 = sld [smem:[#allocation4_spill]] (!%p590_p2)  ;;  %v6619_v2 = vmov (!%p590_p2), 0   ;;  %p649_p3 = scmp.lt.s32.totalorder (!%p590_p2), %s5766_s27, 1  ;;  %vm769_vm0 = vcmask (!%p590_p2), 523264   ;;  %v6620_v40 = vmov (!%p590_p2), 0.0   ;;  %vm6621_vm1 = vmmov (!%p590_p2), 0  }
   0xc   : > { %593 = sbr.rel (%p590_p2) target bundleno = 5826 (0x16c2), region = 104  ;;  %773 = vmatprep.subr.bf16.mxu0 (!%p590_p2), %v6619_v2  ;;  %s7947_s1 = sld [smem:[#allocation3_spill]] (!%p590_p2)  ;;  %6158 = vmatprep.subr.bf16.mxu1 (!%p590_p2), %v6620_v40  ;;  %v6427_v60 = vld [vmem:[%s7912_s7] sm:$0xff] (!%p590_p2)   ;;  %v6428_v62 = vld [vmem:[%s7912_s7 + $0x8] sm:$0xff] (!%p590_p2)   ;;  %v6429_v63 = vld [vmem:[%s7912_s7 + $0x10] sm:$0xff] (!%p590_p2)   ;;  %vm1991_vm2 = vcmask (!%p590_p2), 130048  }
   0xd   : > { %s7949_s23 = sld [smem:[#allocation8_spill]] (!%p590_p2)  ;;  %6166 = vmatprep.mubr.msk.bf16.mxu1 (!%p590_p2), %vm6621_vm1, %v6620_v40  ;;  %s7950_s30 = sld [smem:[#allocation6_spill]] (!%p590_p2)  ;;  %v6430_v0 = vld [vmem:[%s7912_s7 + $0x18] sm:$0xff] (!%p590_p2)   ;;  %vm2754_vm3 = vcmask (!%p590_p2), 261120   ;;  %vm2757_vm4 = vcmask (!%p590_p2), 392192   ;;  %vm5708_vm5 = vcmask (!%p590_p2), 7168  }
   0xe   : > { %s7951_s22 = sld [smem:[#allocation7_spill]] (!%p590_p2)  ;;  %s7936_s2 = smov (!%p590_p2), 96  }
   0xf   : > { %s7934_s25 = smov (!%p590_p2), 80   ;;  %s7933_s0 = smov (!%p590_p2), 32  }
  0x10   : > { %s7932_s4 = smov (!%p590_p2), 16   ;;  %s7953_s20 = smov (!%p590_p2), 96  }
  0x11   : > { %v6411_v1 = vld [vmem:[%s7946_s29] sm:$0xff] (!%p590_p2)   ;;  %v6412_v3 = vld [vmem:[%s7946_s29 + $0x8] sm:$0xff] (!%p590_p2)   ;;  %v6413_v4 = vld [vmem:[%s7946_s29 + $0x10] sm:$0xff] (!%p590_p2)  }
  0x12   : > { %774 = vmatpush1.bf16.msra.mxu0 (!%p590_p2), %v6411_v1  ;;  %v6414_v5 = vld [vmem:[%s7946_s29 + $0x18] sm:$0xff] (!%p590_p2)   ;;  %v6415_v8 = vld [vmem:[%s7946_s29 + $0x20] sm:$0xff] (!%p590_p2)   ;;  %v6416_v10 = vld [vmem:[%s7946_s29 + $0x28] sm:$0xff] (!%p590_p2)  }
  0x13   : > { %775 = vmatprep.subr.bf16.mxu0 %v6619_v2  ;;  %s7959_s27 = smov (!%p649_p3, %s5766_s27), 1  ;;  %v6417_v11 = vld [vmem:[%s7946_s29 + $0x30] sm:$0xff]   ;;  %v6418_v12 = vld [vmem:[%s7946_s29 + $0x38] sm:$0xff]   ;;  %v6419_v13 = vld [vmem:[%s7946_s29 + $0x40] sm:$0xff]  }
  0x14   : > { %s6035_s5 = sshll.u32 %s7959_s27, 5  ;;  %v6420_v14 = vld [vmem:[%s7946_s29 + $0x48] sm:$0xff]   ;;  %v6421_v15 = vld [vmem:[%s7946_s29 + $0x50] sm:$0xff]   ;;  %v6422_v16 = vld [vmem:[%s7946_s29 + $0x58] sm:$0xff]   ;;  %s6036_s28 = sshll.u32 %s7959_s27, 4 }
  0x15   : > { %s6769_s24 = scalar_lea.vmem %s7947_s1, %s6035_s5  ;;  %s7948_s5 = sld [smem:[#allocation5_spill]]  ;;  %v6423_v39 = vld [vmem:[%s7949_s23] sm:$0xff]   ;;  %v6424_v41 = vld [vmem:[%s7949_s23 + $0x8] sm:$0xff]   ;;  %v6425_v42 = vld [vmem:[%s7949_s23 + $0x10] sm:$0xff]  }
  0x16   : > { %776 = vmatpush1.bf16.msra.mxu0 %v6412_v3  ;;  %v661_v6 = vld [vmem:[%s6769_s24 + $0x8] sm:$0xff]  ;;  %v663_v7 = vld [vmem:[%s6769_s24 + $0x18] sm:$0xff]  ;;  %v660_v17 = vld [vmem:[%s6769_s24] sm:$0xff]  ;;  %6159 = vmatpush3.bf16.msra.mxu1 %v6423_v39  ;;  %s7954_s1 = smov 80  }
  0x17   : > { %777 = vmatprep.subr.bf16.mxu0 %v6619_v2  ;;  %v665_v9 = vpack.c.bf16 %v663_v7, %v661_v6  ;;  %v662_v18 = vld [vmem:[%s6769_s24 + $0x10] sm:$0xff]  ;;  %6160 = vmatprep.subr.bf16.mxu1 %v6620_v40  ;;  %v6426_v43 = vld [vmem:[%s7949_s23 + $0x18] sm:$0xff]   ;;  %v5789_v52 = vld [vmem:[%s7950_s30] ss:$0 sm:$0xff]  ;;  %s7931_s24 = smov 48  }
  0x18   : > { %v664_v19 = vpack.c.bf16 %v662_v18, %v660_v17  ;;  %v5790_v56 = vld [vmem:[%s7951_s22] ss:$0 sm:$0xff]  ;;  %v6432_v3 = vld [vmem:[%s7914_s9 + $0x8] sm:$0xff]  }
  0x19   : > { %5788 = vmatprep.mubr.msk.bf16.mxu0 %vm769_vm0, %v665_v9  ;;  %v6431_v1 = vld [vmem:[%s7914_s9] sm:$0xff]  }
  0x1a   : > { %778 = vmatpush1.bf16.msra.mxu0 %v6413_v4  ;;  %6161 = vmatpush3.bf16.msra.mxu1 %v6424_v41  ;;  %v6433_v4 = vld [vmem:[%s7914_s9 + $0x10] sm:$0xff]   ;;  %v5791_v6 = vld [vmem:[%s7911_s6] ss:$0 sm:$0xff] }
  0x1b   : > { %779 = vmatprep.subr.bf16.mxu0 %v6619_v2  ;;  %v5775_v20 = vld [vmem:[%s7948_s5] ss:$0 sm:$0xff]  ;;  %6162 = vmatprep.subr.bf16.mxu1 %v6620_v40  ;;  %s7938_s5 = smov 112  }
  0x1e   : > { %780 = vmatpush1.bf16.msra.mxu0 %v6414_v5  ;;  %6163 = vmatpush3.bf16.msra.mxu1 %v6425_v42  ;;  %v6434_v5 = vld [vmem:[%s7914_s9 + $0x18] sm:$0xff]  }
  0x1f   : > { %781 = vmatprep.subr.bf16.mxu0 %v6619_v2  ;;  %6164 = vmatprep.subr.bf16.mxu1 %v6620_v40 }
  0x22   : > { %782 = vmatpush1.bf16.msra.mxu0 %v6415_v8  ;;  %6165 = vmatpush3.bf16.msra.mxu1 %v6426_v43 }
  0x23   : > { %783 = vmatprep.subr.bf16.mxu0 %v6619_v2  ;;  %6170 = vmatprep.subr.bf16.mxu1 %v6620_v40 }
  0x26   : > { %784 = vmatpush1.bf16.msra.mxu0 %v6416_v10 }
  0x27   : > { %785 = vmatprep.subr.bf16.mxu0 %v6619_v2 }
  0x2a   : > { %786 = vmatpush1.bf16.msra.mxu0 %v6417_v11 }
  0x2b   : > { %787 = vmatprep.subr.bf16.mxu0 %v6619_v2 }
  0x2e   : > { %788 = vmatpush1.bf16.msra.mxu0 %v6418_v12 }
  0x2f   : > { %789 = vmatprep.subr.bf16.mxu0 %v6619_v2 }
  0x32   : > { %790 = vmatpush1.bf16.msra.mxu0 %v6419_v13  ;;  %v5797_v13 = vld [vmem:[%s7913_s8] ss:$0 sm:$0xff] }
  0x33   : > { %791 = vmatprep.subr.bf16.mxu0 %v6619_v2 }
  0x36   : > { %792 = vmatpush1.bf16.msra.mxu0 %v6420_v14 }
  0x37   : > { %793 = vmatprep.subr.bf16.mxu0 %v6619_v2 }
  0x3a   : > { %794 = vmatpush1.bf16.msra.mxu0 %v6421_v15 }
  0x3b   : > { %795 = vmatprep.subr.bf16.mxu0 %v6619_v2 }
  0x3e   : > { %796 = vmatpush1.bf16.msra.mxu0 %v6422_v16 }
  0x3f   : > { %6206 = vmatprep.subr.bf16.mxu0 %v6620_v40 }
  0x41   : > { %806 = vmatmul.mubr.bf16.vlgmr.msra.gmra.mrb[0].mxu0 %v664_v19 }
  0x42   : > { %6208 = vmatprep.mubr.msk.bf16.mxu0 %vm6621_vm1, %v6620_v40 }
 0x114   : > { %v807_v21 = vpop.f32.mrb[0].mxu0 }
 0x115   : > { %v6815_v22 = vadd.f32 %v5775_v20, %v807_v21  ;;  %v809_v23 = vpop.f32.mrb[1].mxu0 }
 0x116   : > { %v810_v24 = vpop.f32.mrb[2].mxu0 }
 0x117   : > { %v6817_v25 = vadd.f32 %v5775_v20, %v810_v24  ;;  %v812_v26 = vpop.f32.mrb[3].mxu0  ;;  %v816_v27 = vsel %vm769_vm0, %v6815_v22, 0.0 }
 0x118   : > { %817 = vadd.xlane.f32.xlu0 %v816_v27  ;;  %v6625_v26 = vmov 1983009808  }
 0x119   : > { %v819_v28 = vsel %vm769_vm0, %v6817_v25, 0.0  ;;  %v1126_v27 = vunpack.c.l.s4 %v6625_v26 }
 0x11c   : > { %820 = vadd.xlane.f32.xlu0 %v819_v28  ;;  %v1128_v28 = vlaneseq }
 0x1a5   : > { %v818_v29 = vpop.xlane.xlu0 %817 }
 0x1a6   : > { %v823_v30 = vmul.f32 0.015625, %v818_v29 }
 0x1a8   : > { %v825_v31 = vsub.f32 %v6815_v22, %v823_v30 }
 0x1a9   : > { %v821_v32 = vpop.xlane.xlu0 %820 }
 0x1aa   : > { %v824_v33 = vmul.f32 0.015625, %v821_v32  ;;  %v827_v34 = vmul.f32 %v825_v31, %v825_v31 }
 0x1ac   : > { %v826_v35 = vsub.f32 %v6817_v25, %v824_v33  ;;  %v829_v36 = vsel %vm769_vm0, %v827_v34, 0.0  ;;  %v1127_v33 = vunpack.c.0.s8 %v1126_v27  ;;  %v6935_v34 = vshrl.u32 %v1128_v28, 7 }
 0x1ad   : > { %830 = vadd.xlane.f32.xlu1 %v829_v36 }
 0x1ae   : > { %v828_v37 = vmul.f32 %v826_v35, %v826_v35 }
 0x1b0   : > { %v832_v38 = vsel %vm769_vm0, %v828_v37, 0.0 }
 0x1b1   : > { %833 = vadd.xlane.f32.xlu1 %v832_v38  ;;  %v6938_v38 = vsub.s32 %v1127_v33, %v6935_v34 }
 0x23a   : > { %v831_v44 = vpop.xlane.xlu1 %830 }
 0x23b   : > { %v835_v45 = vmul.f32 0.015625, %v831_v44 }
 0x23d   : > { %v837_v46 = vadd.f32 1e-05, %v835_v45 }
 0x23e   : > { %v834_v47 = vpop.xlane.xlu1 %833 }
 0x23f   : > { %6515 = vrsqrt.f32 %v837_v46  ;;  %v836_v48 = vmul.f32 0.015625, %v834_v47 }
 0x241   : > { %v838_v49 = vadd.f32 1e-05, %v836_v48 }
 0x243   : > { %6517 = vrsqrt.f32 %v838_v49 }
 0x249   : > { %v6516_v50 = vpop.eup %6515 }
 0x24a   : > { %v841_v51 = vmul.f32 %v6516_v50, %v825_v31  ;;  %v6626_v31 = vmov 1934713408  }
 0x24b   : > { %v1158_v32 = vunpack.c.l.s4 %v6626_v31 }
 0x24c   : > { %v849_v55 = vmul.f32 %v5789_v52, %v841_v51 }
 0x24d   : > { %v6518_v53 = vpop.eup %6517  ;;  %v1159_v37 = vunpack.c.0.s8 %v1158_v32 }
 0x24e   : > { %v842_v54 = vmul.f32 %v6518_v53, %v826_v35  ;;  %v857_v58 = vadd.f32 %v5790_v56, %v849_v55 }
 0x24f   : > { %v6941_v46 = vsub.s32 %v1159_v37, %v6935_v34 }
 0x250   : > { %v850_v57 = vmul.f32 %v5789_v52, %v842_v54 }
 0x252   : > { %v858_v59 = vadd.f32 %v5790_v56, %v850_v57 }
 0x254   : > { %v859_v61 = vpack.c.bf16 %v858_v59, %v857_v58 }
 0x256   : > { %6167 = vmatmul.mubr.msk.bf16.vlgmr.msra.gmra.mrb[0].mxu1 %vm769_vm0, %v859_v61 }
 0x257   : > { %6171 = vmatpush3.bf16.msra.mxu1 %v6427_v60  ;;  %6178 = vmatprep.mubr.msk.bf16.mxu1 %vm6621_vm1, %v6620_v40 }
 0x258   : > { %6172 = vmatprep.subr.bf16.mxu1 %v6620_v40 }
 0x25b   : > { %6173 = vmatpush3.bf16.msra.mxu1 %v6428_v62 }
 0x25c   : > { %6174 = vmatprep.subr.bf16.mxu1 %v6620_v40 }
 0x25f   : > { %6175 = vmatpush3.bf16.msra.mxu1 %v6429_v63 }
 0x260   : > { %6176 = vmatprep.subr.bf16.mxu1 %v6620_v40 }
 0x263   : > { %6177 = vmatpush3.bf16.msra.mxu1 %v6430_v0 }
 0x264   : > { %6182 = vmatprep.subr.bf16.mxu1 %v6620_v40 }
 0x266   : > { %6179 = vmatmul.mubr.msk.bf16.vlgmr.msra.gmra.mrb[4].mxu1 %vm769_vm0, %v859_v61 }
 0x267   : > { %6183 = vmatpush3.bf16.msra.mxu1 %v6431_v1  ;;  %6190 = vmatprep.mubr.msk.bf16.mxu1 %vm6621_vm1, %v6620_v40 }
 0x268   : > { %6184 = vmatprep.subr.bf16.mxu1 %v6620_v40 }
 0x26b   : > { %6185 = vmatpush3.bf16.msra.mxu1 %v6432_v3 }
 0x26c   : > { %6186 = vmatprep.subr.bf16.mxu1 %v6620_v40 }
 0x26f   : > { %6187 = vmatpush3.bf16.msra.mxu1 %v6433_v4 }
 0x270   : > { %6188 = vmatprep.subr.bf16.mxu1 %v6620_v40 }
 0x273   : > { %6189 = vmatpush3.bf16.msra.mxu1 %v6434_v5 }
 0x274   : > { %6194 = vmatprep.subr.bf16.mxu1 %v6620_v40 }
 0x276   : > { %6191 = vmatmul.mubr.msk.bf16.vlgmr.msra.gmra.mrb[8].mxu1 %vm769_vm0, %v859_v61 }
 0x277   : > { %6196 = vmatprep.mubr.msk.bf16.mxu1 %vm6621_vm1, %v6620_v40 }
 0x329   : > { %v936_v7 = vpop.f32.mrb[0].mxu1 }
 0x32a   : > { %v6899_v8 = vadd.f32 %v5791_v6, %v936_v7  ;;  %v6168_v9 = vpop.f32.mrb[1].mxu1 }
 0x32b   : > { %v939_v10 = vpop.f32.mrb[2].mxu1 }
 0x32c   : > { %v6901_v11 = vadd.f32 %v5791_v6, %v939_v10  ;;  %1105 = vrot.lane.b32.xlu0 %v6899_v8, %s7938_s5  ;;  %v6169_v12 = vpop.f32.mrb[3].mxu1 }
 0x32e   : > { %1107 = vrot.lane.b32.xlu1 %v6901_v11, %s7938_s5 }
 0x339   : > { %v1016_v14 = vpop.f32.mrb[4].mxu1 }
 0x33a   : > { %v1017_v15 = vadd.f32 %v5797_v13, %v1016_v14  ;;  %v6180_v16 = vpop.f32.mrb[5].mxu1 }
 0x33b   : > { %v1019_v17 = vpop.f32.mrb[6].mxu1 }
 0x33c   : > { %1407 = vrot.lane.b32.xlu1 %v1017_v15, %s7936_s2  ;;  %1401 = vrot.lane.b32.xlu0 %v1017_v15, %s7938_s5  ;;  %v6181_v18 = vpop.f32.mrb[7].mxu1  ;;  %v6912_v19 = vadd.f32 %v5797_v13, %v1019_v17 }
 0x340   : > { %1413 = vrot.lane.b32.xlu0 %v1017_v15, %s7934_s25  ;;  %1403 = vrot.lane.b32.xlu1 %v6912_v19, %s7938_s5 }
 0x344   : > { %1111 = vrot.lane.b32.xlu0 %v6899_v8, %s7936_s2  ;;  %1409 = vrot.lane.b32.xlu1 %v6912_v19, %s7936_s2 }
 0x348   : > { %1117 = vrot.lane.b32.xlu0 %v6899_v8, %s7934_s25  ;;  %1415 = vrot.lane.b32.xlu1 %v6912_v19, %s7934_s25 }
 0x349   : > { %v6925_v20 = vpop.f32.mrb[8].mxu1 }
 0x34a   : > { %v6192_v21 = vpop.f32.mrb[9].mxu1 }
 0x34b   : > { %v6927_v23 = vpop.f32.mrb[10].mxu1 }
 0x34c   : > { %1113 = vrot.lane.b32.xlu1 %v6901_v11, %s7936_s2  ;;  %v6193_v24 = vpop.f32.mrb[11].mxu1 }
 0x350   : > { %1119 = vrot.lane.b32.xlu1 %v6901_v11, %s7934_s25 }
 0x39e   : > { %v1106_v29 = vpop.permute.xlu0 %1105 }
 0x3a0   : > { %v6933_v30 = vpop.permute.xlu1 %1107 }
 0x3ae   : > { %v1408_v35 = vpop.permute.xlu1 %1407  ;;  %v1402_v36 = vpop.permute.xlu0 %1401 }
 0x3af   : > { %v1419_v39 = vcombine.low %v1017_v15, %v1408_v35  ;;  %v1420_v41 = vcombine.high %v1017_v15, %v1408_v35 }
 0x3b1   : > { %v1427_v47 = vrot.slane %v1419_v39, %v6938_v38  ;;  %v1434_v48 = vrot.slane %v1420_v41, %v6938_v38 }
 0x3b2   : > { %v1414_v42 = vpop.permute.xlu0 %1413  ;;  %v1404_v43 = vpop.permute.xlu1 %1403 }
 0x3b3   : > { %v1435_v44 = vcombine.low %v1402_v36, %v1414_v42  ;;  %v1436_v45 = vcombine.high %v1402_v36, %v1414_v42 }
 0x3b5   : > { %v1443_v49 = vrot.slane %v1435_v44, %v6938_v38  ;;  %v1450_v50 = vrot.slane %v1436_v45, %v6938_v38 }
 0x3b6   : > { %v1112_v51 = vpop.permute.xlu0 %1111  ;;  %v1410_v52 = vpop.permute.xlu1 %1409 }
 0x3b7   : > { %v1451_v53 = vcombine.low %v1427_v47, %v1443_v49  ;;  %v1452_v54 = vcombine.high %v1427_v47, %v1443_v49  ;;  %v1467_v55 = vcombine.low %v1434_v48, %v1450_v50  ;;  %v1468_v56 = vcombine.high %v1434_v48, %v1450_v50 }
 0x3b8   : > { %v1123_v57 = vcombine.low %v6899_v8, %v1112_v51  ;;  %v1124_v58 = vcombine.high %v6899_v8, %v1112_v51  ;;  %v1487_v59 = vcombine.low %v6912_v19, %v1410_v52  ;;  %v1488_v60 = vcombine.high %v6912_v19, %v1410_v52 }
 0x3b9   : > { %v1459_v61 = vrot.slane %v1451_v53, %v6941_v46  ;;  %v1466_v62 = vrot.slane %v1452_v54, %v6941_v46  ;;  %v1475_v63 = vrot.slane %v1467_v55, %v6941_v46  ;;  %v1482_v0 = vrot.slane %v1468_v56, %v6941_v46 }
 0x3ba   : > { %v1131_v1 = vrot.slane %v1123_v57, %v6938_v38  ;;  %v1138_v3 = vrot.slane %v1124_v58, %v6938_v38  ;;  %v1118_v4 = vpop.permute.xlu0 %1117  ;;  %v1416_v5 = vpop.permute.xlu1 %1415  ;;  %v1495_v17 = vrot.slane %v1487_v59, %v6938_v38  ;;  %v1502_v18 = vrot.slane %v1488_v60, %v6938_v38 }
 0x3bb   : > { %v1555_v6 = vcombine.low %v1459_v61, %v1466_v62  ;;  %v5813_v7 = vcombine.high %v1459_v61, %v1466_v62  ;;  %v1571_v8 = vcombine.low %v1475_v63, %v1482_v0  ;;  %v5814_v9 = vcombine.high %v1475_v63, %v1482_v0 }
 0x3bc   : > { %v1139_v10 = vcombine.low %v1106_v29, %v1118_v4  ;;  %v1140_v12 = vcombine.high %v1106_v29, %v1118_v4  ;;  %v1503_v13 = vcombine.low %v1404_v43, %v1416_v5  ;;  %v1504_v14 = vcombine.high %v1404_v43, %v1416_v5 }
 0x3bd   : > { %v6958_v15 = vrot.slane %v1555_v6, %v6938_v38  ;;  %v6961_v16 = vrot.slane %v5813_v7, %v6938_v38  ;;  %v6970_v28 = vrot.slane %v1571_v8, %v6938_v38  ;;  %v6973_v29 = vrot.slane %v5814_v9, %v6938_v38 }
 0x3be   : > { %v1147_v19 = vrot.slane %v1139_v10, %v6938_v38  ;;  %v1154_v21 = vrot.slane %v1140_v12, %v6938_v38  ;;  %v1511_v24 = vrot.slane %v1503_v13, %v6938_v38  ;;  %v1518_v26 = vrot.slane %v1504_v14, %v6938_v38  ;;  %v1114_v27 = vpop.permute.xlu1 %1113 }
 0x3bf   : > { %v1191_v31 = vcombine.low %v6901_v11, %v1114_v27  ;;  %v1192_v32 = vcombine.high %v6901_v11, %v1114_v27  ;;  %v1603_v4 = vcombine.low %v6970_v28, %v6973_v29 }
 0x3c0   : > { %v1155_v33 = vcombine.low %v1131_v1, %v1147_v19  ;;  %v1156_v35 = vcombine.high %v1131_v1, %v1147_v19  ;;  %v1171_v36 = vcombine.low %v1138_v3, %v1154_v21  ;;  %v1172_v37 = vcombine.high %v1138_v3, %v1154_v21 }
 0x3c1   : > { %v1519_v39 = vcombine.low %v1495_v17, %v1511_v24  ;;  %v1520_v41 = vcombine.high %v1495_v17, %v1511_v24  ;;  %v1535_v42 = vcombine.low %v1502_v18, %v1518_v26  ;;  %v1536_v43 = vcombine.high %v1502_v18, %v1518_v26 }
 0x3c2   : > { %v1163_v44 = vrot.slane %v1155_v33, %v6941_v46  ;;  %v1170_v45 = vrot.slane %v1156_v35, %v6941_v46  ;;  %v1179_v47 = vrot.slane %v1171_v36, %v6941_v46  ;;  %v1186_v48 = vrot.slane %v1172_v37, %v6941_v46  ;;  %v1120_v0 = vpop.permute.xlu1 %1119 }
 0x3c3   : > { %v1527_v49 = vrot.slane %v1519_v39, %v6941_v46  ;;  %v1534_v11 = vrot.slane %v1520_v41, %v6941_v46  ;;  %v1543_v50 = vrot.slane %v1535_v42, %v6941_v46  ;;  %v1550_v51 = vrot.slane %v1536_v43, %v6941_v46 }
 0x3c4   : > { %v1259_v52 = vcombine.low %v1163_v44, %v1170_v45  ;;  %v5809_v53 = vcombine.high %v1163_v44, %v1170_v45  ;;  %v1275_v54 = vcombine.low %v1179_v47, %v1186_v48  ;;  %v5810_v55 = vcombine.high %v1179_v47, %v1186_v48 }
 0x3c5   : > { %v1623_v56 = vcombine.low %v1527_v49, %v1534_v11  ;;  %v5815_v57 = vcombine.high %v1527_v49, %v1534_v11  ;;  %v1639_v58 = vcombine.low %v1543_v50, %v1550_v51  ;;  %v5816_v59 = vcombine.high %v1543_v50, %v1550_v51 }
 0x3c6   : > { %v1266_v60 = vrot.slane %v1259_v52, %v6938_v38  ;;  %v1274_v61 = vrot.slane %v5809_v53, %v6938_v38  ;;  %v6988_v62 = vrot.slane %v1275_v54, %v6938_v38  ;;  %v6991_v63 = vrot.slane %v5810_v55, %v6938_v38 }
 0x3c7   : > { %v1630_v1 = vrot.slane %v1623_v56, %v6938_v38  ;;  %v1587_v3 = vcombine.low %v6958_v15, %v6961_v16  ;;  %v1638_v6 = vrot.slane %v5815_v57, %v6938_v38  ;;  %v1646_v7 = vrot.slane %v1639_v58, %v6938_v38 }
 0x3c8   : > { %v1291_v5 = vcombine.low %v1266_v60, %v1274_v61  ;;  %v1654_v8 = vrot.slane %v5816_v59, %v6938_v38  ;;  %v1292_v9 = vcombine.high %v1266_v60, %v1274_v61  ;;  %v1307_v10 = vcombine.low %v6988_v62, %v6991_v63 }
 0x3c9   : > { %v1207_v12 = vcombine.low %v6933_v30, %v1120_v0  ;;  %v1208_v13 = vcombine.high %v6933_v30, %v1120_v0  ;;  %v1308_v17 = vcombine.high %v6988_v62, %v6991_v63  ;;  %v1199_v18 = vrot.slane %v1191_v31, %v6938_v38 }
 0x3ca   : > { %v7006_v14 = vrot.slane %v1291_v5, %v6941_v46  ;;  %v1206_v19 = vrot.slane %v1192_v32, %v6938_v38  ;;  %v1595_v26 = vrot.slane %v1587_v3, %v6941_v46  ;;  %v1611_v27 = vrot.slane %v1603_v4, %v6941_v46 }
 0x3cb   : > { %v1215_v21 = vrot.slane %v1207_v12, %v6938_v38  ;;  %v1222_v24 = vrot.slane %v1208_v13, %v6938_v38  ;;  %v1655_v30 = vcombine.low %v1630_v1, %v1638_v6  ;;  %v1671_v33 = vcombine.low %v1646_v7, %v1654_v8 }
 0x3cc   : > { %v1588_v35 = vcombine.high %v6958_v15, %v6961_v16  ;;  %v1604_v36 = vcombine.high %v6970_v28, %v6973_v29  ;;  %v1619_v41 = vcombine.low %v1595_v26, %v1611_v27  ;;  %v1656_v48 = vcombine.high %v1630_v1, %v1638_v6 }
 0x3cd   : > { %v1223_v37 = vcombine.low %v1199_v18, %v1215_v21  ;;  %v1224_v31 = vcombine.high %v1199_v18, %v1215_v21  ;;  %v1239_v39 = vcombine.low %v1206_v19, %v1222_v24  ;;  %v1240_v32 = vcombine.high %v1206_v19, %v1222_v24 }
 0x3ce   : > { %v1663_v42 = vrot.slane %v1655_v30, %v6941_v46  ;;  %v1679_v43 = vrot.slane %v1671_v33, %v6941_v46  ;;  %v1602_v44 = vrot.slane %v1588_v35, %v6941_v46  ;;  %v1618_v29 = vrot.slane %v1604_v36, %v6941_v46 }
 0x3cf   : > { %v1231_v45 = vrot.slane %v1223_v37, %v6941_v46  ;;  %v1238_v47 = vrot.slane %v1224_v31, %v6941_v46  ;;  %v1247_v15 = vrot.slane %v1239_v39, %v6941_v46  ;;  %v1254_v16 = vrot.slane %v1240_v32, %v6941_v46 }
 0x3d0   : > { %v1687_v28 = vcombine.low %v1663_v42, %v1679_v43  ;;  %v1672_v49 = vcombine.high %v1646_v7, %v1654_v8  ;;  %v1306_v53 = vrot.slane %v1292_v9, %v6941_v46  ;;  %v1670_v55 = vrot.slane %v1656_v48, %v6941_v46 }
 0x3d1   : > { %v1327_v11 = vcombine.low %v1231_v45, %v1238_v47  ;;  %v5811_v50 = vcombine.high %v1231_v45, %v1238_v47  ;;  %v1343_v51 = vcombine.low %v1247_v15, %v1254_v16  ;;  %v5812_v52 = vcombine.high %v1247_v15, %v1254_v16 }
 0x3d2   : > { %v1691_v54 = vpack.c.bf16 %v1687_v28, %v1619_v41  ;;  %v1686_v56 = vrot.slane %v1672_v49, %v6941_v46  ;;  %v1315_v61 = vrot.slane %v1307_v10, %v6941_v46  ;;  %v1621_v63 = vcombine.low %v1602_v44, %v1618_v29 }
 0x3d3   : > { %v1334_v57 = vrot.slane %v1327_v11, %v6938_v38  ;;  %v1342_v58 = vrot.slane %v5811_v50, %v6938_v38  ;;  %v1350_v59 = vrot.slane %v1343_v51, %v6938_v38  ;;  %v1358_v60 = vrot.slane %v5812_v52, %v6938_v38 }
 0x3d4   : > { %v1996_v62 = vsel %vm1991_vm2, %v1691_v54, 0  ;;  %v1689_v0 = vcombine.low %v1670_v55, %v1686_v56  ;;  %v1322_v6 = vrot.slane %v1308_v17, %v6941_v46  ;;  %v1620_v8 = vcombine.high %v1595_v26, %v1611_v27 }
 0x3d5   : > { %v1359_v1 = vcombine.low %v1334_v57, %v1342_v58  ;;  %v1360_v3 = vcombine.high %v1334_v57, %v1342_v58  ;;  %v1375_v4 = vcombine.low %v1350_v59, %v1358_v60  ;;  %v1376_v5 = vcombine.high %v1350_v59, %v1358_v60  ;;  %6195 = vmatpush3.bf16.xpose.msra.mxu1 %v1996_v62 }
 0x3d6   : > { %v1693_v7 = vpack.c.bf16 %v1689_v0, %v1621_v63  ;;  %6200 = vmatprep.subr.bf16.mxu1 %v6620_v40  ;;  %v1688_v9 = vcombine.high %v1663_v42, %v1679_v43  ;;  %v1323_v21 = vcombine.low %v7006_v14, %v1315_v61  ;;  %v1325_v33 = vcombine.low %v1306_v53, %v1322_v6 }
 0x3d7   : > { %v1367_v12 = vrot.slane %v1359_v1, %v6941_v46  ;;  %v1374_v10 = vrot.slane %v1360_v3, %v6941_v46  ;;  %v1383_v13 = vrot.slane %v1375_v4, %v6941_v46  ;;  %v1390_v18 = vrot.slane %v1376_v5, %v6941_v46 }
 0x3d8   : > { %v2090_v19 = vsel %vm1991_vm2, %v1693_v7, 0  ;;  %v1692_v30 = vpack.c.bf16 %v1688_v9, %v1620_v8  ;;  %v1690_v36 = vcombine.high %v1670_v55, %v1686_v56  ;;  %v1622_v31 = vcombine.high %v1602_v44, %v1618_v29  ;;  %v5803_v8 = vld [vmem:[%s7915_s10] ss:$0 sm:$0xff] }
 0x3d9   : > { %6207 = vmatpush3.bf16.xpose.msra.mxu0 %v2090_v19  ;;  %v1391_v24 = vcombine.low %v1367_v12, %v1383_v13  ;;  %v1393_v17 = vcombine.low %v1374_v10, %v1390_v18  ;;  %v1392_v37 = vcombine.high %v1367_v12, %v1383_v13  ;;  %v1324_v39 = vcombine.high %v7006_v14, %v1315_v61 }
 0x3da   : > { %6218 = vmatprep.subr.bf16.mxu0 %v6620_v40  ;;  %v2043_v35 = vsel %vm1991_vm2, %v1692_v30, 0  ;;  %v1694_v32 = vpack.c.bf16 %v1690_v36, %v1622_v31  ;;  %v1394_v43 = vcombine.high %v1374_v10, %v1390_v18  ;;  %v1326_v44 = vcombine.high %v1306_v53, %v1322_v6 }
 0x3db   : > { %v1395_v26 = vpack.c.bf16 %v1391_v24, %v1323_v21  ;;  %v1397_v27 = vpack.c.bf16 %v1393_v17, %v1325_v33  ;;  %v1396_v41 = vpack.c.bf16 %v1392_v37, %v1324_v39  ;;  %v7077_v9 = vadd.f32 %v5803_v8, %v6927_v23 }
 0x3dc   : > { %v2137_v42 = vsel %vm1991_vm2, %v1694_v32, 0  ;;  %v1398_v45 = vpack.c.bf16 %v1394_v43, %v1326_v44  ;;  %v7082_v12 = vadd.f32 %v5803_v8, %v6925_v20 }
 0x3dd   : > { %6197 = vmatmul.mubr.msk.bf16.vlgmr.msra.gmra.mrb[12].mxu1 %vm1991_vm2, %v1395_v26 }
 0x3de   : > { %6201 = vmatpush3.bf16.xpose.msra.mxu1 %v2043_v35  ;;  %6202 = vmatprep.mubr.msk.bf16.mxu1 %vm6621_vm1, %v6620_v40 }
 0x3df   : > { %6212 = vmatprep.subr.bf16.mxu1 %v6620_v40 }
 0x3e0   : > { %6209 = vmatmul.mubr.msk.bf16.vlgmr.msra.gmra.mrb[4].mxu0 %vm1991_vm2, %v1397_v27 }
 0x3e1   : > { %6220 = vmatprep.mubr.msk.bf16.mxu0 %vm6621_vm1, %v6620_v40 }
 0x3e5   : > { %6203 = vmatmul.mubr.msk.bf16.vlgmr.msra.gmra.mrb[16].mxu1 %vm1991_vm2, %v1396_v41 }
 0x3e6   : > { %6213 = vmatpush3.bf16.xpose.msra.mxu1 %v2137_v42  ;;  %6214 = vmatprep.mubr.msk.bf16.mxu1 %vm6621_vm1, %v6620_v40 }
 0x3e7   : > { %6224 = vmatprep.subr.bf16.mxu1 %v6620_v40 }
 0x3ed   : > { %6215 = vmatmul.mubr.msk.bf16.vlgmr.msra.gmra.mrb[20].mxu1 %vm1991_vm2, %v1398_v45 }
 0x3ee   : > { %6226 = vmatprep.mubr.msk.bf16.mxu1 %vm6621_vm1, %v6620_v40 }
 0x4b0   : > { %v2032_v14 = vpop.f32.mrb[12].mxu1 }
 0x4b1   : > { %v2180_v47 = vmul.f32 0.25, %v2032_v14  ;;  %v6198_v15 = vpop.f32.mrb[13].mxu1 }
 0x4b2   : > { %v2035_v16 = vpop.f32.mrb[14].mxu1 }
 0x4b3   : > { %v2126_v28 = vpop.f32.mrb[4].mxu0  ;;  %v2181_v29 = vmul.f32 0.25, %v2035_v16  ;;  %v6199_v48 = vpop.f32.mrb[15].mxu1  ;;  %v2188_v49 = vsel %vm1991_vm2, %v2180_v47, -inf }
 0x4b4   : > { %v6210_v11 = vpop.f32.mrb[5].mxu0  ;;  %2189 = vmax.xlane.f32.xlu0 %v2188_v49  ;;  %v2184_v62 = vmul.f32 0.25, %v2126_v28 }
 0x4b5   : > { %v2129_v50 = vpop.f32.mrb[6].mxu0  ;;  %v2191_v51 = vsel %vm1991_vm2, %v2181_v29, -inf }
 0x4b6   : > { %v7065_v52 = vmul.f32 0.25, %v2129_v50  ;;  %v6211_v53 = vpop.f32.mrb[7].mxu0  ;;  %2192 = vmax.xlane.f32.xlu1 %v2191_v51  ;;  %v2200_v6 = vsel %vm1991_vm2, %v2184_v62, -inf }
 0x4b8   : > { %v2079_v54 = vpop.f32.mrb[16].mxu1  ;;  %v2203_v57 = vsel %vm1991_vm2, %v7065_v52, -inf }
 0x4b9   : > { %v2182_v55 = vmul.f32 0.25, %v2079_v54  ;;  %v6204_v56 = vpop.f32.mrb[17].mxu1 }
 0x4ba   : > { %2204 = vmax.xlane.f32.xlu1 %v2203_v57  ;;  %v2082_v58 = vpop.f32.mrb[18].mxu1 }
 0x4bb   : > { %v2183_v59 = vmul.f32 0.25, %v2082_v58  ;;  %v6205_v60 = vpop.f32.mrb[19].mxu1  ;;  %v2194_v61 = vsel %vm1991_vm2, %v2182_v55, -inf }
 0x4bc   : > { %2195 = vmax.xlane.f32.xlu0 %v2194_v61 }
 0x4bd   : > { %v2197_v63 = vsel %vm1991_vm2, %v2183_v59, -inf }
 0x4c0   : > { %2198 = vmax.xlane.f32.xlu0 %v2197_v63  ;;  %v2173_v0 = vpop.f32.mrb[20].mxu1 }
 0x4c1   : > { %v6216_v1 = vpop.f32.mrb[21].mxu1  ;;  %v2186_v4 = vmul.f32 0.25, %v2173_v0 }
 0x4c2   : > { %v2176_v3 = vpop.f32.mrb[22].mxu1 }
 0x4c3   : > { %v6217_v5 = vpop.f32.mrb[23].mxu1  ;;  %v2206_v7 = vsel %vm1991_vm2, %v2186_v4, -inf  ;;  %v2187_v10 = vmul.f32 0.25, %v2176_v3 }
 0x4c4   : > { %2201 = vmax.xlane.f32.xlu0 %v2200_v6 }
 0x4c5   : > { %v2209_v13 = vsel %vm1991_vm2, %v2187_v10, -inf }
 0x4c8   : > { %2207 = vmax.xlane.f32.xlu0 %v2206_v7 }
 0x4cb   : > { %1699 = vrot.lane.b32.xlu1 %v7077_v9, %s7938_s5 }
 0x4cf   : > { %1703 = vrot.lane.b32.xlu1 %v7082_v12, %s7936_s2 }
 0x4de   : > { %1697 = vrot.lane.b32.xlu0 %v7082_v12, %s7938_s5 }
 0x4e2   : > { %1709 = vrot.lane.b32.xlu0 %v7082_v12, %s7934_s25 }
 0x4f3   : > { %2210 = vmax.xlane.f32.xlu1 %v2209_v13 }
 0x504   : > { %1705 = vrot.lane.b32.xlu1 %v7077_v9, %s7936_s2 }
 0x541   : > { %v2190_v23 = vpop.xlane.xlu0 %2189 }
 0x542   : > { %v2212_v18 = vsub.f32 %v2180_v47, %v2190_v23 }
 0x543   : > { %v2193_v20 = vpop.xlane.xlu1 %2192 }
 0x544   : > { %v2220_v19 = vmul.f32 1.442695, %v2212_v18  ;;  %v2213_v21 = vsub.f32 %v2181_v29, %v2193_v20 }
 0x546   : > { %6519 = vpow2.f32 %v2220_v19  ;;  %v2222_v24 = vmul.f32 1.442695, %v2213_v21 }
 0x547   : > { %v2205_v11 = vpop.xlane.xlu1 %2204 }
 0x548   : > { %6521 = vpow2.f32 %v2222_v24  ;;  %v2217_v51 = vsub.f32 %v7065_v52, %v2205_v11 }
 0x549   : > { %v2196_v17 = vpop.xlane.xlu0 %2195 }
 0x54a   : > { %v2214_v30 = vsub.f32 %v2182_v55, %v2196_v17  ;;  %v2230_v54 = vmul.f32 1.442695, %v2217_v51 }
 0x54b   : > { %v1700_v50 = vpop.permute.xlu1 %1699 }
 0x54c   : > { %v2224_v33 = vmul.f32 1.442695, %v2214_v30 }
 0x54d   : > { %v2199_v26 = vpop.xlane.xlu0 %2198 }
 0x54e   : > { %6523 = vpow2.f32 %v2224_v33  ;;  %v2215_v27 = vsub.f32 %v2183_v59, %v2199_v26 }
 0x54f   : > { %v1704_v53 = vpop.permute.xlu1 %1703 }
 0x550   : > { %v7093_v35 = vpop.eup %6519  ;;  %v2226_v36 = vmul.f32 1.442695, %v2215_v27  ;;  %v1715_v0 = vcombine.low %v7082_v12, %v1704_v53  ;;  %v1716_v3 = vcombine.high %v7082_v12, %v1704_v53 }
 0x551   : > { %v2202_v37 = vpop.xlane.xlu0 %2201  ;;  %v2236_v31 = vsel %vm1991_vm2, %v7093_v35, 0.0 }
 0x552   : > { %v7097_v39 = vpop.eup %6521  ;;  %6525 = vpow2.f32 %v2226_v36  ;;  %v2216_v32 = vsub.f32 %v2184_v62, %v2202_v37  ;;  %2237 = vadd.xlane.f32.xlu0 %v2236_v31  ;;  %v1723_v5 = vrot.slane %v1715_v0, %v6938_v38  ;;  %v1730_v8 = vrot.slane %v1716_v3, %v6938_v38 }
 0x553   : > { %v2239_v41 = vsel %vm1991_vm2, %v7097_v39, 0.0 }
 0x554   : > { %v2228_v42 = vmul.f32 1.442695, %v2216_v32  ;;  %2240 = vadd.xlane.f32.xlu1 %v2239_v41 }
 0x555   : > { %v2208_v43 = vpop.xlane.xlu0 %2207 }
 0x556   : > { %6527 = vpow2.f32 %v2228_v42  ;;  %v2218_v44 = vsub.f32 %v2186_v4, %v2208_v43 }
 0x558   : > { %v7101_v45 = vpop.eup %6523  ;;  %v2232_v14 = vmul.f32 1.442695, %v2218_v44 }
 0x559   : > { %v2242_v47 = vsel %vm1991_vm2, %v7101_v45, 0.0  ;;  %v1698_v52 = vpop.permute.xlu0 %1697 }
 0x55a   : > { %6529 = vpow2.f32 %v2232_v14  ;;  %2243 = vadd.xlane.f32.xlu0 %v2242_v47 }
 0x55b   : > { %6531 = vpow2.f32 %v2230_v54 }
 0x55c   : > { %v7105_v15 = vpop.eup %6525 }
 0x55d   : > { %v2245_v16 = vsel %vm1991_vm2, %v7105_v15, 0.0  ;;  %v1710_v62 = vpop.permute.xlu0 %1709 }
 0x55e   : > { %2246 = vadd.xlane.f32.xlu1 %v2245_v16  ;;  %v1731_v63 = vcombine.low %v1698_v52, %v1710_v62  ;;  %v1732_v1 = vcombine.high %v1698_v52, %v1710_v62 }
 0x560   : > { %v7109_v28 = vpop.eup %6527  ;;  %v1739_v4 = vrot.slane %v1731_v63, %v6938_v38  ;;  %v1746_v6 = vrot.slane %v1732_v1, %v6938_v38 }
 0x561   : > { %v2248_v29 = vsel %vm1991_vm2, %v7109_v28, 0.0 }
 0x562   : > { %2249 = vadd.xlane.f32.xlu0 %v2248_v29  ;;  %v1748_v13 = vcombine.high %v1723_v5, %v1739_v4  ;;  %v1763_v23 = vcombine.low %v1730_v8, %v1746_v6  ;;  %v1764_v18 = vcombine.high %v1730_v8, %v1746_v6 }
 0x564   : > { %v7113_v48 = vpop.eup %6529  ;;  %v1762_v21 = vrot.slane %v1748_v13, %v6941_v46  ;;  %v1771_v12 = vrot.slane %v1763_v23, %v6941_v46  ;;  %v1778_v24 = vrot.slane %v1764_v18, %v6941_v46 }
 0x565   : > { %v2254_v49 = vsel %vm1991_vm2, %v7113_v48, 0.0  ;;  %v7120_v58 = vpop.eup %6531 }
 0x566   : > { %2255 = vadd.xlane.f32.xlu0 %v2254_v49  ;;  %v2251_v61 = vsel %vm1991_vm2, %v7120_v58, 0.0  ;;  %v1867_v37 = vcombine.low %v1771_v12, %v1778_v24  ;;  %v5818_v31 = vcombine.high %v1771_v12, %v1778_v24 }
 0x568   : > { %v1874_v49 = vrot.slane %v1867_v37, %v6938_v38  ;;  %v1882_v11 = vrot.slane %v5818_v31, %v6938_v38 }
 0x56a   : > { %v1899_v52 = vcombine.low %v1874_v49, %v1882_v11  ;;  %v1900_v23 = vcombine.high %v1874_v49, %v1882_v11 }
 0x56c   : > { %v1914_v37 = vrot.slane %v1900_v23, %v6941_v46 }
 0x56f   : > { %1711 = vrot.lane.b32.xlu1 %v7077_v9, %s7934_s25  ;;  %s7952_s25 = smov 112  }
 0x580   : > { %v2211_v55 = vpop.xlane.xlu1 %2210 }
 0x581   : > { %v2219_v56 = vsub.f32 %v2187_v10, %v2211_v55  ;;  %v1747_v10 = vcombine.low %v1723_v5, %v1739_v4 }
 0x583   : > { %v2234_v57 = vmul.f32 1.442695, %v2219_v56  ;;  %v1755_v19 = vrot.slane %v1747_v10, %v6941_v46  ;;  %v1907_v10 = vrot.slane %v1899_v52, %v6941_v46 }
 0x584   : > { %v1706_v7 = vpop.permute.xlu1 %1705 }
 0x585   : > { %6533 = vpow2.f32 %v2234_v57  ;;  %v1851_v30 = vcombine.low %v1755_v19, %v1762_v21  ;;  %v1783_v33 = vcombine.low %v7077_v9, %v1706_v7  ;;  %v1784_v26 = vcombine.high %v7077_v9, %v1706_v7 }
 0x586   : > { %v5817_v36 = vcombine.high %v1755_v19, %v1762_v21 }
 0x587   : > { %v1858_v43 = vrot.slane %v1851_v30, %v6938_v38  ;;  %v1791_v44 = vrot.slane %v1783_v33, %v6938_v38  ;;  %v1798_v14 = vrot.slane %v1784_v26, %v6938_v38 }
 0x588   : > { %v1866_v29 = vrot.slane %v5817_v36, %v6938_v38 }
 0x58a   : > { %v1884_v13 = vcombine.high %v1858_v43, %v1866_v29 }
 0x58c   : > { %v1898_v36 = vrot.slane %v1884_v13, %v6941_v46 }
 0x58e   : > { %v1917_v11 = vcombine.low %v1898_v36, %v1914_v37 }
 0x58f   : > { %v7122_v59 = vpop.eup %6533 }
 0x590   : > { %v2257_v60 = vsel %vm1991_vm2, %v7122_v59, 0.0 }
 0x591   : > { %2258 = vadd.xlane.f32.xlu0 %v2257_v60 }
 0x593   : > { %2252 = vadd.xlane.f32.xlu1 %v2251_v61  ;;  %v1883_v61 = vcombine.low %v1858_v43, %v1866_v29 }
 0x595   : > { %v1891_v8 = vrot.slane %v1883_v61, %v6941_v46 }
 0x597   : > { %v1915_v31 = vcombine.low %v1891_v8, %v1907_v10 }
 0x5df   : > { %v2238_v27 = vpop.xlane.xlu0 %2237 }
 0x5e0   : > { %6535 = vrcp.f32 %v2238_v27 }
 0x5e1   : > { %v2241_v20 = vpop.xlane.xlu1 %2240 }
 0x5e2   : > { %6537 = vrcp.f32 %v2241_v20 }
 0x5e7   : > { %v2244_v47 = vpop.xlane.xlu0 %2243 }
 0x5ea   : > { %v6536_v7 = vpop.eup %6535 }
 0x5eb   : > { %v2247_v17 = vpop.xlane.xlu1 %2246  ;;  %v2268_v29 = vmul.f32 %v6536_v7, %v7093_v35 }
 0x5ec   : > { %6539 = vrcp.f32 %v2247_v17  ;;  %v6538_v18 = vpop.eup %6537 }
 0x5ed   : > { %6541 = vrcp.f32 %v2244_v47  ;;  %v2269_v43 = vmul.f32 %v6538_v18, %v7097_v39 }
 0x5ef   : > { %v1712_v32 = vpop.permute.xlu1 %1711  ;;  %v2250_v35 = vpop.xlane.xlu0 %2249 }
 0x5f0   : > { %v1799_v41 = vcombine.low %v1700_v50, %v1712_v32  ;;  %v1800_v42 = vcombine.high %v1700_v50, %v1712_v32 }
 0x5f2   : > { %v1807_v16 = vrot.slane %v1799_v41, %v6938_v38  ;;  %v1814_v9 = vrot.slane %v1800_v42, %v6938_v38  ;;  %v1916_v41 = vcombine.high %v1891_v8, %v1907_v10 }
 0x5f4   : > { %v1815_v50 = vcombine.low %v1791_v44, %v1807_v16  ;;  %v1816_v51 = vcombine.high %v1791_v44, %v1807_v16  ;;  %v1831_v53 = vcombine.low %v1798_v14, %v1814_v9  ;;  %v1832_v54 = vcombine.high %v1798_v14, %v1814_v9 }
 0x5f6   : > { %v1823_v55 = vrot.slane %v1815_v50, %v6941_v46  ;;  %v1830_v56 = vrot.slane %v1816_v51, %v6941_v46  ;;  %v1839_v57 = vrot.slane %v1831_v53, %v6941_v46  ;;  %v1846_v60 = vrot.slane %v1832_v54, %v6941_v46  ;;  %v6540_v24 = vpop.eup %6539 }
 0x5f7   : > { %v6542_v27 = vpop.eup %6541  ;;  %v2271_v44 = vmul.f32 %v6540_v24, %v7105_v15  ;;  %v1918_v50 = vcombine.high %v1898_v36, %v1914_v37  ;;  %v2276_v51 = vpack.c.bf16 %v2269_v43, %v2268_v29 }
 0x5f8   : > { %v1919_v62 = vcombine.low %v1823_v55, %v1830_v56  ;;  %v5819_v63 = vcombine.high %v1823_v55, %v1830_v56  ;;  %v1935_v0 = vcombine.low %v1839_v57, %v1846_v60  ;;  %v5820_v1 = vcombine.high %v1839_v57, %v1846_v60 }
 0x5f9   : > { %v2270_v49 = vmul.f32 %v6542_v27, %v7101_v45  ;;  %v2256_v45 = vpop.xlane.xlu0 %2255 }
 0x5fa   : > { %v1926_v3 = vrot.slane %v1919_v62, %v6938_v38  ;;  %v1934_v4 = vrot.slane %v5819_v63, %v6938_v38  ;;  %v1942_v5 = vrot.slane %v1935_v0, %v6938_v38  ;;  %v1950_v6 = vrot.slane %v5820_v1, %v6938_v38 }
 0x5fb   : > { %v2277_v53 = vpack.c.bf16 %v2271_v44, %v2270_v49  ;;  %6543 = vrcp.f32 %v2256_v45 }
 0x5fc   : > { %v1951_v20 = vcombine.low %v1926_v3, %v1934_v4  ;;  %v1967_v19 = vcombine.low %v1942_v5, %v1950_v6  ;;  %v1952_v21 = vcombine.high %v1926_v3, %v1934_v4  ;;  %v1968_v12 = vcombine.high %v1942_v5, %v1950_v6 }
 0x5fd   : > { %6545 = vrcp.f32 %v2250_v35 }
 0x5fe   : > { %v1959_v17 = vrot.slane %v1951_v20, %v6941_v46  ;;  %v1975_v30 = vrot.slane %v1967_v19, %v6941_v46  ;;  %v1966_v33 = vrot.slane %v1952_v21, %v6941_v46  ;;  %v1982_v26 = vrot.slane %v1968_v12, %v6941_v46 }
 0x600   : > { %v1983_v32 = vcombine.low %v1959_v17, %v1975_v30  ;;  %v1984_v42 = vcombine.high %v1959_v17, %v1975_v30  ;;  %v1985_v16 = vcombine.low %v1966_v33, %v1982_v26  ;;  %v1986_v9 = vcombine.high %v1966_v33, %v1982_v26 }
 0x602   : > { %v1987_v14 = vpack.c.bf16 %v1983_v32, %v1915_v31  ;;  %v1988_v47 = vpack.c.bf16 %v1984_v42, %v1916_v41  ;;  %v1989_v39 = vpack.c.bf16 %v1985_v16, %v1917_v11  ;;  %v1990_v15 = vpack.c.bf16 %v1986_v9, %v1918_v50 }
 0x604   : > { %6219 = vmatpush3.bf16.msra.mxu0 %v1987_v14  ;;  %6225 = vmatpush3.bf16.msra.mxu1 %v1988_v47 }
 0x605   : > { %6230 = vmatprep.subr.bf16.mxu0 %v6620_v40  ;;  %6236 = vmatprep.subr.bf16.mxu1 %v6620_v40  ;;  %v6544_v56 = vpop.eup %6543 }
 0x606   : > { %v2274_v61 = vmul.f32 %v6544_v56, %v7113_v48  ;;  %v6435_v48 = vld [vmem:[%s7916_s11] sm:$0xff]  }
 0x607   : > { %6221 = vmatmul.mubr.msk.bf16.vlgmr.msra.gmra.mrb[8].mxu0 %vm1991_vm2, %v2276_v51  ;;  %6227 = vmatmul.mubr.msk.bf16.vlgmr.msra.gmra.mrb[24].mxu1 %vm1991_vm2, %v2277_v53  ;;  %v6546_v57 = vpop.eup %6545 }
 0x608   : > { %6231 = vmatpush3.bf16.msra.mxu0 %v1989_v39  ;;  %6237 = vmatpush3.bf16.msra.mxu1 %v1990_v15  ;;  %v2272_v63 = vmul.f32 %v6546_v57, %v7109_v28  ;;  %v6436_v28 = vld [vmem:[%s7916_s11 + $0x8] sm:$0xff]  }
 0x609   : > { %6238 = vmatprep.mubr.msk.bf16.mxu1 %vm6621_vm1, %v6620_v40  ;;  %6232 = vmatprep.mubr.msk.bf16.mxu0 %vm6621_vm1, %v6620_v40 }
 0x60a   : > { %6242 = vmatprep.subr.bf16.mxu0 %v6620_v40 }
 0x61e   : > { %v2259_v54 = vpop.xlane.xlu0 %2258 }
 0x61f   : > { %6547 = vrcp.f32 %v2259_v54 }
 0x620   : > { %v2253_v55 = vpop.xlane.xlu1 %2252 }
 0x621   : > { %6549 = vrcp.f32 %v2253_v55 }
 0x629   : > { %v6548_v60 = vpop.eup %6547 }
 0x62a   : > { %v2275_v52 = vmul.f32 %v6548_v60, %v7122_v59 }
 0x62b   : > { %v6550_v62 = vpop.eup %6549 }
 0x62c   : > { %v2273_v0 = vmul.f32 %v6550_v62, %v7120_v58  ;;  %v2279_v1 = vpack.c.bf16 %v2275_v52, %v2274_v61 }
 0x62e   : > { %6239 = vmatmul.mubr.msk.bf16.vlgmr.msra.gmra.mrb[28].mxu1 %vm1991_vm2, %v2279_v1  ;;  %v2278_v3 = vpack.c.bf16 %v2273_v0, %v2272_v63 }
 0x62f   : > { %2986 = vmatprep.mubr.bf16.mxu1 %v6619_v2 }
 0x630   : > { %6233 = vmatmul.mubr.msk.bf16.vlgmr.msra.gmra.mrb[12].mxu0 %vm1991_vm2, %v2278_v3 }
 0x631   : > { %6250 = vmatprep.mubr.msk.bf16.mxu0 %vm6621_vm1, %v6620_v40  ;;  %6243 = vmatpush3.bf16.msra.mxu0 %v6435_v48 }
 0x632   : > { %6244 = vmatprep.subr.bf16.mxu0 %v6620_v40 }
 0x635   : > { %6245 = vmatpush3.bf16.msra.mxu0 %v6436_v28 }
 0x636   : > { %6246 = vmatprep.subr.bf16.mxu0 %v6620_v40 }
 0x6da   : > { %v2317_v58 = vpop.f32.mrb[8].mxu0  ;;  %v2361_v59 = vpop.f32.mrb[24].mxu1 }
 0x6db   : > { %v6222_v4 = vpop.f32.mrb[9].mxu0  ;;  %v6228_v5 = vpop.f32.mrb[25].mxu1 }
 0x6dc   : > { %v2320_v6 = vpop.f32.mrb[10].mxu0  ;;  %v2364_v7 = vpop.f32.mrb[26].mxu1 }
 0x6dd   : > { %v6223_v8 = vpop.f32.mrb[11].mxu0  ;;  %v6229_v10 = vpop.f32.mrb[27].mxu1 }
 0x6de   : > { %v6437_v10 = vld [vmem:[%s7916_s11 + $0x10] sm:$0xff]  }
 0x6df   : > { %6247 = vmatpush3.bf16.msra.mxu0 %v6437_v10 }
 0x6e0   : > { %6248 = vmatprep.subr.bf16.mxu0 %v6620_v40 }
 0x701   : > { %v2449_v13 = vpop.f32.mrb[28].mxu1 }
 0x702   : > { %v2472_v23 = vcombine.low %v2361_v59, %v2449_v13  ;;  %v2473_v18 = vcombine.high %v2361_v59, %v2449_v13  ;;  %v6240_v20 = vpop.f32.mrb[29].mxu1 }
 0x703   : > { %v2405_v19 = vpop.f32.mrb[12].mxu0  ;;  %v2452_v21 = vpop.f32.mrb[30].mxu1 }
 0x704   : > { %v2456_v12 = vcombine.low %v2317_v58, %v2405_v19  ;;  %v2457_v24 = vcombine.high %v2317_v58, %v2405_v19  ;;  %v6234_v17 = vpop.f32.mrb[13].mxu0  ;;  %v6241_v30 = vpop.f32.mrb[31].mxu1  ;;  %v2480_v33 = vrot.slane %v2472_v23, %v6938_v38  ;;  %v2487_v26 = vrot.slane %v2473_v18, %v6938_v38 }
 0x705   : > { %v2540_v27 = vcombine.low %v2364_v7, %v2452_v21  ;;  %v2541_v36 = vcombine.high %v2364_v7, %v2452_v21  ;;  %v2408_v37 = vpop.f32.mrb[14].mxu0 }
 0x706   : > { %v2464_v31 = vrot.slane %v2456_v12, %v6938_v38  ;;  %v2471_v32 = vrot.slane %v2457_v24, %v6938_v38  ;;  %v2524_v41 = vcombine.low %v2320_v6, %v2408_v37  ;;  %v2525_v42 = vcombine.high %v2320_v6, %v2408_v37  ;;  %v6235_v43 = vpop.f32.mrb[15].mxu0 }
 0x707   : > { %v2548_v9 = vrot.slane %v2540_v27, %v6938_v38  ;;  %v2555_v29 = vrot.slane %v2541_v36, %v6938_v38 }
 0x708   : > { %v2488_v44 = vcombine.low %v2464_v31, %v2480_v33  ;;  %v2489_v14 = vcombine.high %v2464_v31, %v2480_v33  ;;  %v2504_v47 = vcombine.low %v2471_v32, %v2487_v26  ;;  %v2505_v16 = vcombine.high %v2471_v32, %v2487_v26 }
 0x709   : > { %v2532_v49 = vrot.slane %v2524_v41, %v6938_v38  ;;  %v2539_v11 = vrot.slane %v2525_v42, %v6938_v38 }
 0x70a   : > { %v2496_v50 = vrot.slane %v2488_v44, %v6941_v46  ;;  %v2503_v51 = vrot.slane %v2489_v14, %v6941_v46  ;;  %v2512_v53 = vrot.slane %v2504_v47, %v6941_v46  ;;  %v2519_v39 = vrot.slane %v2505_v16, %v6941_v46  ;;  %v6438_v44 = vld [vmem:[%s7916_s11 + $0x18] sm:$0xff]  }
 0x70b   : > { %v2556_v15 = vcombine.low %v2532_v49, %v2548_v9  ;;  %v2557_v35 = vcombine.high %v2532_v49, %v2548_v9  ;;  %v2572_v45 = vcombine.low %v2539_v11, %v2555_v29  ;;  %v2573_v54 = vcombine.high %v2539_v11, %v2555_v29  ;;  %6249 = vmatpush3.bf16.msra.mxu0 %v6438_v44 }
 0x70c   : > { %v2592_v55 = vcombine.low %v2496_v50, %v2503_v51  ;;  %v5829_v56 = vcombine.high %v2496_v50, %v2503_v51  ;;  %v2608_v57 = vcombine.low %v2512_v53, %v2519_v39  ;;  %v5830_v60 = vcombine.high %v2512_v53, %v2519_v39 }
 0x70d   : > { %v2564_v61 = vrot.slane %v2556_v15, %v6941_v46  ;;  %v2571_v52 = vrot.slane %v2557_v35, %v6941_v46  ;;  %v2580_v62 = vrot.slane %v2572_v45, %v6941_v46  ;;  %v2587_v63 = vrot.slane %v2573_v54, %v6941_v46 }
 0x70e   : > { %v2599_v0 = vrot.slane %v2592_v55, %v6938_v38  ;;  %v2607_v1 = vrot.slane %v5829_v56, %v6938_v38  ;;  %v2615_v3 = vrot.slane %v2608_v57, %v6938_v38  ;;  %v2623_v48 = vrot.slane %v5830_v60, %v6938_v38 }
 0x70f   : > { %v2660_v28 = vcombine.low %v2564_v61, %v2571_v52  ;;  %v5831_v58 = vcombine.high %v2564_v61, %v2571_v52  ;;  %v2676_v59 = vcombine.low %v2580_v62, %v2587_v63  ;;  %v5832_v4 = vcombine.high %v2580_v62, %v2587_v63 }
 0x710   : > { %v2625_v5 = vcombine.high %v2599_v0, %v2607_v1  ;;  %v2641_v6 = vcombine.high %v2615_v3, %v2623_v48  ;;  %v2624_v7 = vcombine.low %v2599_v0, %v2607_v1  ;;  %v2640_v8 = vcombine.low %v2615_v3, %v2623_v48  ;;  %v5833_v0 = vld [vmem:[%s7917_s12] ss:$0 sm:$0xff] }
 0x711   : > { %v2667_v13 = vrot.slane %v2660_v28, %v6938_v38  ;;  %v2675_v23 = vrot.slane %v5831_v58, %v6938_v38  ;;  %v2683_v18 = vrot.slane %v2676_v59, %v6938_v38  ;;  %v2691_v20 = vrot.slane %v5832_v4, %v6938_v38 }
 0x712   : > { %v2639_v19 = vrot.slane %v2625_v5, %v6941_v46  ;;  %v2655_v21 = vrot.slane %v2641_v6, %v6941_v46  ;;  %v2632_v12 = vrot.slane %v2624_v7, %v6941_v46  ;;  %v2648_v24 = vrot.slane %v2640_v8, %v6941_v46 }
 0x713   : > { %v2693_v17 = vcombine.high %v2667_v13, %v2675_v23  ;;  %v2709_v30 = vcombine.high %v2683_v18, %v2691_v20  ;;  %v2692_v33 = vcombine.low %v2667_v13, %v2675_v23  ;;  %v2708_v26 = vcombine.low %v2683_v18, %v2691_v20 }
 0x714   : > { %v2658_v27 = vcombine.low %v2639_v19, %v2655_v21  ;;  %v2656_v36 = vcombine.low %v2632_v12, %v2648_v24  ;;  %v2657_v37 = vcombine.high %v2632_v12, %v2648_v24  ;;  %v2659_v31 = vcombine.high %v2639_v19, %v2655_v21  ;;  %v6439_v12 = vld [vmem:[%s7920_s15] ss:$8 sps:$4 sm:$0xff]   ;;  %v6441_v24 = vld [vmem:[%s7920_s15 + $0x4] ss:$8 sps:$4 sm:$0xff]  }
 0x715   : > { %v2707_v32 = vrot.slane %v2693_v17, %v6941_v46  ;;  %v2723_v41 = vrot.slane %v2709_v30, %v6941_v46  ;;  %v2700_v42 = vrot.slane %v2692_v33, %v6941_v46  ;;  %v2716_v43 = vrot.slane %v2708_v26, %v6941_v46  ;;  %v6444_v17 = vld [vmem:[%s7920_s15 + $0x14] ss:$8 sps:$4 sm:$0xff]   ;;  %2954 = vmatprep.subr.bf16.mxu1 %v6441_v24  ;;  %v6442_v30 = vld [vmem:[%s7920_s15 + $0x10] ss:$8 sps:$4 sm:$0xff]   ;;  %v6447_v33 = vld [vmem:[%s7920_s15 + $0x24] ss:$8 sps:$4 sm:$0xff]  }
 0x716   : > { %2955 = vmatpush1.bf16.msra.mxu1 %v6439_v12  ;;  %v6445_v26 = vld [vmem:[%s7920_s15 + $0x20] ss:$8 sps:$4 sm:$0xff]  }
 0x717   : > { %v2726_v14 = vcombine.low %v2707_v32, %v2723_v41  ;;  %v2725_v47 = vcombine.high %v2700_v42, %v2716_v43  ;;  %v2724_v16 = vcombine.low %v2700_v42, %v2716_v43  ;;  %v2727_v9 = vcombine.high %v2707_v32, %v2723_v41  ;;  %2956 = vmatprep.subr.bf16.mxu1 %v6444_v17 }
 0x719   : > { %v6386_v29 = vpack.i.bf16 %v2726_v14, %v2658_v27  ;;  %v6381_v49 = vpack.i.bf16 %v2725_v47, %v2657_v37  ;;  %v6391_v11 = vpack.i.bf16 %v2727_v9, %v2659_v31  ;;  %v6450_v27 = vld [vmem:[%s7920_s15 + $0x34] ss:$8 sps:$4 sm:$0xff]   ;;  %v5839_v47 = vld [vmem:[%s7918_s13] ss:$0 sm:$0xff] }
 0x71a   : > { %2957 = vmatpush1.bf16.msra.mxu1 %v6442_v30 }
 0x71b   : > { %6387 = vrot.lane.b32.xlu1 %v6386_v29, %s7933_s0  ;;  %6382 = vrot.lane.b32.xlu0 %v6381_v49, %s7932_s4  ;;  %v5840_v49 = vld [vmem:[%s7919_s14] ss:$0 sm:$0xff]  ;;  %s7957_s4 = smov 48  }
 0x71c   : > { %2958 = vmatprep.subr.bf16.mxu1 %v6447_v33 }
 0x71e   : > { %2959 = vmatpush1.bf16.msra.mxu1 %v6445_v26 }
 0x71f   : > { %6392 = vrot.lane.b32.xlu1 %v6391_v11, %s7931_s24  ;;  %2960 = vmatprep.subr.bf16.mxu1 %v6450_v27 }
 0x78d   : > { %v6388_v50 = vpop.permute.xlu1 %6387  ;;  %v6383_v51 = vpop.permute.xlu0 %6382 }
 0x78e   : > { %v6385_v53 = vunpack.i.h.bf16 %v6383_v51  ;;  %v6384_v39 = vunpack.i.l.bf16 %v6383_v51  ;;  %v6390_v15 = vunpack.i.h.bf16 %v6388_v50  ;;  %v6389_v35 = vunpack.i.l.bf16 %v6388_v50 }
 0x790   : > { %v2752_v45 = vsel %vm1991_vm2, %v2656_v36, %v6384_v39  ;;  %v2753_v54 = vsel %vm1991_vm2, %v2724_v16, %v6385_v53  ;;  %v6448_v36 = vld [vmem:[%s7920_s15 + $0x30] ss:$8 sps:$4 sm:$0xff]   ;;  %v6451_v39 = vld [vmem:[%s7922_s17 + $0x40] sm:$0xff]  }
 0x791   : > { %v6393_v55 = vpop.permute.xlu1 %6392  ;;  %v2755_v60 = vsel %vm2754_vm3, %v2752_v45, %v6389_v35  ;;  %v2756_v61 = vsel %vm2754_vm3, %v2753_v54, %v6390_v15  ;;  %2961 = vmatpush1.bf16.msra.mxu1 %v6448_v36  ;;  %v6452_v15 = vld [vmem:[%s7922_s17] sm:$0xff]   ;;  %6073 = vmatprep.subr.bf16.mxu0 %v6451_v39  ;;  %v6453_v35 = vld [vmem:[%s7922_s17 + $0x48] sm:$0xff]   ;;  %v6455_v54 = vld [vmem:[%s7922_s17 + $0x50] sm:$0xff]  }
 0x792   : > { %v6395_v56 = vunpack.i.h.bf16 %v6393_v55  ;;  %v6394_v57 = vunpack.i.l.bf16 %v6393_v55  ;;  %6254 = vmatprep.subr.bf16.mxu1 %v6620_v40  ;;  %v6454_v45 = vld [vmem:[%s7922_s17 + $0x8] sm:$0xff]   ;;  %v6456_v55 = vld [vmem:[%s7922_s17 + $0x10] sm:$0xff]  }
 0x794   : > { %v2758_v52 = vsel %vm2757_vm4, %v2755_v60, %v6394_v57  ;;  %v2759_v62 = vsel %vm2757_vm4, %v2756_v61, %v6395_v56  ;;  %v6457_v56 = vld [vmem:[%s7922_s17 + $0x58] sm:$0xff]   ;;  %v6459_v60 = vld [vmem:[%s7922_s17 + $0x60] sm:$0xff]  }
 0x795   : > { %v2760_v63 = vpack.c.bf16 %v2759_v62, %v2758_v52  ;;  %v6458_v57 = vld [vmem:[%s7922_s17 + $0x18] sm:$0xff]   ;;  %v6460_v61 = vld [vmem:[%s7922_s17 + $0x20] sm:$0xff]   ;;  %v6461_v52 = vld [vmem:[%s7922_s17 + $0x68] sm:$0xff]  }
 0x796   : > { %v6462_v62 = vld [vmem:[%s7922_s17 + $0x28] sm:$0xff]  }
 0x797   : > { %6251 = vmatmul.mubr.msk.bf16.vlgmr.msra.gmra.mrb[16].mxu0 %vm769_vm0, %v2760_v63  ;;  %v6463_v63 = vld [vmem:[%s7922_s17 + $0x70] sm:$0xff]  }
 0x798   : > { %6074 = vmatpush3.bf16.msra.mxu0 %v6452_v15 }
 0x799   : > { %6075 = vmatprep.subr.bf16.mxu0 %v6453_v35 }
 0x79c   : > { %6076 = vmatpush3.bf16.msra.mxu0 %v6454_v45 }
 0x79d   : > { %6077 = vmatprep.subr.bf16.mxu0 %v6455_v54 }
 0x7a0   : > { %6078 = vmatpush3.bf16.msra.mxu0 %v6456_v55 }
 0x7a1   : > { %6079 = vmatprep.subr.bf16.mxu0 %v6457_v56 }
 0x7a4   : > { %6080 = vmatpush3.bf16.msra.mxu0 %v6458_v57 }
 0x7a5   : > { %6081 = vmatprep.subr.bf16.mxu0 %v6459_v60 }
 0x7a8   : > { %6082 = vmatpush3.bf16.msra.mxu0 %v6460_v61 }
 0x7a9   : > { %6083 = vmatprep.subr.bf16.mxu0 %v6461_v52 }
 0x7ac   : > { %6084 = vmatpush3.bf16.msra.mxu0 %v6462_v62  ;;  %v5850_v62 = vld [vmem:[%s7923_s18] ss:$0 sm:$0xff] }
 0x7ad   : > { %6085 = vmatprep.subr.bf16.mxu0 %v6463_v63 }
 0x86a   : > { %v2837_v1 = vpop.f32.mrb[16].mxu0 }
 0x86b   : > { %v2838_v3 = vadd.f32 %v5833_v0, %v2837_v1  ;;  %v6252_v48 = vpop.f32.mrb[17].mxu0  ;;  %v6465_v1 = vld [vmem:[%s7922_s17 + $0x78] sm:$0xff]  }
 0x86c   : > { %v2840_v28 = vpop.f32.mrb[18].mxu0  ;;  %v2903_v48 = vsub.s32 0, %v6935_v34 }
 0x86d   : > { %v7247_v58 = vadd.f32 %v2838_v3, %v6815_v22  ;;  %v2841_v59 = vadd.f32 %v5833_v0, %v2840_v28  ;;  %v6253_v4 = vpop.f32.mrb[19].mxu0  ;;  %v6464_v0 = vld [vmem:[%s7922_s17 + $0x30] sm:$0xff]   ;;  %v6466_v3 = vld [vmem:[%s7922_s17 + $0x38] sm:$0xff]   ;;  %v2899_v28 = vld [vmem:[%s7921_s16] sm:$0x3] }
 0x86e   : > { %6086 = vmatpush3.bf16.msra.mxu0 %v6464_v0  ;;  %v2904_v4 = vrot.slane %v2899_v28, %v2903_v48 }
 0x86f   : > { %v7250_v5 = vadd.f32 %v2841_v59, %v6817_v25  ;;  %v2848_v6 = vsel %vm769_vm0, %v7247_v58, 0.0  ;;  %6087 = vmatprep.subr.bf16.mxu0 %v6465_v1  ;;  %v2907_v59 = vsub.s32 1, %v6935_v34 }
 0x870   : > { %2849 = vadd.xlane.f32.xlu1 %v2848_v6 }
 0x871   : > { %v2851_v7 = vsel %vm769_vm0, %v7250_v5, 0.0  ;;  %v2908_v6 = vrot.slane %v2899_v28, %v2907_v59 }
 0x872   : > { %2852 = vadd.xlane.f32.xlu0 %v2851_v7  ;;  %6088 = vmatpush3.bf16.msra.mxu0 %v6466_v3 }
 0x873   : > { %6278 = vmatprep.subr.bf16.mxu0 %v6620_v40 }
 0x8fd   : > { %v2850_v8 = vpop.xlane.xlu1 %2849 }
 0x8fe   : > { %v2854_v10 = vmul.f32 0.015625, %v2850_v8 }
 0x8ff   : > { %v2853_v13 = vpop.xlane.xlu0 %2852 }
 0x900   : > { %v2856_v23 = vsub.f32 %v7247_v58, %v2854_v10  ;;  %v2855_v22 = vmul.f32 0.015625, %v2853_v13 }
 0x902   : > { %v2857_v18 = vsub.f32 %v7250_v5, %v2855_v22  ;;  %v2858_v20 = vmul.f32 %v2856_v23, %v2856_v23 }
 0x904   : > { %v2860_v25 = vsel %vm769_vm0, %v2858_v20, 0.0  ;;  %v2859_v19 = vmul.f32 %v2857_v18, %v2857_v18 }
 0x905   : > { %2861 = vadd.xlane.f32.xlu0 %v2860_v25 }
 0x906   : > { %v2863_v21 = vsel %vm769_vm0, %v2859_v19, 0.0 }
 0x909   : > { %2864 = vadd.xlane.f32.xlu0 %v2863_v21 }
 0x992   : > { %v2862_v37 = vpop.xlane.xlu0 %2861 }
 0x993   : > { %v2866_v31 = vmul.f32 0.015625, %v2862_v37 }
 0x995   : > { %v2868_v32 = vadd.f32 1e-05, %v2866_v31 }
 0x996   : > { %v2865_v41 = vpop.xlane.xlu0 %2864 }
 0x997   : > { %6551 = vrsqrt.f32 %v2868_v32  ;;  %v2867_v42 = vmul.f32 0.015625, %v2865_v41 }
 0x999   : > { %v2869_v43 = vadd.f32 1e-05, %v2867_v42 }
 0x99b   : > { %6553 = vrsqrt.f32 %v2869_v43 }
 0x9a1   : > { %v6552_v44 = vpop.eup %6551 }
 0x9a2   : > { %v2872_v14 = vmul.f32 %v6552_v44, %v2856_v23 }
 0x9a4   : > { %v2880_v9 = vmul.f32 %v5839_v47, %v2872_v14 }
 0x9a5   : > { %v6554_v16 = vpop.eup %6553 }
 0x9a6   : > { %v2873_v29 = vmul.f32 %v6554_v16, %v2857_v18  ;;  %v2888_v50 = vadd.f32 %v5840_v49, %v2880_v9 }
 0x9a8   : > { %v2881_v11 = vmul.f32 %v5839_v47, %v2873_v29 }
 0x9aa   : > { %v2889_v51 = vadd.f32 %v5840_v49, %v2881_v11 }
 0x9ac   : > { %v2890_v53 = vpack.c.bf16 %v2889_v51, %v2888_v50 }
 0x9ae   : > { %5849 = vmatmul.mubr.msk.bf16.vlgmr.msra.gmra.mrb[32].mxu1 %vm769_vm0, %v2890_v53 }
 0x9af   : > { %6262 = vmatprep.mubr.msk.bf16.mxu1 %vm6621_vm1, %v6620_v40 }
 0xa81   : > { %v2988_v7 = vpop.f32.mrb[32].mxu1 }
 0xa82   : > { %v2989_v8 = vadd.f32 %v2988_v7, %v2904_v4  ;;  %v2990_v10 = vpop.f32.mrb[33].mxu1 }
 0xa83   : > { %v2991_v13 = vadd.f32 %v2990_v10, %v2908_v6  ;;  %v2992_v23 = vpop.f32.mrb[34].mxu1 }
 0xa84   : > { %v3001_v22 = vmul.f32 %v2989_v8, %v2989_v8  ;;  %v2993_v18 = vadd.f32 %v2992_v23, %v2904_v4  ;;  %v2994_v20 = vpop.f32.mrb[35].mxu1  ;;  %v2997_v51 = vmul.f32 0.5, %v2989_v8 }
 0xa85   : > { %v3002_v25 = vmul.f32 %v2991_v13, %v2991_v13  ;;  %v2995_v19 = vadd.f32 %v2994_v20, %v2908_v6  ;;  %v2998_v15 = vmul.f32 0.5, %v2991_v13 }
 0xa86   : > { %v3005_v21 = vmul.f32 %v3001_v22, %v2989_v8  ;;  %v3003_v12 = vmul.f32 %v2993_v18, %v2993_v18  ;;  %v2999_v53 = vmul.f32 0.5, %v2993_v18 }
 0xa87   : > { %v3006_v24 = vmul.f32 %v3002_v25, %v2991_v13  ;;  %v3004_v17 = vmul.f32 %v2995_v19, %v2995_v19  ;;  %v3000_v35 = vmul.f32 0.5, %v2995_v19 }
 0xa88   : > { %v3009_v30 = vmul.f32 0.044715, %v3005_v21  ;;  %v3007_v33 = vmul.f32 %v3003_v12, %v2993_v18 }
 0xa89   : > { %v3010_v26 = vmul.f32 0.044715, %v3006_v24  ;;  %v3008_v27 = vmul.f32 %v3004_v17, %v2995_v19  ;;  %v6467_v24 = vld [vmem:[%s7949_s23 + $0x20] sm:$0xff]  }
 0xa8a   : > { %v3013_v36 = vadd.f32 %v3009_v30, %v2989_v8  ;;  %v3011_v37 = vmul.f32 0.044715, %v3007_v33  ;;  %v6468_v17 = vld [vmem:[%s7914_s9 + $0x20] sm:$0xff]   ;;  %6255 = vmatpush3.bf16.msra.mxu1 %v6467_v24  ;;  %v6469_v30 = vld [vmem:[%s7949_s23 + $0x28] sm:$0xff]  }
 0xa8b   : > { %v3014_v31 = vadd.f32 %v3010_v26, %v2991_v13  ;;  %v3012_v32 = vmul.f32 0.044715, %v3008_v27  ;;  %v6470_v33 = vld [vmem:[%s7914_s9 + $0x28] sm:$0xff]   ;;  %6256 = vmatprep.subr.bf16.mxu1 %v6620_v40  ;;  %v6471_v26 = vld [vmem:[%s7949_s23 + $0x30] sm:$0xff]  }
 0xa8c   : > { %v3017_v41 = vmul.f32 0.7978846, %v3013_v36  ;;  %v3015_v42 = vadd.f32 %v3011_v37, %v2993_v18  ;;  %v6472_v27 = vld [vmem:[%s7914_s9 + $0x30] sm:$0xff]   ;;  %v6473_v36 = vld [vmem:[%s7949_s23 + $0x38] sm:$0xff]  }
 0xa8d   : > { %v3018_v43 = vmul.f32 0.7978846, %v3014_v31  ;;  %v3016_v44 = vadd.f32 %v3012_v32, %v2995_v19  ;;  %v6474_v37 = vld [vmem:[%s7914_s9 + $0x38] sm:$0xff]  }
 0xa8e   : > { %6555 = vtanh.f32 %v3017_v41  ;;  %v3019_v14 = vmul.f32 0.7978846, %v3015_v42  ;;  %6257 = vmatpush3.bf16.msra.mxu1 %v6469_v30 }
 0xa8f   : > { %6557 = vtanh.f32 %v3018_v43  ;;  %v3020_v47 = vmul.f32 0.7978846, %v3016_v44  ;;  %6258 = vmatprep.subr.bf16.mxu1 %v6620_v40 }
 0xa90   : > { %6559 = vtanh.f32 %v3019_v14 }
 0xa91   : > { %6561 = vtanh.f32 %v3020_v47  ;;  %v5869_v47 = vld [vmem:[%s7950_s30 + $0x1] ss:$0 sm:$0xff] }
 0xa92   : > { %6259 = vmatpush3.bf16.msra.mxu1 %v6471_v26 }
 0xa93   : > { %6260 = vmatprep.subr.bf16.mxu1 %v6620_v40 }
 0xa96   : > { %6261 = vmatpush3.bf16.msra.mxu1 %v6473_v36 }
 0xa97   : > { %6266 = vmatprep.subr.bf16.mxu1 %v6620_v40 }
 0xa98   : > { %v6556_v16 = vpop.eup %6555 }
 0xa99   : > { %v6558_v9 = vpop.eup %6557  ;;  %v3025_v29 = vadd.f32 1.0, %v6556_v16 }
 0xa9a   : > { %v6560_v49 = vpop.eup %6559  ;;  %v3026_v11 = vadd.f32 1.0, %v6558_v9 }
 0xa9b   : > { %v6562_v50 = vpop.eup %6561  ;;  %v3027_v39 = vadd.f32 1.0, %v6560_v49  ;;  %v3029_v54 = vmul.f32 %v3025_v29, %v2997_v51 }
 0xa9c   : > { %v3028_v45 = vadd.f32 1.0, %v6562_v50  ;;  %v3030_v56 = vmul.f32 %v3026_v11, %v2998_v15  ;;  %v5870_v11 = vld [vmem:[%s7951_s22 + $0x1] ss:$0 sm:$0xff] }
 0xa9d   : > { %v3031_v55 = vmul.f32 %v3027_v39, %v2999_v53  ;;  %v6475_v39 = vld [vmem:[%s7912_s7 + $0x20] sm:$0xff]  }
 0xa9e   : > { %v3032_v57 = vmul.f32 %v3028_v45, %v3000_v35  ;;  %v6476_v35 = vld [vmem:[%s7912_s7 + $0x28] sm:$0xff]   ;;  %v6477_v45 = vld [vmem:[%s7912_s7 + $0x30] sm:$0xff]  }
 0xa9f   : > { %v3033_v60 = vpack.c.bf16 %v3031_v55, %v3029_v54  ;;  %v6478_v54 = vld [vmem:[%s7912_s7 + $0x38] sm:$0xff]   ;;  %v5880_v55 = vld [vmem:[%s7911_s6 + $0x1] ss:$0 sm:$0xff] }
 0xaa0   : > { %v3034_v61 = vpack.c.bf16 %v3032_v57, %v3030_v56 }
 0xaa2   : > { %3202 = vmatprep.mubr.bf16.mxu0 %v3034_v61 }
 0xaa3   : > { %3203 = vmatmul.mubr.bf16.vlgmr.msra.gmra.mrb[20].mxu0 %v3033_v60 }
 0xaa4   : > { %6286 = vmatprep.mubr.msk.bf16.mxu0 %vm6621_vm1, %v6620_v40  ;;  %6279 = vmatpush3.bf16.msra.mxu0 %v6468_v17 }
 0xaa5   : > { %6280 = vmatprep.subr.bf16.mxu0 %v6620_v40 }
 0xaa8   : > { %6281 = vmatpush3.bf16.msra.mxu0 %v6470_v33 }
 0xaa9   : > { %6282 = vmatprep.subr.bf16.mxu0 %v6620_v40 }
 0xaac   : > { %6283 = vmatpush3.bf16.msra.mxu0 %v6472_v27 }
 0xaad   : > { %6284 = vmatprep.subr.bf16.mxu0 %v6620_v40 }
 0xab0   : > { %6285 = vmatpush3.bf16.msra.mxu0 %v6474_v37 }
 0xab1   : > { %6302 = vmatprep.subr.bf16.mxu0 %v6620_v40 }
 0xb76   : > { %v6089_v52 = vpop.f32.mrb[20].mxu0 }
 0xb77   : > { %v6090_v63 = vpop.f32.mrb[21].mxu0 }
 0xb78   : > { %v6091_v0 = vadd.f32 %v6090_v63, %v6089_v52  ;;  %v6092_v1 = vpop.f32.mrb[22].mxu0 }
 0xb79   : > { %v6093_v3 = vpop.f32.mrb[23].mxu0 }
 0xb7a   : > { %v3205_v28 = vadd.f32 %v6091_v0, %v5850_v62  ;;  %v6094_v4 = vadd.f32 %v6093_v3, %v6092_v1 }
 0xb7c   : > { %v7358_v6 = vadd.f32 %v3205_v28, %v7247_v58  ;;  %v3208_v7 = vadd.f32 %v6094_v4, %v5850_v62  ;;  %v5910_v62 = vld [vmem:[%s7915_s10 + $0x1] ss:$0 sm:$0xff] }
 0xb7e   : > { %v7361_v8 = vadd.f32 %v3208_v7, %v7250_v5  ;;  %v3217_v10 = vsel %vm769_vm0, %v7358_v6, 0.0  ;;  %v5895_v7 = vld [vmem:[%s7913_s8 + $0x1] ss:$0 sm:$0xff] }
 0xb7f   : > { %3218 = vadd.xlane.f32.xlu1 %v3217_v10 }
 0xb80   : > { %v3220_v13 = vsel %vm769_vm0, %v7361_v8, 0.0 }
 0xb81   : > { %3221 = vadd.xlane.f32.xlu0 %v3220_v13 }
 0xc0c   : > { %v3219_v23 = vpop.xlane.xlu1 %3218 }
 0xc0d   : > { %v3223_v22 = vmul.f32 0.015625, %v3219_v23 }
 0xc0e   : > { %v3222_v18 = vpop.xlane.xlu0 %3221 }
 0xc0f   : > { %v3225_v20 = vsub.f32 %v7358_v6, %v3223_v22  ;;  %v3224_v25 = vmul.f32 0.015625, %v3222_v18 }
 0xc11   : > { %v3226_v58 = vsub.f32 %v7361_v8, %v3224_v25  ;;  %v3227_v19 = vmul.f32 %v3225_v20, %v3225_v20 }
 0xc13   : > { %v3229_v5 = vsel %vm769_vm0, %v3227_v19, 0.0  ;;  %v3228_v21 = vmul.f32 %v3226_v58, %v3226_v58 }
 0xc14   : > { %3230 = vadd.xlane.f32.xlu1 %v3229_v5 }
 0xc15   : > { %v3232_v12 = vsel %vm769_vm0, %v3228_v21, 0.0 }
 0xc16   : > { %3233 = vadd.xlane.f32.xlu0 %v3232_v12 }
 0xca1   : > { %v3231_v31 = vpop.xlane.xlu1 %3230 }
 0xca2   : > { %v3235_v32 = vmul.f32 0.015625, %v3231_v31 }
 0xca3   : > { %v3234_v41 = vpop.xlane.xlu0 %3233 }
 0xca4   : > { %v3237_v42 = vadd.f32 1e-05, %v3235_v32  ;;  %v3236_v43 = vmul.f32 0.015625, %v3234_v41 }
 0xca6   : > { %6563 = vrsqrt.f32 %v3237_v42  ;;  %v3238_v44 = vadd.f32 1e-05, %v3236_v43 }
 0xca8   : > { %6565 = vrsqrt.f32 %v3238_v44 }
 0xcb0   : > { %v6564_v14 = vpop.eup %6563 }
 0xcb1   : > { %v3241_v16 = vmul.f32 %v6564_v14, %v3225_v20 }
 0xcb2   : > { %v6566_v9 = vpop.eup %6565 }
 0xcb3   : > { %v3249_v29 = vmul.f32 %v5869_v47, %v3241_v16  ;;  %v3242_v49 = vmul.f32 %v6566_v9, %v3226_v58 }
 0xcb5   : > { %v3250_v50 = vmul.f32 %v5869_v47, %v3242_v49  ;;  %v3257_v51 = vadd.f32 %v5870_v11, %v3249_v29 }
 0xcb7   : > { %v3258_v53 = vadd.f32 %v5870_v11, %v3250_v50 }
 0xcb9   : > { %v3259_v15 = vpack.c.bf16 %v3258_v53, %v3257_v51 }
 0xcbb   : > { %6263 = vmatmul.mubr.msk.bf16.vlgmr.msra.gmra.mrb[36].mxu1 %vm769_vm0, %v3259_v15  ;;  %6287 = vmatmul.mubr.msk.bf16.vlgmr.msra.gmra.mrb[24].mxu0 %vm769_vm0, %v3259_v15 }
 0xcbc   : > { %6267 = vmatpush3.bf16.msra.mxu1 %v6475_v39  ;;  %6274 = vmatprep.mubr.msk.bf16.mxu1 %vm6621_vm1, %v6620_v40 }
 0xcbd   : > { %6268 = vmatprep.subr.bf16.mxu1 %v6620_v40  ;;  %6304 = vmatprep.mubr.msk.bf16.mxu0 %vm6621_vm1, %v6620_v40 }
 0xcc0   : > { %6269 = vmatpush3.bf16.msra.mxu1 %v6476_v35 }
 0xcc1   : > { %6270 = vmatprep.subr.bf16.mxu1 %v6620_v40 }
 0xcc4   : > { %6271 = vmatpush3.bf16.msra.mxu1 %v6477_v45 }
 0xcc5   : > { %6272 = vmatprep.subr.bf16.mxu1 %v6620_v40 }
 0xcc8   : > { %6273 = vmatpush3.bf16.msra.mxu1 %v6478_v54 }
 0xcc9   : > { %6290 = vmatprep.subr.bf16.mxu1 %v6620_v40 }
 0xccb   : > { %6275 = vmatmul.mubr.msk.bf16.vlgmr.msra.gmra.mrb[40].mxu1 %vm769_vm0, %v3259_v15 }
 0xccc   : > { %6292 = vmatprep.mubr.msk.bf16.mxu1 %vm6621_vm1, %v6620_v40 }
 0xd8e   : > { %v3338_v56 = vpop.f32.mrb[36].mxu1  ;;  %v3502_v57 = vpop.f32.mrb[24].mxu0 }
 0xd8f   : > { %v7437_v60 = vadd.f32 %v5880_v55, %v3338_v56  ;;  %v6264_v61 = vpop.f32.mrb[37].mxu1  ;;  %v6288_v52 = vpop.f32.mrb[25].mxu0  ;;  %v7467_v25 = vadd.f32 %v5910_v62, %v3502_v57 }
 0xd90   : > { %v3341_v63 = vpop.f32.mrb[38].mxu1  ;;  %v3505_v0 = vpop.f32.mrb[26].mxu0 }
 0xd91   : > { %v7442_v1 = vadd.f32 %v5880_v55, %v3341_v63  ;;  %v7444_v3 = vadd.f32 %v5910_v62, %v3505_v0  ;;  %v6289_v28 = vpop.f32.mrb[27].mxu0  ;;  %3511 = vrot.lane.b32.xlu1 %v7437_v60, %s7952_s25  ;;  %v6265_v4 = vpop.f32.mrb[39].mxu1 }
 0xd93   : > { %3513 = vrot.lane.b32.xlu0 %v7442_v1, %s7952_s25 }
 0xd9e   : > { %v3420_v10 = vpop.f32.mrb[40].mxu1 }
 0xd9f   : > { %v3421_v13 = vadd.f32 %v5895_v7, %v3420_v10  ;;  %v6276_v23 = vpop.f32.mrb[41].mxu1 }
 0xda0   : > { %v3423_v22 = vpop.f32.mrb[42].mxu1 }
 0xda1   : > { %v3424_v18 = vadd.f32 %v5895_v7, %v3423_v22  ;;  %3807 = vrot.lane.b32.xlu1 %v3421_v13, %s7952_s25  ;;  %v6277_v20 = vpop.f32.mrb[43].mxu1 }
 0xda3   : > { %3809 = vrot.lane.b32.xlu0 %v3424_v18, %s7952_s25 }
 0xda5   : > { %3813 = vrot.lane.b32.xlu1 %v3421_v13, %s7953_s20 }
 0xda7   : > { %3821 = vrot.lane.b32.xlu0 %v3424_v18, %s7954_s1 }
 0xda9   : > { %3819 = vrot.lane.b32.xlu1 %v3421_v13, %s7954_s1 }
 0xdab   : > { %3519 = vrot.lane.b32.xlu0 %v7442_v1, %s7953_s20 }
 0xdad   : > { %3815 = vrot.lane.b32.xlu1 %v3424_v18, %s7953_s20 }
 0xdaf   : > { %3525 = vrot.lane.b32.xlu0 %v7442_v1, %s7954_s1 }
 0xdb1   : > { %3517 = vrot.lane.b32.xlu1 %v7437_v60, %s7953_s20 }
 0xdb5   : > { %3523 = vrot.lane.b32.xlu1 %v7437_v60, %s7954_s1 }
 0xdb9   : > { %4103 = vrot.lane.b32.xlu1 %v7467_v25, %s7952_s25 }
 0xe03   : > { %v7471_v58 = vpop.permute.xlu1 %3511 }
 0xe05   : > { %v3514_v19 = vpop.permute.xlu0 %3513 }
 0xe13   : > { %v3808_v5 = vpop.permute.xlu1 %3807 }
 0xe15   : > { %v3810_v21 = vpop.permute.xlu0 %3809 }
 0xe17   : > { %v3814_v12 = vpop.permute.xlu1 %3813 }
 0xe18   : > { %v3825_v17 = vcombine.low %v3421_v13, %v3814_v12  ;;  %v3826_v30 = vcombine.high %v3421_v13, %v3814_v12 }
 0xe19   : > { %v3822_v24 = vpop.permute.xlu0 %3821 }
 0xe1a   : > { %v3909_v33 = vcombine.low %v3810_v21, %v3822_v24  ;;  %v3910_v26 = vcombine.high %v3810_v21, %v3822_v24  ;;  %v3833_v32 = vrot.slane %v3825_v17, %v6938_v38  ;;  %v3840_v41 = vrot.slane %v3826_v30, %v6938_v38 }
 0xe1b   : > { %v3820_v27 = vpop.permute.xlu1 %3819 }
 0xe1c   : > { %v3841_v36 = vcombine.low %v3808_v5, %v3820_v27  ;;  %v3842_v37 = vcombine.high %v3808_v5, %v3820_v27  ;;  %v3917_v44 = vrot.slane %v3909_v33, %v6938_v38  ;;  %v3924_v14 = vrot.slane %v3910_v26, %v6938_v38 }
 0xe1d   : > { %v3520_v31 = vpop.permute.xlu0 %3519 }
 0xe1e   : > { %v3849_v42 = vrot.slane %v3841_v36, %v6938_v38  ;;  %v3856_v43 = vrot.slane %v3842_v37, %v6938_v38  ;;  %v3597_v11 = vcombine.low %v7442_v1, %v3520_v31  ;;  %v3598_v50 = vcombine.high %v7442_v1, %v3520_v31 }
 0xe1f   : > { %v3816_v47 = vpop.permute.xlu1 %3815 }
 0xe20   : > { %v3857_v16 = vcombine.low %v3833_v32, %v3849_v42  ;;  %v3858_v9 = vcombine.high %v3833_v32, %v3849_v42  ;;  %v3873_v29 = vcombine.low %v3840_v41, %v3856_v43  ;;  %v3874_v49 = vcombine.high %v3840_v41, %v3856_v43 }
 0xe21   : > { %v3893_v51 = vcombine.low %v3424_v18, %v3816_v47  ;;  %v3894_v53 = vcombine.high %v3424_v18, %v3816_v47  ;;  %v3526_v39 = vpop.permute.xlu0 %3525  ;;  %v3605_v13 = vrot.slane %v3597_v11, %v6938_v38  ;;  %v3612_v23 = vrot.slane %v3598_v50, %v6938_v38 }
 0xe22   : > { %v3865_v15 = vrot.slane %v3857_v16, %v6941_v46  ;;  %v3872_v35 = vrot.slane %v3858_v9, %v6941_v46  ;;  %v3881_v45 = vrot.slane %v3873_v29, %v6941_v46  ;;  %v3888_v54 = vrot.slane %v3874_v49, %v6941_v46 }
 0xe23   : > { %v3901_v55 = vrot.slane %v3893_v51, %v6938_v38  ;;  %v3908_v56 = vrot.slane %v3894_v53, %v6938_v38  ;;  %v3613_v57 = vcombine.low %v3514_v19, %v3526_v39  ;;  %v3614_v61 = vcombine.high %v3514_v19, %v3526_v39  ;;  %v3518_v1 = vpop.permute.xlu1 %3517 }
 0xe24   : > { %v3961_v52 = vcombine.low %v3865_v15, %v3872_v35  ;;  %v5920_v62 = vcombine.high %v3865_v15, %v3872_v35  ;;  %v3977_v63 = vcombine.low %v3881_v45, %v3888_v54  ;;  %v5921_v0 = vcombine.high %v3881_v45, %v3888_v54 }
 0xe25   : > { %v3925_v28 = vcombine.low %v3901_v55, %v3917_v44  ;;  %v3926_v4 = vcombine.high %v3901_v55, %v3917_v44  ;;  %v3941_v7 = vcombine.low %v3908_v56, %v3924_v14  ;;  %v3942_v10 = vcombine.high %v3908_v56, %v3924_v14 }
 0xe26   : > { %v7494_v5 = vrot.slane %v3961_v52, %v6938_v38  ;;  %v7497_v21 = vrot.slane %v5920_v62, %v6938_v38  ;;  %v3621_v12 = vrot.slane %v3613_v57, %v6938_v38  ;;  %v3628_v24 = vrot.slane %v3614_v61, %v6938_v38 }
 0xe27   : > { %v3933_v22 = vrot.slane %v3925_v28, %v6941_v46  ;;  %v3940_v18 = vrot.slane %v3926_v4, %v6941_v46  ;;  %v3949_v20 = vrot.slane %v3941_v7, %v6941_v46  ;;  %v3956_v19 = vrot.slane %v3942_v10, %v6941_v46  ;;  %v3524_v32 = vpop.permute.xlu1 %3523 }
 0xe28   : > { %v7502_v17 = vrot.slane %v3977_v63, %v6938_v38  ;;  %v7505_v30 = vrot.slane %v5921_v0, %v6938_v38  ;;  %v3629_v27 = vcombine.low %v3605_v13, %v3621_v12  ;;  %v3630_v36 = vcombine.high %v3605_v13, %v3621_v12 }
 0xe29   : > { %v4029_v33 = vcombine.low %v3933_v22, %v3940_v18  ;;  %v5922_v26 = vcombine.high %v3933_v22, %v3940_v18  ;;  %v3645_v37 = vcombine.low %v3612_v23, %v3628_v24  ;;  %v3646_v31 = vcombine.high %v3612_v23, %v3628_v24 }
 0xe2a   : > { %v4045_v41 = vcombine.low %v3949_v20, %v3956_v19  ;;  %v5923_v42 = vcombine.high %v3949_v20, %v3956_v19  ;;  %v3529_v43 = vcombine.low %v7437_v60, %v3518_v1  ;;  %v3530_v44 = vcombine.high %v7437_v60, %v3518_v1 }
 0xe2b   : > { %v3637_v14 = vrot.slane %v3629_v27, %v6941_v46  ;;  %v3644_v47 = vrot.slane %v3630_v36, %v6941_v46  ;;  %v3653_v16 = vrot.slane %v3645_v37, %v6941_v46  ;;  %v3660_v9 = vrot.slane %v3646_v31, %v6941_v46 }
 0xe2c   : > { %v4036_v29 = vrot.slane %v4029_v33, %v6938_v38  ;;  %v4044_v49 = vrot.slane %v5922_v26, %v6938_v38  ;;  %v3545_v11 = vcombine.low %v7471_v58, %v3524_v32  ;;  %v3546_v50 = vcombine.high %v7471_v58, %v3524_v32 }
 0xe2d   : > { %v3733_v51 = vcombine.low %v3637_v14, %v3644_v47  ;;  %v5918_v53 = vcombine.high %v3637_v14, %v3644_v47  ;;  %v3749_v39 = vcombine.low %v3653_v16, %v3660_v9  ;;  %v5919_v60 = vcombine.high %v3653_v16, %v3660_v9 }
 0xe2e   : > { %v3537_v15 = vrot.slane %v3529_v43, %v6938_v38  ;;  %v3544_v35 = vrot.slane %v3530_v44, %v6938_v38  ;;  %v3553_v45 = vrot.slane %v3545_v11, %v6938_v38  ;;  %v3560_v54 = vrot.slane %v3546_v50, %v6938_v38 }
 0xe2f   : > { %v7522_v55 = vrot.slane %v3733_v51, %v6938_v38  ;;  %v7525_v56 = vrot.slane %v5918_v53, %v6938_v38  ;;  %v7528_v58 = vrot.slane %v3749_v39, %v6938_v38  ;;  %v7531_v57 = vrot.slane %v5919_v60, %v6938_v38 }
 0xe30   : > { %v3561_v61 = vcombine.low %v3537_v15, %v3553_v45  ;;  %v3562_v52 = vcombine.high %v3537_v15, %v3553_v45  ;;  %v3577_v62 = vcombine.low %v3544_v35, %v3560_v54  ;;  %v3578_v63 = vcombine.high %v3544_v35, %v3560_v54 }
 0xe31   : > { %v4052_v0 = vrot.slane %v4045_v41, %v6938_v38  ;;  %v4060_v1 = vrot.slane %v5923_v42, %v6938_v38  ;;  %v3993_v28 = vcombine.low %v7494_v5, %v7497_v21  ;;  %v4009_v4 = vcombine.low %v7502_v17, %v7505_v30 }
 0xe32   : > { %v3569_v7 = vrot.slane %v3561_v61, %v6941_v46  ;;  %v3576_v10 = vrot.slane %v3562_v52, %v6941_v46  ;;  %v3585_v13 = vrot.slane %v3577_v62, %v6941_v46  ;;  %v3592_v23 = vrot.slane %v3578_v63, %v6941_v46 }
 0xe33   : > { %v3765_v22 = vcombine.low %v7522_v55, %v7525_v56  ;;  %v3781_v18 = vcombine.low %v7528_v58, %v7531_v57  ;;  %v4001_v33 = vrot.slane %v3993_v28, %v6941_v46  ;;  %v4017_v26 = vrot.slane %v4009_v4, %v6941_v46 }
 0xe34   : > { %v3665_v20 = vcombine.low %v3569_v7, %v3576_v10  ;;  %v5916_v19 = vcombine.high %v3569_v7, %v3576_v10  ;;  %v3681_v12 = vcombine.low %v3585_v13, %v3592_v23  ;;  %v5917_v24 = vcombine.high %v3585_v13, %v3592_v23 }
 0xe35   : > { %v4061_v27 = vcombine.low %v4036_v29, %v4044_v49  ;;  %v4077_v36 = vcombine.low %v4052_v0, %v4060_v1  ;;  %v3773_v42 = vrot.slane %v3765_v22, %v6941_v46  ;;  %v3994_v14 = vcombine.high %v7494_v5, %v7497_v21 }
 0xe36   : > { %v3672_v37 = vrot.slane %v3665_v20, %v6938_v38  ;;  %v3680_v31 = vrot.slane %v5916_v19, %v6938_v38  ;;  %v3688_v32 = vrot.slane %v3681_v12, %v6938_v38  ;;  %v3696_v41 = vrot.slane %v5917_v24, %v6938_v38 }
 0xe37   : > { %v4069_v43 = vrot.slane %v4061_v27, %v6941_v46  ;;  %v4085_v44 = vrot.slane %v4077_v36, %v6941_v46  ;;  %v3789_v47 = vrot.slane %v3781_v18, %v6941_v46  ;;  %v4025_v11 = vcombine.low %v4001_v33, %v4017_v26 }
 0xe38   : > { %v3697_v16 = vcombine.low %v3672_v37, %v3680_v31  ;;  %v3713_v9 = vcombine.low %v3688_v32, %v3696_v41  ;;  %v3698_v50 = vcombine.high %v3672_v37, %v3680_v31  ;;  %v4010_v53 = vcombine.high %v7502_v17, %v7505_v30 }
 0xe39   : > { %v4093_v51 = vcombine.low %v4069_v43, %v4085_v44  ;;  %v4062_v39 = vcombine.high %v4036_v29, %v4044_v49  ;;  %v3714_v15 = vcombine.high %v3688_v32, %v3696_v41  ;;  %v4008_v45 = vrot.slane %v3994_v14, %v6941_v46 }
 0xe3a   : > { %v3705_v60 = vrot.slane %v3697_v16, %v6941_v46  ;;  %v3721_v35 = vrot.slane %v3713_v9, %v6941_v46  ;;  %v4024_v5 = vrot.slane %v4010_v53, %v6941_v46  ;;  %v4078_v61 = vcombine.high %v4052_v0, %v4060_v1 }
 0xe3b   : > { %v4097_v54 = vpack.c.bf16 %v4093_v51, %v4025_v11  ;;  %v4076_v21 = vrot.slane %v4062_v39, %v6941_v46  ;;  %v3766_v52 = vcombine.high %v7522_v55, %v7525_v56  ;;  %v3782_v17 = vcombine.high %v7528_v58, %v7531_v57 }
 0xe3c   : > { %v4092_v29 = vrot.slane %v4078_v61, %v6941_v46  ;;  %v3729_v49 = vcombine.low %v3705_v60, %v3721_v35  ;;  %v3712_v62 = vrot.slane %v3698_v50, %v6941_v46  ;;  %v3728_v63 = vrot.slane %v3714_v15, %v6941_v46 }
 0xe3d   : > { %v4401_v30 = vsel %vm1991_vm2, %v4097_v54, 0  ;;  %v4094_v28 = vcombine.high %v4069_v43, %v4085_v44  ;;  %v4027_v4 = vcombine.low %v4008_v45, %v4024_v5  ;;  %v3797_v0 = vcombine.low %v3773_v42, %v3789_v47 }
 0xe3e   : > { %6291 = vmatpush3.bf16.xpose.msra.mxu1 %v4401_v30  ;;  %v4095_v7 = vcombine.low %v4076_v21, %v4092_v29  ;;  %v4026_v55 = vcombine.high %v4001_v33, %v4017_v26  ;;  %v3780_v56 = vrot.slane %v3766_v52, %v6941_v46  ;;  %v3796_v58 = vrot.slane %v3782_v17, %v6941_v46 }
 0xe3f   : > { %6296 = vmatprep.subr.bf16.mxu1 %v6620_v40  ;;  %v3801_v1 = vpack.c.bf16 %v3797_v0, %v3729_v49  ;;  %v3731_v23 = vcombine.low %v3712_v62, %v3728_v63  ;;  %v4096_v20 = vcombine.high %v4076_v21, %v4092_v29  ;;  %v3730_v12 = vcombine.high %v3705_v60, %v3721_v35 }
 0xe40   : > { %v4099_v57 = vpack.c.bf16 %v4095_v7, %v4027_v4  ;;  %v4098_v10 = vpack.c.bf16 %v4094_v28, %v4026_v55  ;;  %v3799_v22 = vcombine.low %v3780_v56, %v3796_v58  ;;  %v4028_v24 = vcombine.high %v4008_v45, %v4024_v5  ;;  %v7612_v55 = vpop.permute.xlu1 %4103 }
 0xe41   : > { %v3798_v33 = vcombine.high %v3773_v42, %v3789_v47  ;;  %v3732_v37 = vcombine.high %v3712_v62, %v3728_v63  ;;  %v3800_v31 = vcombine.high %v3780_v56, %v3796_v58 }
 0xe42   : > { %v4495_v13 = vsel %vm1991_vm2, %v4099_v57, 0  ;;  %v4448_v18 = vsel %vm1991_vm2, %v4098_v10, 0  ;;  %v3803_v19 = vpack.c.bf16 %v3799_v22, %v3731_v23  ;;  %v4100_v26 = vpack.c.bf16 %v4096_v20, %v4028_v24 }
 0xe43   : > { %6303 = vmatpush3.bf16.xpose.msra.mxu0 %v4495_v13  ;;  %v3802_v27 = vpack.c.bf16 %v3798_v33, %v3730_v12  ;;  %v3804_v32 = vpack.c.bf16 %v3800_v31, %v3732_v37 }
 0xe44   : > { %6314 = vmatprep.subr.bf16.mxu0 %v6620_v40  ;;  %v4542_v36 = vsel %vm1991_vm2, %v4100_v26, 0 }
 0xe45   : > { %6293 = vmatmul.mubr.msk.bf16.vlgmr.msra.gmra.mrb[44].mxu1 %vm1991_vm2, %v3801_v1 }
 0xe46   : > { %6297 = vmatpush3.bf16.xpose.msra.mxu1 %v4448_v18  ;;  %6298 = vmatprep.mubr.msk.bf16.mxu1 %vm6621_vm1, %v6620_v40 }
 0xe47   : > { %6308 = vmatprep.subr.bf16.mxu1 %v6620_v40 }
 0xe4a   : > { %6305 = vmatmul.mubr.msk.bf16.vlgmr.msra.gmra.mrb[28].mxu0 %vm1991_vm2, %v3803_v19 }
 0xe4b   : > { %6316 = vmatprep.mubr.msk.bf16.mxu0 %vm6621_vm1, %v6620_v40 }
 0xe4d   : > { %6299 = vmatmul.mubr.msk.bf16.vlgmr.msra.gmra.mrb[48].mxu1 %vm1991_vm2, %v3802_v27 }
 0xe4e   : > { %6309 = vmatpush3.bf16.xpose.msra.mxu1 %v4542_v36  ;;  %6310 = vmatprep.mubr.msk.bf16.mxu1 %vm6621_vm1, %v6620_v40 }
 0xe4f   : > { %6320 = vmatprep.subr.bf16.mxu1 %v6620_v40 }
 0xe55   : > { %6311 = vmatmul.mubr.msk.bf16.vlgmr.msra.gmra.mrb[52].mxu1 %vm1991_vm2, %v3804_v32 }
 0xe56   : > { %6322 = vmatprep.mubr.msk.bf16.mxu1 %vm6621_vm1, %v6620_v40 }
 0xf18   : > { %v4437_v41 = vpop.f32.mrb[44].mxu1 }
 0xf19   : > { %v4585_v42 = vmul.f32 0.25, %v4437_v41  ;;  %v6294_v43 = vpop.f32.mrb[45].mxu1 }
 0xf1a   : > { %v4440_v44 = vpop.f32.mrb[46].mxu1 }
 0xf1b   : > { %v4586_v14 = vmul.f32 0.25, %v4440_v44  ;;  %v6295_v47 = vpop.f32.mrb[47].mxu1  ;;  %v4593_v16 = vsel %vm1991_vm2, %v4585_v42, -inf }
 0xf1c   : > { %4594 = vmax.xlane.f32.xlu1 %v4593_v16 }
 0xf1d   : > { %v4596_v9 = vsel %vm1991_vm2, %v4586_v14, -inf  ;;  %v4531_v11 = vpop.f32.mrb[28].mxu0 }
 0xf1e   : > { %4597 = vmax.xlane.f32.xlu0 %v4596_v9  ;;  %v7597_v50 = vmul.f32 0.25, %v4531_v11  ;;  %v6306_v51 = vpop.f32.mrb[29].mxu0 }
 0xf1f   : > { %v4534_v53 = vpop.f32.mrb[30].mxu0 }
 0xf20   : > { %v4484_v39 = vpop.f32.mrb[48].mxu1  ;;  %v4590_v60 = vmul.f32 0.25, %v4534_v53  ;;  %v6307_v15 = vpop.f32.mrb[31].mxu0  ;;  %v4605_v35 = vsel %vm1991_vm2, %v7597_v50, -inf }
 0xf21   : > { %v6300_v45 = vpop.f32.mrb[49].mxu1  ;;  %4606 = vmax.xlane.f32.xlu1 %v4605_v35  ;;  %v4587_v5 = vmul.f32 0.25, %v4484_v39 }
 0xf22   : > { %v4487_v54 = vpop.f32.mrb[50].mxu1  ;;  %v4608_v21 = vsel %vm1991_vm2, %v4590_v60, -inf }
 0xf23   : > { %v6301_v61 = vpop.f32.mrb[51].mxu1  ;;  %4609 = vmax.xlane.f32.xlu0 %v4608_v21  ;;  %v4588_v52 = vmul.f32 0.25, %v4487_v54  ;;  %v4599_v17 = vsel %vm1991_vm2, %v4587_v5, -inf }
 0xf25   : > { %v4602_v63 = vsel %vm1991_vm2, %v4588_v52, -inf }
 0xf27   : > { %4600 = vmax.xlane.f32.xlu0 %v4599_v17 }
 0xf28   : > { %v4578_v30 = vpop.f32.mrb[52].mxu1 }
 0xf29   : > { %v4591_v29 = vmul.f32 0.25, %v4578_v30  ;;  %v6312_v49 = vpop.f32.mrb[53].mxu1 }
 0xf2a   : > { %v4581_v62 = vpop.f32.mrb[54].mxu1 }
 0xf2b   : > { %v4592_v28 = vmul.f32 0.25, %v4581_v62  ;;  %v6313_v4 = vpop.f32.mrb[55].mxu1  ;;  %v4611_v7 = vsel %vm1991_vm2, %v4591_v29, -inf  ;;  %4603 = vmax.xlane.f32.xlu0 %v4602_v63 }
 0xf2c   : > { %4612 = vmax.xlane.f32.xlu1 %v4611_v7 }
 0xf2d   : > { %v4614_v0 = vsel %vm1991_vm2, %v4592_v28, -inf }
 0xf2f   : > { %4615 = vmax.xlane.f32.xlu0 %v4614_v0 }
 0xf3d   : > { %4109 = vrot.lane.b32.xlu1 %v7467_v25, %s7953_s20 }
 0xf41   : > { %4111 = vrot.lane.b32.xlu1 %v7444_v3, %s7953_s20  ;;  %s7955_s20 = smov 32  }
 0xf45   : > { %4105 = vrot.lane.b32.xlu0 %v7444_v3, %s7952_s25 }
 0xfa9   : > { %v4595_v56 = vpop.xlane.xlu1 %4594 }
 0xfaa   : > { %v4617_v58 = vsub.f32 %v4585_v42, %v4595_v56 }
 0xfab   : > { %v4598_v57 = vpop.xlane.xlu0 %4597 }
 0xfac   : > { %v4625_v1 = vmul.f32 1.442695, %v4617_v58  ;;  %v4618_v10 = vsub.f32 %v4586_v14, %v4598_v57 }
 0xfae   : > { %6567 = vpow2.f32 %v4625_v1  ;;  %v4627_v13 = vmul.f32 1.442695, %v4618_v10  ;;  %v4607_v37 = vpop.xlane.xlu1 %4606 }
 0xfaf   : > { %v4621_v47 = vsub.f32 %v7597_v50, %v4607_v37 }
 0xfb0   : > { %6569 = vpow2.f32 %v4627_v13  ;;  %v4610_v23 = vpop.xlane.xlu0 %4609 }
 0xfb1   : > { %v4622_v36 = vsub.f32 %v4590_v60, %v4610_v23  ;;  %v4633_v11 = vmul.f32 1.442695, %v4621_v47 }
 0xfb3   : > { %v4635_v32 = vmul.f32 1.442695, %v4622_v36 }
 0xfb4   : > { %v4601_v22 = vpop.xlane.xlu0 %4600 }
 0xfb5   : > { %v4619_v18 = vsub.f32 %v4587_v5, %v4601_v22 }
 0xfb7   : > { %v4629_v19 = vmul.f32 1.442695, %v4619_v18 }
 0xfb8   : > { %v7614_v20 = vpop.eup %6567  ;;  %v4604_v31 = vpop.xlane.xlu0 %4603 }
 0xfb9   : > { %v4641_v12 = vsel %vm1991_vm2, %v7614_v20, 0.0  ;;  %6571 = vpow2.f32 %v4629_v19  ;;  %v4620_v41 = vsub.f32 %v4588_v52, %v4604_v31  ;;  %v4613_v42 = vpop.xlane.xlu1 %4612 }
 0xfba   : > { %v7618_v24 = vpop.eup %6569  ;;  %4642 = vadd.xlane.f32.xlu1 %v4641_v12  ;;  %6573 = vpow2.f32 %v4635_v32  ;;  %v4623_v44 = vsub.f32 %v4591_v29, %v4613_v42 }
 0xfbb   : > { %v4644_v33 = vsel %vm1991_vm2, %v7618_v24, 0.0  ;;  %v4631_v43 = vmul.f32 1.442695, %v4620_v41 }
 0xfbc   : > { %4645 = vadd.xlane.f32.xlu0 %v4644_v33  ;;  %v4616_v14 = vpop.xlane.xlu0 %4615  ;;  %v4637_v16 = vmul.f32 1.442695, %v4623_v44 }
 0xfbd   : > { %6575 = vpow2.f32 %v4631_v43  ;;  %v4624_v9 = vsub.f32 %v4592_v28, %v4616_v14  ;;  %v4110_v61 = vpop.permute.xlu1 %4109 }
 0xfbe   : > { %6577 = vpow2.f32 %v4637_v16  ;;  %v4121_v12 = vcombine.low %v7467_v25, %v4110_v61  ;;  %v4122_v33 = vcombine.high %v7467_v25, %v4110_v61 }
 0xfbf   : > { %v4639_v51 = vmul.f32 1.442695, %v4624_v9  ;;  %6579 = vpow2.f32 %v4633_v11 }
 0xfc0   : > { %v4106_v52 = vpop.permute.xlu0 %4105  ;;  %v4129_v43 = vrot.slane %v4121_v12, %v6938_v38  ;;  %v4136_v44 = vrot.slane %v4122_v33, %v6938_v38 }
 0xfc1   : > { %6581 = vpow2.f32 %v4639_v51  ;;  %v4112_v17 = vpop.permute.xlu1 %4111 }
 0xfc2   : > { %v4189_v29 = vcombine.low %v7444_v3, %v4112_v17  ;;  %v4190_v49 = vcombine.high %v7444_v3, %v4112_v17 }
 0xfc3   : > { %v7622_v26 = vpop.eup %6571 }
 0xfc4   : > { %v4647_v27 = vsel %vm1991_vm2, %v7622_v26, 0.0  ;;  %v7631_v53 = vpop.eup %6573  ;;  %v4197_v7 = vrot.slane %v4189_v29, %v6938_v38  ;;  %v4204_v0 = vrot.slane %v4190_v49, %v6938_v38 }
 0xfc5   : > { %4648 = vadd.xlane.f32.xlu1 %v4647_v27  ;;  %v4656_v39 = vsel %vm1991_vm2, %v7631_v53, 0.0 }
 0xfc7   : > { %v7635_v60 = vpop.eup %6575 }
 0xfc8   : > { %v4650_v15 = vsel %vm1991_vm2, %v7635_v60, 0.0  ;;  %v7639_v50 = vpop.eup %6577 }
 0xfc9   : > { %v7641_v35 = vpop.eup %6579  ;;  %v4659_v45 = vsel %vm1991_vm2, %v7639_v50, 0.0 }
 0xfca   : > { %v4653_v5 = vsel %vm1991_vm2, %v7641_v35, 0.0 }
 0xfcb   : > { %v7645_v54 = vpop.eup %6581 }
 0xfcc   : > { %v4662_v21 = vsel %vm1991_vm2, %v7645_v54, 0.0 }
 0xfd2   : > { %4117 = vrot.lane.b32.xlu0 %v7444_v3, %s7954_s1 }
 0xfd6   : > { %4115 = vrot.lane.b32.xlu1 %v7467_v25, %s7954_s1  ;;  %s7956_s1 = smov 16  }
 0xff1   : > { %4657 = vadd.xlane.f32.xlu0 %v4656_v39 }
 0xff5   : > { %4651 = vadd.xlane.f32.xlu0 %v4650_v15 }
 0xff9   : > { %4660 = vadd.xlane.f32.xlu0 %v4659_v45 }
 0xffa   : > { %4654 = vadd.xlane.f32.xlu1 %v4653_v5 }
 0xffd   : > { %4663 = vadd.xlane.f32.xlu0 %v4662_v21 }
0x1047   : > { %v4643_v4 = vpop.xlane.xlu1 %4642 }
0x1049   : > { %v4646_v30 = vpop.xlane.xlu0 %4645 }
0x104a   : > { %6583 = vrcp.f32 %v4646_v30 }
0x104b   : > { %6585 = vrcp.f32 %v4643_v4 }
0x104d   : > { %v4118_v62 = vpop.permute.xlu0 %4117 }
0x104e   : > { %v4205_v63 = vcombine.low %v4106_v52, %v4118_v62  ;;  %v4206_v28 = vcombine.high %v4106_v52, %v4118_v62 }
0x1050   : > { %v4213_v56 = vrot.slane %v4205_v63, %v6938_v38  ;;  %v4220_v58 = vrot.slane %v4206_v28, %v6938_v38 }
0x1052   : > { %v4221_v57 = vcombine.low %v4197_v7, %v4213_v56  ;;  %v4222_v1 = vcombine.high %v4197_v7, %v4213_v56  ;;  %v4237_v10 = vcombine.low %v4204_v0, %v4220_v58  ;;  %v4238_v13 = vcombine.high %v4204_v0, %v4220_v58  ;;  %v7657_v23 = vpop.xlane.xlu1 %4648 }
0x1053   : > { %6587 = vrcp.f32 %v7657_v23 }
0x1054   : > { %v4229_v3 = vrot.slane %v4221_v57, %v6941_v46  ;;  %v4236_v22 = vrot.slane %v4222_v1, %v6941_v46  ;;  %v4245_v18 = vrot.slane %v4237_v10, %v6941_v46  ;;  %v4252_v19 = vrot.slane %v4238_v13, %v6941_v46  ;;  %v6584_v1 = vpop.eup %6583 }
0x1056   : > { %v4116_v27 = vpop.permute.xlu1 %4115  ;;  %v4325_v36 = vcombine.low %v4229_v3, %v4236_v22  ;;  %v5926_v37 = vcombine.high %v4229_v3, %v4236_v22  ;;  %v4341_v31 = vcombine.low %v4245_v18, %v4252_v19  ;;  %v5927_v32 = vcombine.high %v4245_v18, %v4252_v19 }
0x1057   : > { %v4137_v41 = vcombine.low %v7612_v55, %v4116_v27  ;;  %v4138_v42 = vcombine.high %v7612_v55, %v4116_v27  ;;  %v6586_v27 = vpop.eup %6585 }
0x1058   : > { %v4332_v25 = vrot.slane %v4325_v36, %v6938_v38  ;;  %v4340_v16 = vrot.slane %v5926_v37, %v6938_v38  ;;  %v4348_v9 = vrot.slane %v4341_v31, %v6938_v38  ;;  %v4356_v11 = vrot.slane %v5927_v32, %v6938_v38 }
0x1059   : > { %v4145_v14 = vrot.slane %v4137_v41, %v6938_v38  ;;  %v4152_v47 = vrot.slane %v4138_v42, %v6938_v38 }
0x105a   : > { %v4357_v52 = vcombine.low %v4332_v25, %v4340_v16  ;;  %v4373_v17 = vcombine.low %v4348_v9, %v4356_v11  ;;  %v4358_v58 = vcombine.high %v4332_v25, %v4340_v16  ;;  %v4374_v57 = vcombine.high %v4348_v9, %v4356_v11 }
0x105b   : > { %v4153_v51 = vcombine.low %v4129_v43, %v4145_v14  ;;  %v4154_v39 = vcombine.high %v4129_v43, %v4145_v14  ;;  %v4169_v55 = vcombine.low %v4136_v44, %v4152_v47  ;;  %v4170_v15 = vcombine.high %v4136_v44, %v4152_v47 }
0x105c   : > { %v4365_v0 = vrot.slane %v4357_v52, %v6941_v46  ;;  %v4381_v56 = vrot.slane %v4373_v17, %v6941_v46  ;;  %v4372_v36 = vrot.slane %v4358_v58, %v6941_v46  ;;  %v4388_v37 = vrot.slane %v4374_v57, %v6941_v46 }
0x105d   : > { %v4161_v45 = vrot.slane %v4153_v51, %v6941_v46  ;;  %v4168_v5 = vrot.slane %v4154_v39, %v6941_v46  ;;  %v4177_v21 = vrot.slane %v4169_v55, %v6941_v46  ;;  %v4184_v61 = vrot.slane %v4170_v15, %v6941_v46  ;;  %v6588_v15 = vpop.eup %6587 }
0x105e   : > { %v4389_v32 = vcombine.low %v4365_v0, %v4381_v56  ;;  %v4390_v42 = vcombine.high %v4365_v0, %v4381_v56  ;;  %v4674_v43 = vmul.f32 %v6584_v1, %v7618_v24  ;;  %v4673_v25 = vmul.f32 %v6586_v27, %v7614_v20 }
0x105f   : > { %v4257_v30 = vcombine.low %v4161_v45, %v4168_v5  ;;  %v5924_v29 = vcombine.high %v4161_v45, %v4168_v5  ;;  %v4273_v49 = vcombine.low %v4177_v21, %v4184_v61  ;;  %v5925_v62 = vcombine.high %v4177_v21, %v4184_v61 }
0x1060   : > { %v4391_v16 = vcombine.low %v4372_v36, %v4388_v37  ;;  %v4681_v9 = vpack.c.bf16 %v4674_v43, %v4673_v25  ;;  %v4675_v21 = vmul.f32 %v6588_v15, %v7622_v26  ;;  %v4392_v52 = vcombine.high %v4372_v36, %v4388_v37 }
0x1061   : > { %v4264_v63 = vrot.slane %v4257_v30, %v6938_v38  ;;  %v4272_v28 = vrot.slane %v5924_v29, %v6938_v38  ;;  %v4280_v4 = vrot.slane %v4273_v49, %v6938_v38  ;;  %v4288_v7 = vrot.slane %v5925_v62, %v6938_v38 }
0x1063   : > { %v4289_v10 = vcombine.low %v4264_v63, %v4272_v28  ;;  %v4305_v13 = vcombine.low %v4280_v4, %v4288_v7  ;;  %v4290_v3 = vcombine.high %v4264_v63, %v4272_v28  ;;  %v4306_v22 = vcombine.high %v4280_v4, %v4288_v7 }
0x1065   : > { %v4297_v18 = vrot.slane %v4289_v10, %v6941_v46  ;;  %v4313_v19 = vrot.slane %v4305_v13, %v6941_v46  ;;  %v4304_v12 = vrot.slane %v4290_v3, %v6941_v46  ;;  %v4320_v33 = vrot.slane %v4306_v22, %v6941_v46 }
0x1067   : > { %v4321_v31 = vcombine.low %v4297_v18, %v4313_v19  ;;  %v4322_v41 = vcombine.high %v4297_v18, %v4313_v19  ;;  %v4323_v47 = vcombine.low %v4304_v12, %v4320_v33  ;;  %v4324_v5 = vcombine.high %v4304_v12, %v4320_v33 }
0x1069   : > { %v4393_v44 = vpack.c.bf16 %v4389_v32, %v4321_v31  ;;  %v4394_v14 = vpack.c.bf16 %v4390_v42, %v4322_v41  ;;  %v4395_v11 = vpack.c.bf16 %v4391_v16, %v4323_v47  ;;  %v4396_v23 = vpack.c.bf16 %v4392_v52, %v4324_v5 }
0x106b   : > { %6315 = vmatpush3.bf16.msra.mxu0 %v4393_v44  ;;  %6321 = vmatpush3.bf16.msra.mxu1 %v4394_v14 }
0x106c   : > { %6326 = vmatprep.subr.bf16.mxu0 %v6620_v40  ;;  %6332 = vmatprep.subr.bf16.mxu1 %v6620_v40 }
0x106e   : > { %6317 = vmatmul.mubr.msk.bf16.vlgmr.msra.gmra.mrb[32].mxu0 %vm1991_vm2, %v4681_v9 }
0x106f   : > { %6327 = vmatpush3.bf16.msra.mxu0 %v4395_v11  ;;  %6328 = vmatprep.mubr.msk.bf16.mxu0 %vm6621_vm1, %v6620_v40 }
0x1070   : > { %6338 = vmatprep.subr.bf16.mxu0 %v6620_v40 }
0x107e   : > { %v4658_v24 = vpop.xlane.xlu0 %4657 }
0x1082   : > { %v4652_v20 = vpop.xlane.xlu0 %4651 }
0x1083   : > { %6589 = vrcp.f32 %v4652_v20 }
0x1084   : > { %6591 = vrcp.f32 %v4658_v24 }
0x1086   : > { %v4661_v51 = vpop.xlane.xlu0 %4660 }
0x1087   : > { %v4655_v39 = vpop.xlane.xlu1 %4654  ;;  %6593 = vrcp.f32 %v4661_v51 }
0x1088   : > { %6595 = vrcp.f32 %v4655_v39 }
0x108a   : > { %v4664_v55 = vpop.xlane.xlu0 %4663 }
0x108b   : > { %6597 = vrcp.f32 %v4664_v55 }
0x108d   : > { %v6590_v45 = vpop.eup %6589 }
0x108e   : > { %v4676_v61 = vmul.f32 %v6590_v45, %v7635_v60  ;;  %v6592_v30 = vpop.eup %6591 }
0x108f   : > { %v4678_v62 = vmul.f32 %v6592_v30, %v7631_v53  ;;  %v6479_v53 = vld [vmem:[%s7916_s11 + $0x20] sm:$0xff]  }
0x1090   : > { %v4682_v17 = vpack.c.bf16 %v4676_v61, %v4675_v21 }
0x1091   : > { %v6594_v29 = vpop.eup %6593 }
0x1092   : > { %6323 = vmatmul.mubr.msk.bf16.vlgmr.msra.gmra.mrb[56].mxu1 %vm1991_vm2, %v4682_v17  ;;  %v6596_v49 = vpop.eup %6595  ;;  %v4679_v26 = vmul.f32 %v6594_v29, %v7639_v50  ;;  %v6480_v50 = vld [vmem:[%s7916_s11 + $0x28] sm:$0xff]  }
0x1093   : > { %6333 = vmatpush3.bf16.msra.mxu1 %v4396_v23  ;;  %6334 = vmatprep.mubr.msk.bf16.mxu1 %vm6621_vm1, %v6620_v40  ;;  %v4677_v63 = vmul.f32 %v6596_v49, %v7641_v35 }
0x1095   : > { %v6598_v28 = vpop.eup %6597  ;;  %v4683_v4 = vpack.c.bf16 %v4678_v62, %v4677_v63 }
0x1096   : > { %v4680_v60 = vmul.f32 %v6598_v28, %v7645_v54 }
0x1097   : > { %6329 = vmatmul.mubr.msk.bf16.vlgmr.msra.gmra.mrb[36].mxu0 %vm1991_vm2, %v4683_v4 }
0x1098   : > { %v4684_v7 = vpack.c.bf16 %v4680_v60, %v4679_v26  ;;  %6346 = vmatprep.mubr.msk.bf16.mxu0 %vm6621_vm1, %v6620_v40  ;;  %6339 = vmatpush3.bf16.msra.mxu0 %v6479_v53 }
0x1099   : > { %6340 = vmatprep.subr.bf16.mxu0 %v6620_v40 }
0x109a   : > { %6335 = vmatmul.mubr.msk.bf16.vlgmr.msra.gmra.mrb[60].mxu1 %vm1991_vm2, %v4684_v7 }
0x109b   : > { %5395 = vmatprep.mubr.bf16.mxu1 %v6619_v2 }
0x109c   : > { %6341 = vmatpush3.bf16.msra.mxu0 %v6480_v50 }
0x109d   : > { %6342 = vmatprep.subr.bf16.mxu0 %v6620_v40 }
0x1141   : > { %v4722_v35 = vpop.f32.mrb[32].mxu0 }
0x1142   : > { %v6318_v54 = vpop.f32.mrb[33].mxu0 }
0x1143   : > { %v4725_v0 = vpop.f32.mrb[34].mxu0 }
0x1144   : > { %v6319_v56 = vpop.f32.mrb[35].mxu0 }
0x1165   : > { %v4766_v58 = vpop.f32.mrb[56].mxu1 }
0x1166   : > { %v6324_v2 = vpop.f32.mrb[57].mxu1 }
0x1167   : > { %v4769_v57 = vpop.f32.mrb[58].mxu1 }
0x1168   : > { %v6325_v1 = vpop.f32.mrb[59].mxu1 }
0x116a   : > { %v4810_v10 = vpop.f32.mrb[36].mxu0 }
0x116b   : > { %v4861_v13 = vcombine.low %v4722_v35, %v4810_v10  ;;  %v4862_v3 = vcombine.high %v4722_v35, %v4810_v10  ;;  %v6330_v22 = vpop.f32.mrb[37].mxu0 }
0x116c   : > { %v4813_v18 = vpop.f32.mrb[38].mxu0 }
0x116d   : > { %v4854_v19 = vpop.f32.mrb[60].mxu1  ;;  %v4929_v12 = vcombine.low %v4725_v0, %v4813_v18  ;;  %v4930_v33 = vcombine.high %v4725_v0, %v4813_v18  ;;  %v6331_v27 = vpop.f32.mrb[39].mxu0  ;;  %v4869_v44 = vrot.slane %v4861_v13, %v6938_v38  ;;  %v4876_v14 = vrot.slane %v4862_v3, %v6938_v38 }
0x116e   : > { %v6336_v36 = vpop.f32.mrb[61].mxu1  ;;  %v4877_v37 = vcombine.low %v4766_v58, %v4854_v19  ;;  %v4878_v31 = vcombine.high %v4766_v58, %v4854_v19  ;;  %v6481_v58 = vld [vmem:[%s7916_s11 + $0x30] sm:$0xff]  }
0x116f   : > { %v4857_v32 = vpop.f32.mrb[62].mxu1  ;;  %v4937_v16 = vrot.slane %v4929_v12, %v6938_v38  ;;  %v4944_v9 = vrot.slane %v4930_v33, %v6938_v38  ;;  %6343 = vmatpush3.bf16.msra.mxu0 %v6481_v58 }
0x1170   : > { %v4945_v41 = vcombine.low %v4769_v57, %v4857_v32  ;;  %v4946_v42 = vcombine.high %v4769_v57, %v4857_v32  ;;  %v6337_v43 = vpop.f32.mrb[63].mxu1  ;;  %v4885_v47 = vrot.slane %v4877_v37, %v6938_v38  ;;  %v4892_v25 = vrot.slane %v4878_v31, %v6938_v38  ;;  %6344 = vmatprep.subr.bf16.mxu0 %v6620_v40 }
0x1172   : > { %v4953_v11 = vrot.slane %v4945_v41, %v6938_v38  ;;  %v4960_v24 = vrot.slane %v4946_v42, %v6938_v38  ;;  %v4893_v20 = vcombine.low %v4869_v44, %v4885_v47  ;;  %v4894_v51 = vcombine.high %v4869_v44, %v4885_v47  ;;  %v6482_v44 = vld [vmem:[%s7916_s11 + $0x38] sm:$0xff]  }
0x1173   : > { %v4909_v39 = vcombine.low %v4876_v14, %v4892_v25  ;;  %v4910_v55 = vcombine.high %v4876_v14, %v4892_v25  ;;  %6345 = vmatpush3.bf16.msra.mxu0 %v6482_v44 }
0x1174   : > { %v4961_v15 = vcombine.low %v4937_v16, %v4953_v11  ;;  %v4962_v45 = vcombine.high %v4937_v16, %v4953_v11  ;;  %v4977_v5 = vcombine.low %v4944_v9, %v4960_v24  ;;  %v4978_v21 = vcombine.high %v4944_v9, %v4960_v24 }
0x1175   : > { %v4901_v61 = vrot.slane %v4893_v20, %v6941_v46  ;;  %v4908_v52 = vrot.slane %v4894_v51, %v6941_v46  ;;  %v4917_v17 = vrot.slane %v4909_v39, %v6941_v46  ;;  %v4924_v30 = vrot.slane %v4910_v55, %v6941_v46 }
0x1176   : > { %v4969_v23 = vrot.slane %v4961_v15, %v6941_v46  ;;  %v4976_v29 = vrot.slane %v4962_v45, %v6941_v46  ;;  %v4985_v49 = vrot.slane %v4977_v5, %v6941_v46  ;;  %v4992_v62 = vrot.slane %v4978_v21, %v6941_v46 }
0x1177   : > { %v4997_v63 = vcombine.low %v4901_v61, %v4908_v52  ;;  %v5936_v28 = vcombine.high %v4901_v61, %v4908_v52  ;;  %v5013_v26 = vcombine.low %v4917_v17, %v4924_v30  ;;  %v5937_v60 = vcombine.high %v4917_v17, %v4924_v30 }
0x1178   : > { %v5065_v4 = vcombine.low %v4969_v23, %v4976_v29  ;;  %v5938_v7 = vcombine.high %v4969_v23, %v4976_v29  ;;  %v5081_v53 = vcombine.low %v4985_v49, %v4992_v62  ;;  %v5939_v50 = vcombine.high %v4985_v49, %v4992_v62 }
0x1179   : > { %v5004_v35 = vrot.slane %v4997_v63, %v6938_v38  ;;  %v5012_v54 = vrot.slane %v5936_v28, %v6938_v38  ;;  %v5020_v0 = vrot.slane %v5013_v26, %v6938_v38  ;;  %v5028_v56 = vrot.slane %v5937_v60, %v6938_v38  ;;  %v5949_v60 = vld [vmem:[%s7917_s12 + $0x1] ss:$0 sm:$0xff] }
0x117a   : > { %v5072_v2 = vrot.slane %v5065_v4, %v6938_v38  ;;  %v5080_v57 = vrot.slane %v5938_v7, %v6938_v38  ;;  %v5088_v1 = vrot.slane %v5081_v53, %v6938_v38  ;;  %v5096_v10 = vrot.slane %v5939_v50, %v6938_v38 }
0x117b   : > { %v5030_v13 = vcombine.high %v5004_v35, %v5012_v54  ;;  %v5046_v3 = vcombine.high %v5020_v0, %v5028_v56  ;;  %v5029_v22 = vcombine.low %v5004_v35, %v5012_v54  ;;  %v5045_v18 = vcombine.low %v5020_v0, %v5028_v56 }
0x117c   : > { %v5098_v19 = vcombine.high %v5072_v2, %v5080_v57  ;;  %v5114_v12 = vcombine.high %v5088_v1, %v5096_v10  ;;  %v5097_v33 = vcombine.low %v5072_v2, %v5080_v57  ;;  %v5113_v27 = vcombine.low %v5088_v1, %v5096_v10 }
0x117d   : > { %v5044_v36 = vrot.slane %v5030_v13, %v6941_v46  ;;  %v5060_v37 = vrot.slane %v5046_v3, %v6941_v46  ;;  %v5037_v31 = vrot.slane %v5029_v22, %v6941_v46  ;;  %v5053_v32 = vrot.slane %v5045_v18, %v6941_v46 }
0x117e   : > { %v5112_v38 = vrot.slane %v5098_v19, %v6941_v46  ;;  %v5128_v41 = vrot.slane %v5114_v12, %v6941_v46  ;;  %v5105_v42 = vrot.slane %v5097_v33, %v6941_v46  ;;  %v5121_v43 = vrot.slane %v5113_v27, %v6941_v46  ;;  %v6485_v12 = vld [vmem:[%s7920_s15 + $0x44] ss:$8 sps:$4 sm:$0xff]   ;;  %v6483_v33 = vld [vmem:[%s7920_s15 + $0x40] ss:$8 sps:$4 sm:$0xff]   ;;  %v6488_v27 = vld [vmem:[%s7920_s15 + $0x54] ss:$8 sps:$4 sm:$0xff]  }
0x117f   : > { %v5063_v14 = vcombine.low %v5044_v36, %v5060_v37  ;;  %v5061_v47 = vcombine.low %v5037_v31, %v5053_v32  ;;  %v5062_v25 = vcombine.high %v5037_v31, %v5053_v32  ;;  %v5064_v16 = vcombine.high %v5044_v36, %v5060_v37  ;;  %5363 = vmatprep.subr.bf16.mxu1 %v6485_v12  ;;  %v6486_v36 = vld [vmem:[%s7920_s15 + $0x50] ss:$8 sps:$4 sm:$0xff]   ;;  %v6491_v37 = vld [vmem:[%s7920_s15 + $0x64] ss:$8 sps:$4 sm:$0xff]   ;;  %v6489_v31 = vld [vmem:[%s7920_s15 + $0x60] ss:$8 sps:$4 sm:$0xff]  }
0x1180   : > { %v5131_v9 = vcombine.low %v5112_v38, %v5128_v41  ;;  %v5130_v11 = vcombine.high %v5105_v42, %v5121_v43  ;;  %v5129_v24 = vcombine.low %v5105_v42, %v5121_v43  ;;  %v5132_v20 = vcombine.high %v5112_v38, %v5128_v41  ;;  %5364 = vmatpush1.bf16.msra.mxu1 %v6483_v33  ;;  %v6494_v32 = vld [vmem:[%s7920_s15 + $0x74] ss:$8 sps:$4 sm:$0xff]   ;;  %v6492_v38 = vld [vmem:[%s7920_s15 + $0x70] ss:$8 sps:$4 sm:$0xff]  }
0x1181   : > { %5365 = vmatprep.subr.bf16.mxu1 %v6488_v27 }
0x1182   : > { %v6401_v51 = vpack.i.bf16 %v5131_v9, %v5063_v14  ;;  %v6396_v39 = vpack.i.bf16 %v5130_v11, %v5062_v25  ;;  %v6406_v55 = vpack.i.bf16 %v5132_v20, %v5064_v16  ;;  %v5957_v16 = vld [vmem:[%s7918_s13 + $0x1] ss:$0 sm:$0xff] }
0x1184   : > { %6402 = vrot.lane.b32.xlu0 %v6401_v51, %s7955_s20  ;;  %6397 = vrot.lane.b32.xlu1 %v6396_v39, %s7956_s1  ;;  %v5958_v51 = vld [vmem:[%s7919_s14 + $0x1] ss:$0 sm:$0xff] }
0x1185   : > { %5366 = vmatpush1.bf16.msra.mxu1 %v6486_v36 }
0x1186   : > { %5367 = vmatprep.subr.bf16.mxu1 %v6491_v37 }
0x1188   : > { %6407 = vrot.lane.b32.xlu1 %v6406_v55, %s7957_s4  ;;  %s658_s4 = scalar_lea.vmem %s7926_s21, %s6036_s28 }
0x1189   : > { %5368 = vmatpush1.bf16.msra.mxu1 %v6489_v31 }
0x118a   : > { %5369 = vmatprep.subr.bf16.mxu1 %v6494_v32 }
0x118d   : > { %5370 = vmatpush1.bf16.msra.mxu1 %v6492_v38 }
0x118e   : > { %6350 = vmatprep.subr.bf16.mxu1 %v6620_v40 }
0x11f6   : > { %v6403_v46 = vpop.permute.xlu0 %6402  ;;  %v6398_v15 = vpop.permute.xlu1 %6397 }
0x11f7   : > { %v6400_v45 = vunpack.i.h.bf16 %v6398_v15  ;;  %v6399_v5 = vunpack.i.l.bf16 %v6398_v15  ;;  %v6405_v21 = vunpack.i.h.bf16 %v6403_v46  ;;  %v6404_v61 = vunpack.i.l.bf16 %v6403_v46 }
0x11f9   : > { %v5157_v52 = vsel %vm1991_vm2, %v5061_v47, %v6399_v5  ;;  %v5158_v17 = vsel %vm1991_vm2, %v5129_v24, %v6400_v45  ;;  %v6495_v45 = vld [vmem:[%s7922_s17 + $0xc0] sm:$0xff]  }
0x11fa   : > { %v6408_v30 = vpop.permute.xlu1 %6407  ;;  %v5159_v49 = vsel %vm2754_vm3, %v5157_v52, %v6404_v61  ;;  %v5160_v62 = vsel %vm2754_vm3, %v5158_v17, %v6405_v21  ;;  %v6496_v5 = vld [vmem:[%s7922_s17 + $0x80] sm:$0xff]   ;;  %6131 = vmatprep.subr.bf16.mxu0 %v6495_v45  ;;  %v6497_v21 = vld [vmem:[%s7922_s17 + $0xc8] sm:$0xff]   ;;  %v6499_v52 = vld [vmem:[%s7922_s17 + $0xd0] sm:$0xff]  }
0x11fb   : > { %v6410_v23 = vunpack.i.h.bf16 %v6408_v30  ;;  %v6409_v29 = vunpack.i.l.bf16 %v6408_v30  ;;  %v6498_v61 = vld [vmem:[%s7922_s17 + $0x88] sm:$0xff]   ;;  %v6500_v17 = vld [vmem:[%s7922_s17 + $0x90] sm:$0xff]   ;;  %v6501_v30 = vld [vmem:[%s7922_s17 + $0xd8] sm:$0xff]  }
0x11fd   : > { %v5161_v63 = vsel %vm2757_vm4, %v5159_v49, %v6409_v29  ;;  %v5162_v28 = vsel %vm2757_vm4, %v5160_v62, %v6410_v23  ;;  %v6502_v23 = vld [vmem:[%s7922_s17 + $0x98] sm:$0xff]   ;;  %v6503_v29 = vld [vmem:[%s7922_s17 + $0xe0] sm:$0xff]   ;;  %v6505_v62 = vld [vmem:[%s7922_s17 + $0xe8] sm:$0xff]  }
0x11fe   : > { %v5163_v26 = vpack.c.bf16 %v5162_v28, %v5161_v63  ;;  %v6504_v49 = vld [vmem:[%s7922_s17 + $0xa0] sm:$0xff]   ;;  %v6506_v63 = vld [vmem:[%s7922_s17 + $0xa8] sm:$0xff]   ;;  %v6507_v28 = vld [vmem:[%s7922_s17 + $0xf0] sm:$0xff]  }
0x1200   : > { %6347 = vmatmul.mubr.msk.bf16.vlgmr.msra.gmra.mrb[40].mxu0 %vm769_vm0, %v5163_v26  ;;  %v6508_v26 = vld [vmem:[%s7922_s17 + $0xb0] sm:$0xff]  }
0x1201   : > { %6132 = vmatpush3.bf16.msra.mxu0 %v6496_v5 }
0x1202   : > { %6133 = vmatprep.subr.bf16.mxu0 %v6497_v21 }
0x1205   : > { %6134 = vmatpush3.bf16.msra.mxu0 %v6498_v61 }
0x1206   : > { %6135 = vmatprep.subr.bf16.mxu0 %v6499_v52 }
0x1209   : > { %6136 = vmatpush3.bf16.msra.mxu0 %v6500_v17  ;;  %v6512_v17 = vld [vmem:[%s7924_s19 + $0x8] sm:$0xff]  }
0x120a   : > { %6137 = vmatprep.subr.bf16.mxu0 %v6501_v30  ;;  %v6513_v30 = vld [vmem:[%s7924_s19 + $0x10] sm:$0xff]  }
0x120d   : > { %6138 = vmatpush3.bf16.msra.mxu0 %v6502_v23  ;;  %v6514_v23 = vld [vmem:[%s7924_s19 + $0x18] sm:$0xff]  }
0x120e   : > { %6139 = vmatprep.subr.bf16.mxu0 %v6503_v29 }
0x1211   : > { %6140 = vmatpush3.bf16.msra.mxu0 %v6504_v49  ;;  %v6010_v49 = vld [vmem:[%s7923_s18 + $0x1] ss:$0 sm:$0xff] }
0x1212   : > { %6141 = vmatprep.subr.bf16.mxu0 %v6505_v62 }
0x1215   : > { %6142 = vmatpush3.bf16.msra.mxu0 %v6506_v63 }
0x1216   : > { %6143 = vmatprep.subr.bf16.mxu0 %v6507_v28 }
0x1219   : > { %6144 = vmatpush3.bf16.msra.mxu0 %v6508_v26 }
0x12d3   : > { %v5242_v4 = vpop.f32.mrb[40].mxu0 }
0x12d4   : > { %v5243_v7 = vadd.f32 %v5949_v60, %v5242_v4  ;;  %v6348_v53 = vpop.f32.mrb[41].mxu0  ;;  %v6511_v4 = vld [vmem:[%s7924_s19] sm:$0xff]  }
0x12d5   : > { %v5245_v50 = vpop.f32.mrb[42].mxu0  ;;  %v5967_v53 = vld [vmem:[%s7921_s16 + $0x2] sm:$0x3] }
0x12d6   : > { %v7775_v35 = vadd.f32 %v5243_v7, %v7358_v6  ;;  %v5246_v54 = vadd.f32 %v5949_v60, %v5245_v50  ;;  %v6349_v0 = vpop.f32.mrb[43].mxu0  ;;  %v6509_v60 = vld [vmem:[%s7922_s17 + $0xf8] sm:$0xff]   ;;  %v5313_v50 = vrot.slane %v5967_v53, %v2903_v48 }
0x12d7   : > { %v6510_v7 = vld [vmem:[%s7922_s17 + $0xb8] sm:$0xff]   ;;  %6145 = vmatprep.subr.bf16.mxu0 %v6509_v60 }
0x12d8   : > { %v7778_v56 = vadd.f32 %v5246_v54, %v7361_v8  ;;  %v5255_v58 = vsel %vm769_vm0, %v7775_v35, 0.0  ;;  %6146 = vmatpush3.bf16.msra.mxu0 %v6510_v7  ;;  %v5317_v54 = vrot.slane %v5967_v53, %v2907_v59 }
0x12d9   : > { %5256 = vadd.xlane.f32.xlu1 %v5255_v58 }
0x12da   : > { %v5258_v2 = vsel %vm769_vm0, %v7778_v56, 0.0 }
0x12db   : > { %5259 = vadd.xlane.f32.xlu0 %v5258_v2 }
0x1366   : > { %v5257_v57 = vpop.xlane.xlu1 %5256 }
0x1367   : > { %v5261_v1 = vmul.f32 0.015625, %v5257_v57 }
0x1368   : > { %v5260_v10 = vpop.xlane.xlu0 %5259 }
0x1369   : > { %v5263_v13 = vsub.f32 %v7775_v35, %v5261_v1  ;;  %v5262_v6 = vmul.f32 0.015625, %v5260_v10 }
0x136b   : > { %v5264_v3 = vsub.f32 %v7778_v56, %v5262_v6  ;;  %v5265_v22 = vmul.f32 %v5263_v13, %v5263_v13 }
0x136d   : > { %v5267_v8 = vsel %vm769_vm0, %v5265_v22, 0.0  ;;  %v5266_v18 = vmul.f32 %v5264_v3, %v5264_v3 }
0x136e   : > { %5268 = vadd.xlane.f32.xlu0 %v5267_v8 }
0x136f   : > { %v5270_v19 = vsel %vm769_vm0, %v5266_v18, 0.0 }
0x1370   : > { %5271 = vadd.xlane.f32.xlu1 %v5270_v19 }
0x13fb   : > { %v5269_v41 = vpop.xlane.xlu0 %5268 }
0x13fc   : > { %v5273_v42 = vmul.f32 0.015625, %v5269_v41 }
0x13fd   : > { %v5272_v43 = vpop.xlane.xlu1 %5271 }
0x13fe   : > { %v5275_v44 = vadd.f32 1e-05, %v5273_v42  ;;  %v5274_v14 = vmul.f32 0.015625, %v5272_v43 }
0x1400   : > { %6599 = vrsqrt.f32 %v5275_v44  ;;  %v5276_v47 = vadd.f32 1e-05, %v5274_v14 }
0x1402   : > { %6601 = vrsqrt.f32 %v5276_v47 }
0x140a   : > { %v6600_v25 = vpop.eup %6599 }
0x140b   : > { %v5279_v9 = vmul.f32 %v6600_v25, %v5263_v13 }
0x140c   : > { %v6602_v11 = vpop.eup %6601 }
0x140d   : > { %v5287_v24 = vmul.f32 %v5957_v16, %v5279_v9  ;;  %v5280_v20 = vmul.f32 %v6602_v11, %v5264_v3 }
0x140f   : > { %v5288_v39 = vmul.f32 %v5957_v16, %v5280_v20  ;;  %v5295_v55 = vadd.f32 %v5958_v51, %v5287_v24 }
0x1411   : > { %v5296_v46 = vadd.f32 %v5958_v51, %v5288_v39 }
0x1413   : > { %v5297_v15 = vpack.c.bf16 %v5296_v46, %v5295_v55 }
0x1415   : > { %5976 = vmatmul.mubr.msk.bf16.vlgmr.msra.gmra.mrb[64].mxu1 %vm769_vm0, %v5297_v15 }
0x1416   : > { %6358 = vmatprep.mubr.msk.bf16.mxu1 %vm6621_vm1, %v6620_v40  ;;  %6351 = vmatpush3.bf16.msra.mxu1 %v6511_v4 }
0x1417   : > { %6352 = vmatprep.subr.bf16.mxu1 %v6620_v40 }
0x141a   : > { %6353 = vmatpush3.bf16.msra.mxu1 %v6512_v17 }
0x141b   : > { %6354 = vmatprep.subr.bf16.mxu1 %v6620_v40 }
0x141e   : > { %6355 = vmatpush3.bf16.msra.mxu1 %v6513_v30 }
0x141f   : > { %6356 = vmatprep.subr.bf16.mxu1 %v6620_v40  ;;  %v6027_v40 = vld [vmem:[#allocation2] ss:$0 sm:$0xff] }
0x1422   : > { %6357 = vmatpush3.bf16.msra.mxu1 %v6514_v23 }
0x14e8   : > { %v5397_v0 = vpop.f32.mrb[64].mxu1 }
0x14e9   : > { %v5398_v58 = vadd.f32 %v5397_v0, %v5313_v50  ;;  %v5399_v2 = vpop.f32.mrb[65].mxu1 }
0x14ea   : > { %v5400_v57 = vadd.f32 %v5399_v2, %v5317_v54  ;;  %v5401_v1 = vpop.f32.mrb[66].mxu1 }
0x14eb   : > { %v5410_v10 = vmul.f32 %v5398_v58, %v5398_v58  ;;  %v5402_v13 = vadd.f32 %v5401_v1, %v5313_v50  ;;  %v5403_v6 = vpop.f32.mrb[67].mxu1  ;;  %v5406_v24 = vmul.f32 0.5, %v5398_v58 }
0x14ec   : > { %v5411_v3 = vmul.f32 %v5400_v57, %v5400_v57  ;;  %v5404_v22 = vadd.f32 %v5403_v6, %v5317_v54  ;;  %v5407_v39 = vmul.f32 0.5, %v5400_v57 }
0x14ed   : > { %v5414_v8 = vmul.f32 %v5410_v10, %v5398_v58  ;;  %v5412_v18 = vmul.f32 %v5402_v13, %v5402_v13  ;;  %v5408_v20 = vmul.f32 0.5, %v5402_v13 }
0x14ee   : > { %v5415_v19 = vmul.f32 %v5411_v3, %v5400_v57  ;;  %v5413_v12 = vmul.f32 %v5404_v22, %v5404_v22  ;;  %v5409_v55 = vmul.f32 0.5, %v5404_v22 }
0x14ef   : > { %v5418_v33 = vmul.f32 0.044715, %v5414_v8  ;;  %v5416_v27 = vmul.f32 %v5412_v18, %v5402_v13 }
0x14f0   : > { %v5419_v48 = vmul.f32 0.044715, %v5415_v19  ;;  %v5417_v36 = vmul.f32 %v5413_v12, %v5404_v22 }
0x14f1   : > { %v5422_v34 = vadd.f32 %v5418_v33, %v5398_v58  ;;  %v5420_v59 = vmul.f32 0.044715, %v5416_v27 }
0x14f2   : > { %v5423_v37 = vadd.f32 %v5419_v48, %v5400_v57  ;;  %v5421_v31 = vmul.f32 0.044715, %v5417_v36 }
0x14f3   : > { %v5426_v32 = vmul.f32 0.7978846, %v5422_v34  ;;  %v5424_v38 = vadd.f32 %v5420_v59, %v5402_v13 }
0x14f4   : > { %v5427_v41 = vmul.f32 0.7978846, %v5423_v37  ;;  %v5425_v42 = vadd.f32 %v5421_v31, %v5404_v22 }
0x14f5   : > { %6603 = vtanh.f32 %v5426_v32  ;;  %v5428_v43 = vmul.f32 0.7978846, %v5424_v38 }
0x14f6   : > { %6605 = vtanh.f32 %v5427_v41  ;;  %v5429_v44 = vmul.f32 0.7978846, %v5425_v42 }
0x14f7   : > { %6607 = vtanh.f32 %v5428_v43 }
0x14f8   : > { %6609 = vtanh.f32 %v5429_v44 }
0x14ff   : > { %v6604_v14 = vpop.eup %6603 }
0x1500   : > { %v6606_v47 = vpop.eup %6605  ;;  %v5434_v25 = vadd.f32 1.0, %v6604_v14 }
0x1501   : > { %v6608_v16 = vpop.eup %6607  ;;  %v5435_v9 = vadd.f32 1.0, %v6606_v47 }
0x1502   : > { %v6610_v11 = vpop.eup %6609  ;;  %v5436_v51 = vadd.f32 1.0, %v6608_v16  ;;  %v5438_v15 = vmul.f32 %v5434_v25, %v5406_v24 }
0x1503   : > { %v5437_v46 = vadd.f32 1.0, %v6610_v11  ;;  %v5439_v5 = vmul.f32 %v5435_v9, %v5407_v39 }
0x1504   : > { %v5440_v45 = vmul.f32 %v5436_v51, %v5408_v20 }
0x1505   : > { %v5441_v21 = vmul.f32 %v5437_v46, %v5409_v55 }
0x1506   : > { %v5442_v61 = vpack.c.bf16 %v5440_v45, %v5438_v15 }
0x1507   : > { %v5443_v52 = vpack.c.bf16 %v5441_v21, %v5439_v5 }
0x1509   : > { %5613 = vmatprep.mubr.bf16.mxu0 %v5443_v52 }
0x150a   : > { %5614 = vmatmul.mubr.bf16.vlgmr.msra.gmra.mrb[44].mxu0 %v5442_v61 }
0x15dd   : > { %v6147_v29 = vpop.f32.mrb[44].mxu0 }
0x15de   : > { %v6148_v62 = vpop.f32.mrb[45].mxu0 }
0x15df   : > { %v6149_v63 = vadd.f32 %v6148_v62, %v6147_v29  ;;  %v6150_v28 = vpop.f32.mrb[46].mxu0 }
0x15e0   : > { %v6151_v26 = vpop.f32.mrb[47].mxu0 }
0x15e1   : > { %v5616_v60 = vadd.f32 %v6149_v63, %v6010_v49  ;;  %v6152_v4 = vadd.f32 %v6151_v26, %v6150_v28 }
0x15e3   : > { %v5619_v7 = vadd.f32 %v6152_v4, %v6010_v49  ;;  %v5622_v53 = vadd.f32 %v5616_v60, %v7775_v35 }
0x15e5   : > { %v5623_v50 = vadd.f32 %v5619_v7, %v7778_v56 }
0x15e7   : > { %v5624_v54 = vpack.c.bf16 %v5623_v50, %v5622_v53 }
0x15e9   : > { %6359 = vmatmul.mubr.msk.bf16.vlgmr.msra.gmra.mrb[68].mxu1 %vm769_vm0, %v5624_v54 }
0x16bc   : > { %v5701_v0 = vpop.f32.mrb[68].mxu1 }
0x16bd   : > { %v5702_v58 = vadd.f32 %v6027_v40, %v5701_v0  ;;  %v6360_v2 = vpop.f32.mrb[69].mxu1 }
0x16be   : > { %v5704_v57 = vpop.f32.mrb[70].mxu1 }
0x16bf   : > { %5709 = vst.msk [vmem:[%s658_s4] sm:$0xff] %vm5708_vm5, %v5702_v58  ;;  %v5705_v1 = vadd.f32 %v6027_v40, %v5704_v57  ;;  %v6361_v10 = vpop.f32.mrb[71].mxu1 }
0x16c1   : > { %5710 = vst.msk [vmem:[%s658_s4 + $0x8] sm:$0xff] %vm5708_vm5, %v5705_v1 }
0x16c2 PF: > { %s33_s26 = sadd.s32 1, %s6617_s26  }
0x16c3   : > { %p30_p4 = scmp.ge.s32.totalorder %s33_s26, 4  }
0x16c5   :  { %32 = sbr.rel (!%p30_p4) target bundleno = 7 (0x7), region = 150 }

</bundles_post_ra>
